<compile_context>
chip_gen: v6e
topology: v6e:2x2x1
jax: 0.10.0
libtpu: 0.0.40
codegen_flags: <defaults>
</compile_context>

<pallas_src>
import jax
import jax.numpy as jnp
from jax.experimental import pallas as pl
from jax.experimental.pallas import tpu as pltpu

BN_EPS = 1e-5
_LANE = 128


# --------------------------------------------------------------------------- #
# Chip-aware knobs
# --------------------------------------------------------------------------- #
def _round_up(x, m):
    return (x + m - 1) // m * m


def _vmem_limit_bytes():
    try:
        cap = pltpu.get_tpu_info().vmem_capacity_bytes
    except Exception:
        cap = 64 * 1024 * 1024
    return int(cap * 0.75)           # headroom for compiler scratch / semaphores


def _prefer_wide_tiles():
    try:
        return "v5" not in jax.devices()[0].device_kind.lower()
    except Exception:
        return True


def _pick_tc(c):
    prefs = (256, 128) if _prefer_wide_tiles() else (128, 256)
    for t in prefs:
        if c % t == 0:
            return t
    return c


def _pick_rows(rows):
    for t in (1024, 512, 256, 128, 64, 32, 16, 8):
        if rows % t == 0:
            return t
    return rows


def _compiler_params(dimension_semantics):
    return pltpu.CompilerParams(
        dimension_semantics=dimension_semantics,
        vmem_limit_bytes=_vmem_limit_bytes(),
    )


# --------------------------------------------------------------------------- #
# In-kernel helpers
# --------------------------------------------------------------------------- #
def _fill_pad_and_col(z, cin, pad_ref, col_ref):
    """Write z=(Hp,Wp,cin) bf16 into pad_ref=(Hp+2,Wp+2,CK) with a zero ring and
    build the 3x3-tap im2col slab col_ref=(Hp*Wp, 9*CK).  Runs once per image.
    CK is cin rounded up to a lane multiple so every tap store is a 128-aligned
    full-width store (matching weight rows are zero-padded on the host)."""
    Hp2, Wp2, CK = pad_ref.shape
    Hp, Wp = Hp2 - 2, Wp2 - 2
    dt = pad_ref.dtype
    if cin == CK:
        # Channels already lane-aligned: zero only the 1-pixel border strips.
        pad_ref[0:1, :, :] = jnp.zeros((1, Wp2, CK), dt)
        pad_ref[Hp + 1:Hp + 2, :, :] = jnp.zeros((1, Wp2, CK), dt)
        pad_ref[:, 0:1, :] = jnp.zeros((Hp2, 1, CK), dt)
        pad_ref[:, Wp + 1:Wp + 2, :] = jnp.zeros((Hp2, 1, CK), dt)
        pad_ref[1:Hp + 1, 1:Wp + 1, :] = z
    else:
        # Channel-padding lanes must also be zero -> clear the whole (small) slab.
        pad_ref[...] = jnp.zeros(pad_ref.shape, dt)
        pad_ref[1:Hp + 1, 1:Wp + 1, 0:cin] = z
    for t in range(9):
        dy, dx = divmod(t, 3)
        tap = pad_ref[dy:dy + Hp, dx:dx + Wp, :].reshape(Hp * Wp, CK)
        col_ref[:, t * CK:(t + 1) * CK] = tap       # 128-aligned full-width store


def _matmul_out(w_ref, y_ref, stats_ref, col_ref):
    """Single K-folded MXU dot (K = 9*CK) -> bf16 output + f32 BN statistics."""
    acc = jnp.dot(col_ref[...], w_ref[...], preferred_element_type=jnp.float32)
    y_ref[0] = acc.astype(y_ref.dtype)
    stats_ref[0, 0:1, :] = jnp.sum(acc, axis=0, keepdims=True)
    stats_ref[0, 1:2, :] = jnp.sum(acc * acc, axis=0, keepdims=True)


# --------------------------------------------------------------------------- #
# Pallas kernels
# --------------------------------------------------------------------------- #
def _conv1_kernel(x_ref, w_ref, y_ref, stats_ref, pad_ref, col_ref):
    # x_ref:   (1, Hp, Wp, Cin) bf16 pooled input (not padded)
    # w_ref:   (9*CK, TC) bf16       K-folded, channel-padded 3x3 weights
    # y_ref:   (1, Hp*Wp, TC) bf16   pre-BN conv output (flat spatial)
    # stats:   (1, 2, TC) f32        per-image [sum, sumsq]
    cin = x_ref.shape[3]

    @pl.when(pl.program_id(1) == 0)      # pad + im2col once per image,
    def _prologue():                     # not once per Cout tile
        _fill_pad_and_col(x_ref[0], cin, pad_ref, col_ref)

    _matmul_out(w_ref, y_ref, stats_ref, col_ref)


def _conv2_kernel(y1_ref, scale_ref, shift_ref, w_ref, y_ref, stats_ref,
                  pad_ref, col_ref):
    # y1_ref:      (1, Hp*Wp, Cmid) bf16 pre-BN conv1 output
    # scale/shift: (1, Cmid) f32         folded BN1 affine
    cmid = y1_ref.shape[2]
    Hp, Wp = pad_ref.shape[0] - 2, pad_ref.shape[1] - 2

    @pl.when(pl.program_id(1) == 0)
    def _prologue():
        # Fused BN1 + ReLU straight into the padded VMEM slab (never HBM).
        z = jnp.maximum(
            y1_ref[0].astype(jnp.float32) * scale_ref[...] + shift_ref[...], 0.0)
        _fill_pad_and_col(z.astype(pad_ref.dtype).reshape(Hp, Wp, cmid),
                          cmid, pad_ref, col_ref)

    _matmul_out(w_ref, y_ref, stats_ref, col_ref)


def _bnrelu_kernel(y_ref, scale_ref, shift_ref, o_ref):
    # Streaming BN-apply + ReLU epilogue on flattened (rows, C) tiles.
    o_ref[...] = jnp.maximum(
        y_ref[...].astype(jnp.float32) * scale_ref[...] + shift_ref[...], 0.0)


# --------------------------------------------------------------------------- #
# pallas_call wrappers
# --------------------------------------------------------------------------- #
def _fold_weights(w, ck):
    # HWIO (3,3,Cin,Cout) -> (9*CK, Cout) bf16, zero-padding Cin -> CK so the K
    # layout matches the 128-aligned tap groups of the im2col slab.
    _, _, cin, cout = w.shape
    w9 = w.reshape(9, cin, cout)
    if ck != cin:
        w9 = jnp.zeros((9, ck, cout), w.dtype).at[:, :cin, :].set(w9)
    return w9.reshape(9 * ck, cout).astype(jnp.bfloat16)


def conv3x3_stats(pooled, w):
    # pooled: (N, Hp, Wp, Cin) bf16 ; w: (3,3,Cin,Cout) f32 (HWIO)
    N, Hp, Wp, Cin = pooled.shape
    Cout = w.shape[-1]
    TC = _pick_tc(Cout)
    CK = _round_up(Cin, _LANE)
    M = Hp * Wp
    wK = _fold_weights(w, CK)
    return pl.pallas_call(
        _conv1_kernel,
        out_shape=[jax.ShapeDtypeStruct((N, M, Cout), jnp.bfloat16),
                   jax.ShapeDtypeStruct((N, 2, Cout), jnp.float32)],
        grid=(N, Cout // TC),
        in_specs=[pl.BlockSpec((1, Hp, Wp, Cin), lambda n, j: (n, 0, 0, 0)),
                  pl.BlockSpec((9 * CK, TC), lambda n, j: (0, j))],
        out_specs=[pl.BlockSpec((1, M, TC), lambda n, j: (n, 0, j)),
                   pl.BlockSpec((1, 2, TC), lambda n, j: (n, 0, j))],
        scratch_shapes=[pltpu.VMEM((Hp + 2, Wp + 2, CK), jnp.bfloat16),
                        pltpu.VMEM((M, 9 * CK), jnp.bfloat16)],
        compiler_params=_compiler_params(("parallel", "arbitrary")),
    )(pooled, wK)


def bnrelu_conv3x3_stats(y1, scale, shift, w, Hp, Wp):
    # y1: (N, Hp*Wp, Cmid) bf16 ; scale/shift: (1, Cmid) f32 ; w: (3,3,Cmid,Cout)
    N, M, Cmid = y1.shape
    Cout = w.shape[-1]
    TC = _pick_tc(Cout)
    CK = _round_up(Cmid, _LANE)
    wK = _fold_weights(w, CK)
    return pl.pallas_call(
        _conv2_kernel,
        out_shape=[jax.ShapeDtypeStruct((N, M, Cout), jnp.bfloat16),
                   jax.ShapeDtypeStruct((N, 2, Cout), jnp.float32)],
        grid=(N, Cout // TC),
        in_specs=[pl.BlockSpec((1, M, Cmid), lambda n, j: (n, 0, 0)),
                  pl.BlockSpec((1, Cmid), lambda n, j: (0, 0)),
                  pl.BlockSpec((1, Cmid), lambda n, j: (0, 0)),
                  pl.BlockSpec((9 * CK, TC), lambda n, j: (0, j))],
        out_specs=[pl.BlockSpec((1, M, TC), lambda n, j: (n, 0, j)),
                   pl.BlockSpec((1, 2, TC), lambda n, j: (n, 0, j))],
        scratch_shapes=[pltpu.VMEM((Hp + 2, Wp + 2, CK), jnp.bfloat16),
                        pltpu.VMEM((M, 9 * CK), jnp.bfloat16)],
        compiler_params=_compiler_params(("parallel", "arbitrary")),
    )(y1, scale, shift, wK)


def bnrelu(y_flat, scale, shift):
    # y_flat: (R, C) bf16 ; scale/shift: (1, C) f32 -> (R, C) f32
    R, C = y_flat.shape
    TR = _pick_rows(R)
    return pl.pallas_call(
        _bnrelu_kernel,
        out_shape=jax.ShapeDtypeStruct((R, C), jnp.float32),
        grid=(R // TR,),
        in_specs=[pl.BlockSpec((TR, C), lambda i: (i, 0)),
                  pl.BlockSpec((1, C), lambda i: (0, 0)),
                  pl.BlockSpec((1, C), lambda i: (0, 0))],
        out_specs=pl.BlockSpec((TR, C), lambda i: (i, 0)),
        compiler_params=_compiler_params(("parallel",)),
    )(y_flat, scale, shift)


# --------------------------------------------------------------------------- #
# BatchNorm glue: finalize single-pass statistics -> folded affine (tiny)
# --------------------------------------------------------------------------- #
def _bn_affine(stats, gamma, beta, count):
    # stats: (N, 2, C) per-image [sum, sumsq]; training-mode biased variance.
    s = jnp.sum(stats[:, 0, :], axis=0)
    ss = jnp.sum(stats[:, 1, :], axis=0)
    mean = s / count
    var = jnp.maximum(ss / count - mean * mean, 0.0)
    inv = jax.lax.rsqrt(var + BN_EPS)
    scale = gamma * inv
    shift = beta - mean * scale
    return scale.reshape(1, -1), shift.reshape(1, -1)


# --------------------------------------------------------------------------- #
# Down = MaxPool2d(2) -> DoubleConv (conv-BN-ReLU x2), forward pass
# --------------------------------------------------------------------------- #
def down_forward_nhwc(params, x):
    # x: (N, H, W, Cin) f32 NHWC -> (N, H//2, W//2, Cout) f32 NHWC.
    N, H, W, Cin = x.shape
    Hp, Wp = H // 2, W // 2
    count = N * Hp * Wp

    # 2x2/2 max-pool + bf16 cast: cheap XLA glue.
    # TODO(synk): fold the pool into the conv1 prologue to drop one small HBM
    #             round trip of the pooled activation.
    pooled = x.reshape(N, Hp, 2, Wp, 2, Cin).max(axis=(2, 4)).astype(jnp.bfloat16)

    # conv1 (+ per-image BN1 statistics from the f32 accumulator)
    y1, stats1 = conv3x3_stats(pooled, params["w1"])
    scale1, shift1 = _bn_affine(stats1, params["g1"], params["b1"], count)

    # BN1+ReLU fused into conv2's once-per-image prologue; conv2 (+ BN2 stats)
    y2, stats2 = bnrelu_conv3x3_stats(y1, scale1, shift1, params["w2"], Hp, Wp)
    scale2, shift2 = _bn_affine(stats2, params["g2"], params["b2"], count)

    # BN2 + ReLU streaming epilogue over the flattened lane-dense layout
    Cout = y2.shape[-1]
    out = bnrelu(y2.reshape(N * Hp * Wp, Cout), scale2, shift2)
    return out.reshape(N, Hp, Wp, Cout)


def down_forward(params, x_nchw):
    # NCHW public interface matching the PyTorch module.  A full UNet should
    # call down_forward_nhwc directly and keep NHWC end-to-end.
    x = jnp.transpose(x_nchw, (0, 2, 3, 1)).astype(jnp.float32)
    out = down_forward_nhwc(params, x)
    return jnp.transpose(out, (0, 3, 1, 2))


# --------------------------------------------------------------------------- #
# Deterministic parameter init (shapes as in the PyTorch __init__)
# --------------------------------------------------------------------------- #
def init_down_params(key, in_channels, out_channels, mid_channels=None):
    mid = mid_channels or out_channels
    k1, k2 = jax.random.split(key)

    def conv_w(k, cin, cout):                  # HWIO, PyTorch default init range
        bound = 1.0 / jnp.sqrt(cin * 9.0)
        return jax.random.uniform(k, (3, 3, cin, cout), jnp.float32, -bound, bound)

    return {
        "w1": conv_w(k1, in_channels, mid),
        "g1": jnp.ones((mid,), jnp.float32),
        "b1": jnp.zeros((mid,), jnp.float32),
        "w2": conv_w(k2, mid, out_channels),
        "g2": jnp.ones((out_channels,), jnp.float32),
        "b2": jnp.zeros((out_channels,), jnp.float32),
    }


if __name__ == "__main__":
    in_channels, out_channels = 4, 32
    N, H, W = 2, 16, 16

    key = jax.random.PRNGKey(0)
    kp, kx = jax.random.split(key)
    params = init_down_params(kp, in_channels, out_channels)
    x = jax.random.normal(kx, (N, in_channels, H, W), jnp.float32)

    fwd = jax.jit(down_forward)
    out = fwd(params, x)
    jax.block_until_ready(out)

    assert out.shape == (N, out_channels, H // 2, W // 2), out.shape
    assert bool(jnp.all(jnp.isfinite(out)))
    print("KERNEL_OK")
</pallas_src>

<mosaic_0001>
module attributes {stable_mosaic.version = 11 : i64} {
  func.func @_conv1_kernel(%arg0: i32, %arg1: i32, %arg2: memref<1x8x8x4xbf16, #tpu.memory_space<vmem>>, %arg3: memref<1152x32xbf16, #tpu.memory_space<vmem>>, %arg4: memref<1x64x32xbf16, #tpu.memory_space<vmem>>, %arg5: memref<1x2x32xf32, #tpu.memory_space<vmem>>, %arg6: memref<10x10x128xbf16, #tpu.memory_space<vmem>>, %arg7: memref<64x1152xbf16, #tpu.memory_space<vmem>>) attributes {dimension_semantics = [#tpu.dimension_semantics<parallel>, #tpu.dimension_semantics<arbitrary>], iteration_bounds = array<i64: 2, 1>, scalar_prefetch = 0 : i64, scratch_operands = 2 : i64, tpu.core_type = #tpu.core_type<tc>, window_params = [{transform_indices = @transform_0, window_bounds = array<i64: 1, 8, 8, 4>}, {transform_indices = @transform_1, window_bounds = array<i64: 1152, 32>}, {transform_indices = @transform_2, window_bounds = array<i64: 1, 64, 32>}, {transform_indices = @transform_3, window_bounds = array<i64: 1, 2, 32>}]} {
    %c0_i32 = arith.constant 0 : i32
    %0 = arith.cmpi eq, %arg1, %c0_i32 : i32
    %1 = arith.extui %0 : i1 to i32
    %c0_i32_0 = arith.constant 0 : i32
    %2 = arith.cmpi ne, %1, %c0_i32_0 : i32
    scf.if %2 {
      %c0_14 = arith.constant 0 : index
      %c0_15 = arith.constant 0 : index
      %c0_16 = arith.constant 0 : index
      %c0_17 = arith.constant 0 : index
      %21 = vector.load %arg2[%c0_14, %c0_15, %c0_16, %c0_17] : memref<1x8x8x4xbf16, #tpu.memory_space<vmem>>, vector<1x8x8x4xbf16>
      %22 = vector.shape_cast %21 : vector<1x8x8x4xbf16> to vector<8x8x4xbf16>
      %cst_18 = arith.constant 0.000000e+00 : bf16
      %23 = vector.broadcast %cst_18 : bf16 to vector<10x10x128xbf16>
      %c0_19 = arith.constant 0 : index
      %c0_20 = arith.constant 0 : index
      %c0_21 = arith.constant 0 : index
      %24 = vector.load %arg6[%c0_19, %c0_20, %c0_21] : memref<10x10x128xbf16, #tpu.memory_space<vmem>>, vector<10x10x128xbf16>
      tpu.vector_store %arg6[%c0_19, %c0_20, %c0_21], %23 {strides = array<i32>} : memref<10x10x128xbf16, #tpu.memory_space<vmem>>, vector<10x10x128xbf16>,
      %c1_22 = arith.constant 1 : index
      %c1_23 = arith.constant 1 : index
      %c0_24 = arith.constant 0 : index
      %25 = vector.load %arg6[%c1_22, %c1_23, %c0_24] : memref<10x10x128xbf16, #tpu.memory_space<vmem>>, vector<8x8x4xbf16>
      tpu.vector_store %arg6[%c1_22, %c1_23, %c0_24], %22 {strides = array<i32>} : memref<10x10x128xbf16, #tpu.memory_space<vmem>>, vector<8x8x4xbf16>,
      %c0_25 = arith.constant 0 : index
      %c0_26 = arith.constant 0 : index
      %c0_27 = arith.constant 0 : index
      %26 = vector.load %arg6[%c0_25, %c0_26, %c0_27] : memref<10x10x128xbf16, #tpu.memory_space<vmem>>, vector<8x8x128xbf16>
      %27 = vector.shape_cast %26 : vector<8x8x128xbf16> to vector<64x128xbf16>
      %c0_28 = arith.constant 0 : index
      %c0_29 = arith.constant 0 : index
      %28 = vector.load %arg7[%c0_28, %c0_29] : memref<64x1152xbf16, #tpu.memory_space<vmem>>, vector<64x128xbf16>
      tpu.vector_store %arg7[%c0_28, %c0_29], %27 {strides = array<i32>} : memref<64x1152xbf16, #tpu.memory_space<vmem>>, vector<64x128xbf16>,
      %c0_30 = arith.constant 0 : index
      %c1_31 = arith.constant 1 : index
      %c0_32 = arith.constant 0 : index
      %29 = vector.load %arg6[%c0_30, %c1_31, %c0_32] : memref<10x10x128xbf16, #tpu.memory_space<vmem>>, vector<8x8x128xbf16>
      %30 = vector.shape_cast %29 : vector<8x8x128xbf16> to vector<64x128xbf16>
      %c0_33 = arith.constant 0 : index
      %c128 = arith.constant 128 : index
      %31 = vector.load %arg7[%c0_33, %c128] : memref<64x1152xbf16, #tpu.memory_space<vmem>>, vector<64x128xbf16>
      tpu.vector_store %arg7[%c0_33, %c128], %30 {strides = array<i32>} : memref<64x1152xbf16, #tpu.memory_space<vmem>>, vector<64x128xbf16>,
      %c0_34 = arith.constant 0 : index
      %c2 = arith.constant 2 : index
      %c0_35 = arith.constant 0 : index
      %32 = vector.load %arg6[%c0_34, %c2, %c0_35] : memref<10x10x128xbf16, #tpu.memory_space<vmem>>, vector<8x8x128xbf16>
      %33 = vector.shape_cast %32 : vector<8x8x128xbf16> to vector<64x128xbf16>
      %c0_36 = arith.constant 0 : index
      %c256 = arith.constant 256 : index
      %34 = vector.load %arg7[%c0_36, %c256] : memref<64x1152xbf16, #tpu.memory_space<vmem>>, vector<64x128xbf16>
      tpu.vector_store %arg7[%c0_36, %c256], %33 {strides = array<i32>} : memref<64x1152xbf16, #tpu.memory_space<vmem>>, vector<64x128xbf16>,
      %c1_37 = arith.constant 1 : index
      %c0_38 = arith.constant 0 : index
      %c0_39 = arith.constant 0 : index
      %35 = vector.load %arg6[%c1_37, %c0_38, %c0_39] : memref<10x10x128xbf16, #tpu.memory_space<vmem>>, vector<8x8x128xbf16>
      %36 = vector.shape_cast %35 : vector<8x8x128xbf16> to vector<64x128xbf16>
      %c0_40 = arith.constant 0 : index
      %c384 = arith.constant 384 : index
      %37 = vector.load %arg7[%c0_40, %c384] : memref<64x1152xbf16, #tpu.memory_space<vmem>>, vector<64x128xbf16>
      tpu.vector_store %arg7[%c0_40, %c384], %36 {strides = array<i32>} : memref<64x1152xbf16, #tpu.memory_space<vmem>>, vector<64x128xbf16>,
      %c1_41 = arith.constant 1 : index
      %c1_42 = arith.constant 1 : index
      %c0_43 = arith.constant 0 : index
      %38 = vector.load %arg6[%c1_41, %c1_42, %c0_43] : memref<10x10x128xbf16, #tpu.memory_space<vmem>>, vector<8x8x128xbf16>
      %39 = vector.shape_cast %38 : vector<8x8x128xbf16> to vector<64x128xbf16>
      %c0_44 = arith.constant 0 : index
      %c512 = arith.constant 512 : index
      %40 = vector.load %arg7[%c0_44, %c512] : memref<64x1152xbf16, #tpu.memory_space<vmem>>, vector<64x128xbf16>
      tpu.vector_store %arg7[%c0_44, %c512], %39 {strides = array<i32>} : memref<64x1152xbf16, #tpu.memory_space<vmem>>, vector<64x128xbf16>,
      %c1_45 = arith.constant 1 : index
      %c2_46 = arith.constant 2 : index
      %c0_47 = arith.constant 0 : index
      %41 = vector.load %arg6[%c1_45, %c2_46, %c0_47] : memref<10x10x128xbf16, #tpu.memory_space<vmem>>, vector<8x8x128xbf16>
      %42 = vector.shape_cast %41 : vector<8x8x128xbf16> to vector<64x128xbf16>
      %c0_48 = arith.constant 0 : index
      %c640 = arith.constant 640 : index
      %43 = vector.load %arg7[%c0_48, %c640] : memref<64x1152xbf16, #tpu.memory_space<vmem>>, vector<64x128xbf16>
      tpu.vector_store %arg7[%c0_48, %c640], %42 {strides = array<i32>} : memref<64x1152xbf16, #tpu.memory_space<vmem>>, vector<64x128xbf16>,
      %c2_49 = arith.constant 2 : index
      %c0_50 = arith.constant 0 : index
      %c0_51 = arith.constant 0 : index
      %44 = vector.load %arg6[%c2_49, %c0_50, %c0_51] : memref<10x10x128xbf16, #tpu.memory_space<vmem>>, vector<8x8x128xbf16>
      %45 = vector.shape_cast %44 : vector<8x8x128xbf16> to vector<64x128xbf16>
      %c0_52 = arith.constant 0 : index
      %c768 = arith.constant 768 : index
      %46 = vector.load %arg7[%c0_52, %c768] : memref<64x1152xbf16, #tpu.memory_space<vmem>>, vector<64x128xbf16>
      tpu.vector_store %arg7[%c0_52, %c768], %45 {strides = array<i32>} : memref<64x1152xbf16, #tpu.memory_space<vmem>>, vector<64x128xbf16>,
      %c2_53 = arith.constant 2 : index
      %c1_54 = arith.constant 1 : index
      %c0_55 = arith.constant 0 : index
      %47 = vector.load %arg6[%c2_53, %c1_54, %c0_55] : memref<10x10x128xbf16, #tpu.memory_space<vmem>>, vector<8x8x128xbf16>
      %48 = vector.shape_cast %47 : vector<8x8x128xbf16> to vector<64x128xbf16>
      %c0_56 = arith.constant 0 : index
      %c896 = arith.constant 896 : index
      %49 = vector.load %arg7[%c0_56, %c896] : memref<64x1152xbf16, #tpu.memory_space<vmem>>, vector<64x128xbf16>
      tpu.vector_store %arg7[%c0_56, %c896], %48 {strides = array<i32>} : memref<64x1152xbf16, #tpu.memory_space<vmem>>, vector<64x128xbf16>,
      %c2_57 = arith.constant 2 : index
      %c2_58 = arith.constant 2 : index
      %c0_59 = arith.constant 0 : index
      %50 = vector.load %arg6[%c2_57, %c2_58, %c0_59] : memref<10x10x128xbf16, #tpu.memory_space<vmem>>, vector<8x8x128xbf16>
      %51 = vector.shape_cast %50 : vector<8x8x128xbf16> to vector<64x128xbf16>
      %c0_60 = arith.constant 0 : index
      %c1024 = arith.constant 1024 : index
      %52 = vector.load %arg7[%c0_60, %c1024] : memref<64x1152xbf16, #tpu.memory_space<vmem>>, vector<64x128xbf16>
      tpu.vector_store %arg7[%c0_60, %c1024], %51 {strides = array<i32>} : memref<64x1152xbf16, #tpu.memory_space<vmem>>, vector<64x128xbf16>,
    } else {
    }
    %c0 = arith.constant 0 : index
    %c0_1 = arith.constant 0 : index
    %3 = vector.load %arg7[%c0, %c0_1] : memref<64x1152xbf16, #tpu.memory_space<vmem>>, vector<64x1152xbf16>
    %c0_2 = arith.constant 0 : index
    %c0_3 = arith.constant 0 : index
    %4 = vector.load %arg3[%c0_2, %c0_3] : memref<1152x32xbf16, #tpu.memory_space<vmem>>, vector<1152x32xbf16>
    %cst = arith.constant dense<0.000000e+00> : vector<64x32xf32>
    %5 = tpu.matmul %3, %4, %cst {dimension_numbers = #tpu.dot_dimension_numbers<[1], [0], [0], [1], [0, 0, 1, 1], [], []>} : vector<64x1152xbf16>, vector<1152x32xbf16>, vector<64x32xf32> -> vector<64x32xf32>
    %6 = arith.truncf %5 : vector<64x32xf32> to vector<64x32xbf16>
    %c0_4 = arith.constant 0 : index
    %c0_5 = arith.constant 0 : index
    %c0_6 = arith.constant 0 : index
    %7 = vector.load %arg4[%c0_4, %c0_5, %c0_6] : memref<1x64x32xbf16, #tpu.memory_space<vmem>>, vector<1x64x32xbf16>
    %8 = vector.shape_cast %7 : vector<1x64x32xbf16> to vector<64x32xbf16>
    %9 = vector.shape_cast %6 : vector<64x32xbf16> to vector<1x64x32xbf16>
    tpu.vector_store %arg4[%c0_4, %c0_5, %c0_6], %9 {strides = array<i32>} : memref<1x64x32xbf16, #tpu.memory_space<vmem>>, vector<1x64x32xbf16>,
    %cst_7 = arith.constant dense<0.000000e+00> : vector<32xf32>
    %10 = vector.multi_reduction <add>, %5, %cst_7 [0] : vector<64x32xf32> to vector<32xf32>
    %11 = vector.shape_cast %10 : vector<32xf32> to vector<1x32xf32>
    %c0_8 = arith.constant 0 : index
    %c0_9 = arith.constant 0 : index
    %c0_10 = arith.constant 0 : index
    %12 = vector.load %arg5[%c0_8, %c0_9, %c0_10] : memref<1x2x32xf32, #tpu.memory_space<vmem>>, vector<1x1x32xf32>
    %13 = vector.shape_cast %12 : vector<1x1x32xf32> to vector<1x32xf32>
    %14 = vector.shape_cast %11 : vector<1x32xf32> to vector<1x1x32xf32>
    tpu.vector_store %arg5[%c0_8, %c0_9, %c0_10], %14 {strides = array<i32>} : memref<1x2x32xf32, #tpu.memory_space<vmem>>, vector<1x1x32xf32>,
    %15 = arith.mulf %5, %5 : vector<64x32xf32>
    %cst_11 = arith.constant dense<0.000000e+00> : vector<32xf32>
    %16 = vector.multi_reduction <add>, %15, %cst_11 [0] : vector<64x32xf32> to vector<32xf32>
    %17 = vector.shape_cast %16 : vector<32xf32> to vector<1x32xf32>
    %c0_12 = arith.constant 0 : index
    %c1 = arith.constant 1 : index
    %c0_13 = arith.constant 0 : index
    %18 = vector.load %arg5[%c0_12, %c1, %c0_13] : memref<1x2x32xf32, #tpu.memory_space<vmem>>, vector<1x1x32xf32>
    %19 = vector.shape_cast %18 : vector<1x1x32xf32> to vector<1x32xf32>
    %20 = vector.shape_cast %17 : vector<1x32xf32> to vector<1x1x32xf32>
    tpu.vector_store %arg5[%c0_12, %c1, %c0_13], %20 {strides = array<i32>} : memref<1x2x32xf32, #tpu.memory_space<vmem>>, vector<1x1x32xf32>,
    return
  }
  func.func @transform_0(%arg0: i32, %arg1: i32) -> (i32, i32, i32, i32) {
    %c0_i32 = arith.constant 0 : i32
    %c0_i32_0 = arith.constant 0 : i32
    %c0_i32_1 = arith.constant 0 : i32
    %c0_i32_2 = arith.constant 0 : i32
    return %arg0, %c0_i32, %c0_i32_0, %c0_i32_1 : i32, i32, i32, i32
  }
  func.func @transform_1(%arg0: i32, %arg1: i32) -> (i32, i32) {
    %c0_i32 = arith.constant 0 : i32
    %c0_i32_0 = arith.constant 0 : i32
    return %c0_i32, %arg1 : i32, i32
  }
  func.func @transform_2(%arg0: i32, %arg1: i32) -> (i32, i32, i32) {
    %c0_i32 = arith.constant 0 : i32
    %c0_i32_0 = arith.constant 0 : i32
    return %arg0, %c0_i32, %arg1 : i32, i32, i32
  }
  func.func @transform_3(%arg0: i32, %arg1: i32) -> (i32, i32, i32) {
    %c0_i32 = arith.constant 0 : i32
    %c0_i32_0 = arith.constant 0 : i32
    return %arg0, %c0_i32, %arg1 : i32, i32, i32
  }
}

module attributes {stable_mosaic.version = 11 : i64} {
  func.func @_conv2_kernel(%arg0: i32, %arg1: i32, %arg2: memref<1x64x32xbf16, #tpu.memory_space<vmem>>, %arg3: memref<1x32xf32, #tpu.memory_space<vmem>>, %arg4: memref<1x32xf32, #tpu.memory_space<vmem>>, %arg5: memref<1152x32xbf16, #tpu.memory_space<vmem>>, %arg6: memref<1x64x32xbf16, #tpu.memory_space<vmem>>, %arg7: memref<1x2x32xf32, #tpu.memory_space<vmem>>, %arg8: memref<10x10x128xbf16, #tpu.memory_space<vmem>>, %arg9: memref<64x1152xbf16, #tpu.memory_space<vmem>>) attributes {dimension_semantics = [#tpu.dimension_semantics<parallel>, #tpu.dimension_semantics<arbitrary>], iteration_bounds = array<i64: 2, 1>, scalar_prefetch = 0 : i64, scratch_operands = 2 : i64, tpu.core_type = #tpu.core_type<tc>, window_params = [{transform_indices = @transform_0, window_bounds = array<i64: 1, 64, 32>}, {pipeline_mode = #tpu.pipeline_mode<synchronous>, transform_indices = @transform_1, window_bounds = array<i64: 1, 32>}, {pipeline_mode = #tpu.pipeline_mode<synchronous>, transform_indices = @transform_2, window_bounds = array<i64: 1, 32>}, {transform_indices = @transform_3, window_bounds = array<i64: 1152, 32>}, {transform_indices = @transform_4, window_bounds = array<i64: 1, 64, 32>}, {transform_indices = @transform_5, window_bounds = array<i64: 1, 2, 32>}]} {
    %c0_i32 = arith.constant 0 : i32
    %0 = arith.cmpi eq, %arg1, %c0_i32 : i32
    %1 = arith.extui %0 : i1 to i32
    %c0_i32_0 = arith.constant 0 : i32
    %2 = arith.cmpi ne, %1, %c0_i32_0 : i32
    scf.if %2 {
      %c0_14 = arith.constant 0 : index
      %c0_15 = arith.constant 0 : index
      %c0_16 = arith.constant 0 : index
      %21 = vector.load %arg2[%c0_14, %c0_15, %c0_16] : memref<1x64x32xbf16, #tpu.memory_space<vmem>>, vector<1x64x32xbf16>
      %22 = vector.shape_cast %21 : vector<1x64x32xbf16> to vector<64x32xbf16>
      %23 = arith.extf %22 : vector<64x32xbf16> to vector<64x32xf32>
      %c0_17 = arith.constant 0 : index
      %c0_18 = arith.constant 0 : index
      %24 = vector.load %arg3[%c0_17, %c0_18] : memref<1x32xf32, #tpu.memory_space<vmem>>, vector<1x32xf32>
      %25 = vector.broadcast %24 : vector<1x32xf32> to vector<64x32xf32>
      %26 = arith.mulf %23, %25 : vector<64x32xf32>
      %c0_19 = arith.constant 0 : index
      %c0_20 = arith.constant 0 : index
      %27 = vector.load %arg4[%c0_19, %c0_20] : memref<1x32xf32, #tpu.memory_space<vmem>>, vector<1x32xf32>
      %28 = vector.broadcast %27 : vector<1x32xf32> to vector<64x32xf32>
      %29 = arith.addf %26, %28 : vector<64x32xf32>
      %cst_21 = arith.constant 0.000000e+00 : f32
      %30 = vector.broadcast %cst_21 : f32 to vector<64x32xf32>
      %31 = arith.maximumf %29, %30 : vector<64x32xf32>
      %32 = arith.truncf %31 : vector<64x32xf32> to vector<64x32xbf16>
      %33 = vector.shape_cast %32 : vector<64x32xbf16> to vector<8x8x32xbf16>
      %cst_22 = arith.constant 0.000000e+00 : bf16
      %34 = vector.broadcast %cst_22 : bf16 to vector<10x10x128xbf16>
      %c0_23 = arith.constant 0 : index
      %c0_24 = arith.constant 0 : index
      %c0_25 = arith.constant 0 : index
      %35 = vector.load %arg8[%c0_23, %c0_24, %c0_25] : memref<10x10x128xbf16, #tpu.memory_space<vmem>>, vector<10x10x128xbf16>
      tpu.vector_store %arg8[%c0_23, %c0_24, %c0_25], %34 {strides = array<i32>} : memref<10x10x128xbf16, #tpu.memory_space<vmem>>, vector<10x10x128xbf16>,
      %c1_26 = arith.constant 1 : index
      %c1_27 = arith.constant 1 : index
      %c0_28 = arith.constant 0 : index
      %36 = vector.load %arg8[%c1_26, %c1_27, %c0_28] : memref<10x10x128xbf16, #tpu.memory_space<vmem>>, vector<8x8x32xbf16>
      tpu.vector_store %arg8[%c1_26, %c1_27, %c0_28], %33 {strides = array<i32>} : memref<10x10x128xbf16, #tpu.memory_space<vmem>>, vector<8x8x32xbf16>,
      %c0_29 = arith.constant 0 : index
      %c0_30 = arith.constant 0 : index
      %c0_31 = arith.constant 0 : index
      %37 = vector.load %arg8[%c0_29, %c0_30, %c0_31] : memref<10x10x128xbf16, #tpu.memory_space<vmem>>, vector<8x8x128xbf16>
      %38 = vector.shape_cast %37 : vector<8x8x128xbf16> to vector<64x128xbf16>
      %c0_32 = arith.constant 0 : index
      %c0_33 = arith.constant 0 : index
      %39 = vector.load %arg9[%c0_32, %c0_33] : memref<64x1152xbf16, #tpu.memory_space<vmem>>, vector<64x128xbf16>
      tpu.vector_store %arg9[%c0_32, %c0_33], %38 {strides = array<i32>} : memref<64x1152xbf16, #tpu.memory_space<vmem>>, vector<64x128xbf16>,
      %c0_34 = arith.constant 0 : index
      %c1_35 = arith.constant 1 : index
      %c0_36 = arith.constant 0 : index
      %40 = vector.load %arg8[%c0_34, %c1_35, %c0_36] : memref<10x10x128xbf16, #tpu.memory_space<vmem>>, vector<8x8x128xbf16>
      %41 = vector.shape_cast %40 : vector<8x8x128xbf16> to vector<64x128xbf16>
      %c0_37 = arith.constant 0 : index
      %c128 = arith.constant 128 : index
      %42 = vector.load %arg9[%c0_37, %c128] : memref<64x1152xbf16, #tpu.memory_space<vmem>>, vector<64x128xbf16>
      tpu.vector_store %arg9[%c0_37, %c128], %41 {strides = array<i32>} : memref<64x1152xbf16, #tpu.memory_space<vmem>>, vector<64x128xbf16>,
      %c0_38 = arith.constant 0 : index
      %c2 = arith.constant 2 : index
      %c0_39 = arith.constant 0 : index
      %43 = vector.load %arg8[%c0_38, %c2, %c0_39] : memref<10x10x128xbf16, #tpu.memory_space<vmem>>, vector<8x8x128xbf16>
      %44 = vector.shape_cast %43 : vector<8x8x128xbf16> to vector<64x128xbf16>
      %c0_40 = arith.constant 0 : index
      %c256 = arith.constant 256 : index
      %45 = vector.load %arg9[%c0_40, %c256] : memref<64x1152xbf16, #tpu.memory_space<vmem>>, vector<64x128xbf16>
      tpu.vector_store %arg9[%c0_40, %c256], %44 {strides = array<i32>} : memref<64x1152xbf16, #tpu.memory_space<vmem>>, vector<64x128xbf16>,
      %c1_41 = arith.constant 1 : index
      %c0_42 = arith.constant 0 : index
      %c0_43 = arith.constant 0 : index
      %46 = vector.load %arg8[%c1_41, %c0_42, %c0_43] : memref<10x10x128xbf16, #tpu.memory_space<vmem>>, vector<8x8x128xbf16>
      %47 = vector.shape_cast %46 : vector<8x8x128xbf16> to vector<64x128xbf16>
      %c0_44 = arith.constant 0 : index
      %c384 = arith.constant 384 : index
      %48 = vector.load %arg9[%c0_44, %c384] : memref<64x1152xbf16, #tpu.memory_space<vmem>>, vector<64x128xbf16>
      tpu.vector_store %arg9[%c0_44, %c384], %47 {strides = array<i32>} : memref<64x1152xbf16, #tpu.memory_space<vmem>>, vector<64x128xbf16>,
      %c1_45 = arith.constant 1 : index
      %c1_46 = arith.constant 1 : index
      %c0_47 = arith.constant 0 : index
      %49 = vector.load %arg8[%c1_45, %c1_46, %c0_47] : memref<10x10x128xbf16, #tpu.memory_space<vmem>>, vector<8x8x128xbf16>
      %50 = vector.shape_cast %49 : vector<8x8x128xbf16> to vector<64x128xbf16>
      %c0_48 = arith.constant 0 : index
      %c512 = arith.constant 512 : index
      %51 = vector.load %arg9[%c0_48, %c512] : memref<64x1152xbf16, #tpu.memory_space<vmem>>, vector<64x128xbf16>
      tpu.vector_store %arg9[%c0_48, %c512], %50 {strides = array<i32>} : memref<64x1152xbf16, #tpu.memory_space<vmem>>, vector<64x128xbf16>,
      %c1_49 = arith.constant 1 : index
      %c2_50 = arith.constant 2 : index
      %c0_51 = arith.constant 0 : index
      %52 = vector.load %arg8[%c1_49, %c2_50, %c0_51] : memref<10x10x128xbf16, #tpu.memory_space<vmem>>, vector<8x8x128xbf16>
      %53 = vector.shape_cast %52 : vector<8x8x128xbf16> to vector<64x128xbf16>
      %c0_52 = arith.constant 0 : index
      %c640 = arith.constant 640 : index
      %54 = vector.load %arg9[%c0_52, %c640] : memref<64x1152xbf16, #tpu.memory_space<vmem>>, vector<64x128xbf16>
      tpu.vector_store %arg9[%c0_52, %c640], %53 {strides = array<i32>} : memref<64x1152xbf16, #tpu.memory_space<vmem>>, vector<64x128xbf16>,
      %c2_53 = arith.constant 2 : index
      %c0_54 = arith.constant 0 : index
      %c0_55 = arith.constant 0 : index
      %55 = vector.load %arg8[%c2_53, %c0_54, %c0_55] : memref<10x10x128xbf16, #tpu.memory_space<vmem>>, vector<8x8x128xbf16>
      %56 = vector.shape_cast %55 : vector<8x8x128xbf16> to vector<64x128xbf16>
      %c0_56 = arith.constant 0 : index
      %c768 = arith.constant 768 : index
      %57 = vector.load %arg9[%c0_56, %c768] : memref<64x1152xbf16, #tpu.memory_space<vmem>>, vector<64x128xbf16>
      tpu.vector_store %arg9[%c0_56, %c768], %56 {strides = array<i32>} : memref<64x1152xbf16, #tpu.memory_space<vmem>>, vector<64x128xbf16>,
      %c2_57 = arith.constant 2 : index
      %c1_58 = arith.constant 1 : index
      %c0_59 = arith.constant 0 : index
      %58 = vector.load %arg8[%c2_57, %c1_58, %c0_59] : memref<10x10x128xbf16, #tpu.memory_space<vmem>>, vector<8x8x128xbf16>
      %59 = vector.shape_cast %58 : vector<8x8x128xbf16> to vector<64x128xbf16>
      %c0_60 = arith.constant 0 : index
      %c896 = arith.constant 896 : index
      %60 = vector.load %arg9[%c0_60, %c896] : memref<64x1152xbf16, #tpu.memory_space<vmem>>, vector<64x128xbf16>
      tpu.vector_store %arg9[%c0_60, %c896], %59 {strides = array<i32>} : memref<64x1152xbf16, #tpu.memory_space<vmem>>, vector<64x128xbf16>,
      %c2_61 = arith.constant 2 : index
      %c2_62 = arith.constant 2 : index
      %c0_63 = arith.constant 0 : index
      %61 = vector.load %arg8[%c2_61, %c2_62, %c0_63] : memref<10x10x128xbf16, #tpu.memory_space<vmem>>, vector<8x8x128xbf16>
      %62 = vector.shape_cast %61 : vector<8x8x128xbf16> to vector<64x128xbf16>
      %c0_64 = arith.constant 0 : index
      %c1024 = arith.constant 1024 : index
      %63 = vector.load %arg9[%c0_64, %c1024] : memref<64x1152xbf16, #tpu.memory_space<vmem>>, vector<64x128xbf16>
      tpu.vector_store %arg9[%c0_64, %c1024], %62 {strides = array<i32>} : memref<64x1152xbf16, #tpu.memory_space<vmem>>, vector<64x128xbf16>,
    } else {
    }
    %c0 = arith.constant 0 : index
    %c0_1 = arith.constant 0 : index
    %3 = vector.load %arg9[%c0, %c0_1] : memref<64x1152xbf16, #tpu.memory_space<vmem>>, vector<64x1152xbf16>
    %c0_2 = arith.constant 0 : index
    %c0_3 = arith.constant 0 : index
    %4 = vector.load %arg5[%c0_2, %c0_3] : memref<1152x32xbf16, #tpu.memory_space<vmem>>, vector<1152x32xbf16>
    %cst = arith.constant dense<0.000000e+00> : vector<64x32xf32>
    %5 = tpu.matmul %3, %4, %cst {dimension_numbers = #tpu.dot_dimension_numbers<[1], [0], [0], [1], [0, 0, 1, 1], [], []>} : vector<64x1152xbf16>, vector<1152x32xbf16>, vector<64x32xf32> -> vector<64x32xf32>
    %6 = arith.truncf %5 : vector<64x32xf32> to vector<64x32xbf16>
    %c0_4 = arith.constant 0 : index
    %c0_5 = arith.constant 0 : index
    %c0_6 = arith.constant 0 : index
    %7 = vector.load %arg6[%c0_4, %c0_5, %c0_6] : memref<1x64x32xbf16, #tpu.memory_space<vmem>>, vector<1x64x32xbf16>
    %8 = vector.shape_cast %7 : vector<1x64x32xbf16> to vector<64x32xbf16>
    %9 = vector.shape_cast %6 : vector<64x32xbf16> to vector<1x64x32xbf16>
    tpu.vector_store %arg6[%c0_4, %c0_5, %c0_6], %9 {strides = array<i32>} : memref<1x64x32xbf16, #tpu.memory_space<vmem>>, vector<1x64x32xbf16>,
    %cst_7 = arith.constant dense<0.000000e+00> : vector<32xf32>
    %10 = vector.multi_reduction <add>, %5, %cst_7 [0] : vector<64x32xf32> to vector<32xf32>
    %11 = vector.shape_cast %10 : vector<32xf32> to vector<1x32xf32>
    %c0_8 = arith.constant 0 : index
    %c0_9 = arith.constant 0 : index
    %c0_10 = arith.constant 0 : index
    %12 = vector.load %arg7[%c0_8, %c0_9, %c0_10] : memref<1x2x32xf32, #tpu.memory_space<vmem>>, vector<1x1x32xf32>
    %13 = vector.shape_cast %12 : vector<1x1x32xf32> to vector<1x32xf32>
    %14 = vector.shape_cast %11 : vector<1x32xf32> to vector<1x1x32xf32>
    tpu.vector_store %arg7[%c0_8, %c0_9, %c0_10], %14 {strides = array<i32>} : memref<1x2x32xf32, #tpu.memory_space<vmem>>, vector<1x1x32xf32>,
    %15 = arith.mulf %5, %5 : vector<64x32xf32>
    %cst_11 = arith.constant dense<0.000000e+00> : vector<32xf32>
    %16 = vector.multi_reduction <add>, %15, %cst_11 [0] : vector<64x32xf32> to vector<32xf32>
    %17 = vector.shape_cast %16 : vector<32xf32> to vector<1x32xf32>
    %c0_12 = arith.constant 0 : index
    %c1 = arith.constant 1 : index
    %c0_13 = arith.constant 0 : index
    %18 = vector.load %arg7[%c0_12, %c1, %c0_13] : memref<1x2x32xf32, #tpu.memory_space<vmem>>, vector<1x1x32xf32>
    %19 = vector.shape_cast %18 : vector<1x1x32xf32> to vector<1x32xf32>
    %20 = vector.shape_cast %17 : vector<1x32xf32> to vector<1x1x32xf32>
    tpu.vector_store %arg7[%c0_12, %c1, %c0_13], %20 {strides = array<i32>} : memref<1x2x32xf32, #tpu.memory_space<vmem>>, vector<1x1x32xf32>,
    return
  }
  func.func @transform_0(%arg0: i32, %arg1: i32) -> (i32, i32, i32) {
    %c0_i32 = arith.constant 0 : i32
    %c0_i32_0 = arith.constant 0 : i32
    %c0_i32_1 = arith.constant 0 : i32
    return %arg0, %c0_i32, %c0_i32_0 : i32, i32, i32
  }
  func.func @transform_1(%arg0: i32, %arg1: i32) -> (i32, i32) {
    %c0_i32 = arith.constant 0 : i32
    %c0_i32_0 = arith.constant 0 : i32
    %c0_i32_1 = arith.constant 0 : i32
    return %c0_i32, %c0_i32_0 : i32, i32
  }
  func.func @transform_2(%arg0: i32, %arg1: i32) -> (i32, i32) {
    %c0_i32 = arith.constant 0 : i32
    %c0_i32_0 = arith.constant 0 : i32
    %c0_i32_1 = arith.constant 0 : i32
    return %c0_i32, %c0_i32_0 : i32, i32
  }
  func.func @transform_3(%arg0: i32, %arg1: i32) -> (i32, i32) {
    %c0_i32 = arith.constant 0 : i32
    %c0_i32_0 = arith.constant 0 : i32
    return %c0_i32, %arg1 : i32, i32
  }
  func.func @transform_4(%arg0: i32, %arg1: i32) -> (i32, i32, i32) {
    %c0_i32 = arith.constant 0 : i32
    %c0_i32_0 = arith.constant 0 : i32
    return %arg0, %c0_i32, %arg1 : i32, i32, i32
  }
  func.func @transform_5(%arg0: i32, %arg1: i32) -> (i32, i32, i32) {
    %c0_i32 = arith.constant 0 : i32
    %c0_i32_0 = arith.constant 0 : i32
    return %arg0, %c0_i32, %arg1 : i32, i32, i32
  }
}

module attributes {stable_mosaic.version = 11 : i64} {
  func.func @_bnrelu_kernel(%arg0: i32, %arg1: memref<128x32xbf16, #tpu.memory_space<vmem>>, %arg2: memref<1x32xf32, #tpu.memory_space<vmem>>, %arg3: memref<1x32xf32, #tpu.memory_space<vmem>>, %arg4: memref<128x32xf32, #tpu.memory_space<vmem>>) attributes {dimension_semantics = [#tpu.dimension_semantics<parallel>], iteration_bounds = array<i64: 1>, scalar_prefetch = 0 : i64, scratch_operands = 0 : i64, tpu.core_type = #tpu.core_type<tc>, window_params = [{transform_indices = @transform_0, window_bounds = array<i64: 128, 32>}, {pipeline_mode = #tpu.pipeline_mode<synchronous>, transform_indices = @transform_1, window_bounds = array<i64: 1, 32>}, {pipeline_mode = #tpu.pipeline_mode<synchronous>, transform_indices = @transform_2, window_bounds = array<i64: 1, 32>}, {transform_indices = @transform_3, window_bounds = array<i64: 128, 32>}]} {
    %c0 = arith.constant 0 : index
    %c0_0 = arith.constant 0 : index
    %0 = vector.load %arg1[%c0, %c0_0] : memref<128x32xbf16, #tpu.memory_space<vmem>>, vector<128x32xbf16>
    %1 = arith.extf %0 : vector<128x32xbf16> to vector<128x32xf32>
    %c0_1 = arith.constant 0 : index
    %c0_2 = arith.constant 0 : index
    %2 = vector.load %arg2[%c0_1, %c0_2] : memref<1x32xf32, #tpu.memory_space<vmem>>, vector<1x32xf32>
    %3 = vector.broadcast %2 : vector<1x32xf32> to vector<128x32xf32>
    %4 = arith.mulf %1, %3 : vector<128x32xf32>
    %c0_3 = arith.constant 0 : index
    %c0_4 = arith.constant 0 : index
    %5 = vector.load %arg3[%c0_3, %c0_4] : memref<1x32xf32, #tpu.memory_space<vmem>>, vector<1x32xf32>
    %6 = vector.broadcast %5 : vector<1x32xf32> to vector<128x32xf32>
    %7 = arith.addf %4, %6 : vector<128x32xf32>
    %cst = arith.constant 0.000000e+00 : f32
    %8 = vector.broadcast %cst : f32 to vector<128x32xf32>
    %9 = arith.maximumf %7, %8 : vector<128x32xf32>
    %c0_5 = arith.constant 0 : index
    %c0_6 = arith.constant 0 : index
    %10 = vector.load %arg4[%c0_5, %c0_6] : memref<128x32xf32, #tpu.memory_space<vmem>>, vector<128x32xf32>
    tpu.vector_store %arg4[%c0_5, %c0_6], %9 {strides = array<i32>} : memref<128x32xf32, #tpu.memory_space<vmem>>, vector<128x32xf32>,
    return
  }
  func.func @transform_0(%arg0: i32) -> (i32, i32) {
    %c0_i32 = arith.constant 0 : i32
    %c0_i32_0 = arith.constant 0 : i32
    return %arg0, %c0_i32 : i32, i32
  }
  func.func @transform_1(%arg0: i32) -> (i32, i32) {
    %c0_i32 = arith.constant 0 : i32
    %c0_i32_0 = arith.constant 0 : i32
    %c0_i32_1 = arith.constant 0 : i32
    return %c0_i32, %c0_i32_0 : i32, i32
  }
  func.func @transform_2(%arg0: i32) -> (i32, i32) {
    %c0_i32 = arith.constant 0 : i32
    %c0_i32_0 = arith.constant 0 : i32
    %c0_i32_1 = arith.constant 0 : i32
    return %c0_i32, %c0_i32_0 : i32, i32
  }
  func.func @transform_3(%arg0: i32) -> (i32, i32) {
    %c0_i32 = arith.constant 0 : i32
    %c0_i32_0 = arith.constant 0 : i32
    return %arg0, %c0_i32 : i32, i32
  }
}

</mosaic_0001>

<bundles_post_ra>
// kernel: down_forward.5
= control target key start
LH: loop header
LB: loop body
LE: loop exit
PB: predicated region body
PF: predicated region fallthrough
CT: control target
= control target key end

     0   :  { %vm109_vm0 = vcmask 261120   ;;  %s316_s0 = inlined_call_operand.vmem [shape: bf16[128,32], index: 0, kind: input, shape index: {}]   ;;  %s317_s1 = inlined_call_operand.vmem [shape: f32[1,32], index: 1, kind: input, shape index: {}]   ;;  %s318_s2 = inlined_call_operand.vmem [shape: f32[1,32], index: 2, kind: input, shape index: {}]   ;;  %s319_s3 = inlined_call_operand.hbm [shape: f32[128,32], index: 3, kind: output, shape index: {}]  }
   0x1   :  { %v145_v0 = vld [vmem:[%s316_s0] sm:$0xff]   ;;  %v176_v4 = vld [vmem:[%s316_s0 + $0x8] sm:$0xff]   ;;  %v177_v5 = vld [vmem:[%s316_s0 + $0x10] sm:$0xff]  }
   0x2   :  { %v237_v1 = vld [vmem:[%s317_s1] ss:$0 sm:$0xff]  ;;  %v146_v2 = vunpack.c.l.bf16 %v145_v0  ;;  %v147_v3 = vunpack.c.h.bf16 %v145_v0  ;;  %v178_v6 = vld [vmem:[%s316_s0 + $0x18] sm:$0xff]   ;;  %v150_v8 = vunpack.c.l.bf16 %v176_v4  ;;  %v151_v9 = vunpack.c.h.bf16 %v176_v4 }
   0x3   :  { %v251_v7 = vld [vmem:[%s318_s2] ss:$0 sm:$0xff]  ;;  %v154_v10 = vunpack.c.l.bf16 %v177_v5  ;;  %v155_v11 = vunpack.c.h.bf16 %v177_v5  ;;  %v158_v14 = vunpack.c.l.bf16 %v178_v6  ;;  %v159_v15 = vunpack.c.h.bf16 %v178_v6 }
   0x4   :  { %v54_v12 = vmul.f32 %v146_v2, %v237_v1  ;;  %v55_v13 = vmul.f32 %v147_v3, %v237_v1 }
   0x5   :  { %8 = vsyncpa [#allocation3], 0  ;;  %v56_v16 = vmul.f32 %v150_v8, %v237_v1  ;;  %v57_v17 = vmul.f32 %v151_v9, %v237_v1  ;;  %v58_v18 = vmul.f32 %v154_v10, %v237_v1  ;;  %v59_v19 = vmul.f32 %v155_v11, %v237_v1  ;;  %v179_v28 = vld [vmem:[%s316_s0 + $0x20] sm:$0xff]   ;;  %v180_v33 = vld [vmem:[%s316_s0 + $0x28] sm:$0xff]  }
   0x6   :  { %v77_v20 = vadd.f32 %v251_v7, %v54_v12  ;;  %v78_v21 = vadd.f32 %v251_v7, %v55_v13  ;;  %v60_v22 = vmul.f32 %v158_v14, %v237_v1  ;;  %v61_v23 = vmul.f32 %v159_v15, %v237_v1  ;;  %v181_v34 = vld [vmem:[%s316_s0 + $0x30] sm:$0xff]   ;;  %v182_v39 = vld [vmem:[%s316_s0 + $0x38] sm:$0xff]   ;;  %s208_s0 = smov [#allocation2]  }
   0x7   :  { %v79_v24 = vadd.f32 %v251_v7, %v56_v16  ;;  %v80_v25 = vadd.f32 %v251_v7, %v57_v17  ;;  %v81_v26 = vadd.f32 %v251_v7, %v58_v18  ;;  %v82_v27 = vadd.f32 %v251_v7, %v59_v19  ;;  %s131_s30 = sshll.u32 %s208_s0, 4  ;;  %s132_s30 = int_to_ptr.vmem [resolvable:$true] %s131_s30 }
   0x8   :  { %v93_v29 = vmax.f32 %v77_v20, 0.0  ;;  %v94_v30 = vmax.f32 %v78_v21, 0.0  ;;  %v83_v31 = vadd.f32 %v251_v7, %v60_v22  ;;  %v84_v32 = vadd.f32 %v251_v7, %v61_v23  ;;  %s186_s4 = scalar_lea.vmem %s132_s30, 2048  ;;  %p191_p1 = scmp.lt.s32.totalorder %s132_s30, %s132_s30 }
   0x9   :  { %v95_v35 = vmax.f32 %v79_v24, 0.0  ;;  %v96_v36 = vmax.f32 %v80_v25, 0.0  ;;  %v97_v37 = vmax.f32 %v81_v26, 0.0  ;;  %v98_v38 = vmax.f32 %v82_v27, 0.0  ;;  %p187_p0 = scmp.ne.s32.totalorder %s132_s30, %s186_s4  ;;  %p192_p2 = scmp.lt.s32.totalorder %s186_s4, %s186_s4 }
   0xa   :  { %110 = vst.msk [vmem:[#allocation2] sm:$0xff] %vm109_vm0, %v93_v29  ;;  %111 = vst.msk [vmem:[#allocation2 + $0x8] sm:$0xff] %vm109_vm0, %v94_v30  ;;  %v99_v40 = vmax.f32 %v83_v31, 0.0  ;;  %v100_v41 = vmax.f32 %v84_v32, 0.0  ;;  %v162_v42 = vunpack.c.l.bf16 %v179_v28  ;;  %v163_v43 = vunpack.c.h.bf16 %v179_v28 }
   0xb   :  { %112 = vst.msk [vmem:[#allocation2 + $0x10] sm:$0xff] %vm109_vm0, %v95_v35  ;;  %113 = vst.msk [vmem:[#allocation2 + $0x18] sm:$0xff] %vm109_vm0, %v96_v36  ;;  %v166_v44 = vunpack.c.l.bf16 %v180_v33  ;;  %v167_v45 = vunpack.c.h.bf16 %v180_v33  ;;  %v170_v46 = vunpack.c.l.bf16 %v181_v34  ;;  %v171_v47 = vunpack.c.h.bf16 %v181_v34  ;;  %p193_p3 = por %p192_p2, %p191_p1 }
   0xc   :  { %114 = vst.msk [vmem:[#allocation2 + $0x20] sm:$0xff] %vm109_vm0, %v97_v37  ;;  %115 = vst.msk [vmem:[#allocation2 + $0x28] sm:$0xff] %vm109_vm0, %v98_v38  ;;  %v62_v48 = vmul.f32 %v162_v42, %v237_v1  ;;  %v63_v49 = vmul.f32 %v163_v43, %v237_v1  ;;  %v174_v50 = vunpack.c.l.bf16 %v182_v39  ;;  %v175_v51 = vunpack.c.h.bf16 %v182_v39 }
   0xd   :  { %116 = vst.msk [vmem:[#allocation2 + $0x30] sm:$0xff] %vm109_vm0, %v99_v40  ;;  %117 = vst.msk [vmem:[#allocation2 + $0x38] sm:$0xff] %vm109_vm0, %v100_v41  ;;  %v64_v52 = vmul.f32 %v166_v44, %v237_v1  ;;  %v65_v53 = vmul.f32 %v167_v45, %v237_v1  ;;  %v66_v54 = vmul.f32 %v170_v46, %v237_v1  ;;  %p194_p4 = pnand %p193_p3, %p187_p0 }
   0xe   :  { %v67_v55 = vmul.f32 %v171_v47, %v237_v1  ;;  %v85_v56 = vadd.f32 %v251_v7, %v62_v48  ;;  %v86_v57 = vadd.f32 %v251_v7, %v63_v49  ;;  %v68_v58 = vmul.f32 %v174_v50, %v237_v1 }
   0xf   :  { %v69_v59 = vmul.f32 %v175_v51, %v237_v1  ;;  %v87_v60 = vadd.f32 %v251_v7, %v64_v52  ;;  %v88_v61 = vadd.f32 %v251_v7, %v65_v53  ;;  %v89_v62 = vadd.f32 %v251_v7, %v66_v54 }
  0x10   :  { %v90_v63 = vadd.f32 %v251_v7, %v67_v55  ;;  %v101_v0 = vmax.f32 %v85_v56, 0.0  ;;  %v102_v2 = vmax.f32 %v86_v57, 0.0  ;;  %v91_v3 = vadd.f32 %v251_v7, %v68_v58 }
  0x11   :  { %v92_v4 = vadd.f32 %v251_v7, %v69_v59  ;;  %v103_v5 = vmax.f32 %v87_v60, 0.0  ;;  %v104_v6 = vmax.f32 %v88_v61, 0.0  ;;  %v105_v8 = vmax.f32 %v89_v62, 0.0 }
  0x12   :  { %v106_v1 = vmax.f32 %v90_v63, 0.0  ;;  %118 = vst.msk [vmem:[#allocation2 + $0x40] sm:$0xff] %vm109_vm0, %v101_v0  ;;  %119 = vst.msk [vmem:[#allocation2 + $0x48] sm:$0xff] %vm109_vm0, %v102_v2  ;;  %v107_v9 = vmax.f32 %v91_v3, 0.0 }
  0x13   :  { %v108_v10 = vmax.f32 %v92_v4, 0.0  ;;  %120 = vst.msk [vmem:[#allocation2 + $0x50] sm:$0xff] %vm109_vm0, %v103_v5  ;;  %121 = vst.msk [vmem:[#allocation2 + $0x58] sm:$0xff] %vm109_vm0, %v104_v6 }
  0x14   :  { %122 = vst.msk [vmem:[#allocation2 + $0x60] sm:$0xff] %vm109_vm0, %v105_v8  ;;  %123 = vst.msk [vmem:[#allocation2 + $0x68] sm:$0xff] %vm109_vm0, %v106_v1 }
  0x15   :  { %124 = vst.msk [vmem:[#allocation2 + $0x70] sm:$0xff] %vm109_vm0, %v107_v9  ;;  %125 = vst.msk [vmem:[#allocation2 + $0x78] sm:$0xff] %vm109_vm0, %v108_v10 }
  0x16   :  { %197 = shalt.err (!%p194_p4)
}
  0x17   :  { %s209_s5 = smov 128   ;;  %s210_s6 = smov 8  }
  0x18   :  { %137 = dma.vmem_to_hbm [thread:$0]  %s132_s30, 2048, %s319_s3, [#allocation3], %s209_s5, %s209_s5, %s210_s6  }
  0x19   :  { %206 = dma.done.wait [#allocation3], 2048  }
  0x1a   :  { %207 = vsyncadd [#allocation3], 4294965248 }
  0x1b   :  { %141 = vsyncpa [#allocation3], 1 }

// kernel: down_forward.3
= control target key start
LH: loop header
LB: loop body
LE: loop exit
PB: predicated region body
PF: predicated region fallthrough
CT: control target
= control target key end

     0   :  { %s3045_s12 = smov 0   ;;  %s3047_s13 = smov 0   ;;  %s3628_s0 = inlined_call_operand.vmem [shape: bf16[2,8,8,4], index: 0, kind: input, shape index: {}]   ;;  %s3629_s1 = inlined_call_operand.vmem [shape: bf16[1152,32], index: 1, kind: input, shape index: {}]   ;;  %s3630_s2 = inlined_call_operand.vmem [shape: bf16[2,64,32], index: 2, kind: output, shape index: {0}]   ;;  %s3631_s3 = inlined_call_operand.vmem [shape: f32[2,2,32], index: 3, kind: output, shape index: {1}]  }
   0x1   :  { %s3049_s14 = smov 0  }
   0x2 LB: > { %s26_s15 = sadd.s32 1, %s3018_s13  ;;  %p2481_p0 = scmp.ge.s32.totalorder %s3022_s14, 1  ;;  %s3022_s14 = sphi %s3049_s14, %s14_s14   ;;  %s3018_s13 = sphi %s3047_s13, %s3655_s13   ;;  %s3014_s12 = sphi %s3045_s12, %s3654_s12  }
   0x3   : > { %p28_p1 = scmp.ge.s32.totalorder %s26_s15, 2  ;;  %p165_p2 = scmp.lt.s32.totalorder %s3022_s14, 3 }
   0x5   : > { %s3657_s15 = smov (%p28_p1, %s26_s15), 0  ;;  %p166_p3 = pnand %p2481_p0, %p165_p2 }
   0x7   : > { %169 = sbr.rel (%p166_p3) target bundleno = 407 (0x197), region = 28 }
   0xc   : > { %v2876_v0 = vld [vmem:[%s3629_s1 + $0xf8] sm:$0xff]   ;;  %v2878_v2 = vld [vmem:[%s3629_s1 + $0xf0] sm:$0xff]   ;;  %v3024_v3 = vmov 0   ;;  %v2882_v7 = vld [vmem:[%s3629_s1 + $0xe8] sm:$0xff]   ;;  %p203_p4 = scmp.lt.s32.totalorder %s3014_s12, 1  ;;  %vm341_vm0 = vcmask 27648  }
   0xd   : > { %v2877_v1 = vld [vmem:[%s3629_s1 + $0xb8] sm:$0xff]   ;;  %2679 = vmatprep.subr.bf16.mxu1 %v2876_v0  ;;  %240 = vst [vmem:[#allocation2] sm:$0xf] %v3024_v3  ;;  %241 = vst [vmem:[#allocation2 + $0x4] sm:$0x1] %v3024_v3  ;;  %v2880_v5 = vld [vmem:[%s3629_s1 + $0xb0] sm:$0xff]  }
   0xe   : > { %242 = vst [vmem:[#allocation2 + $0x8] sm:$0xf] %v3024_v3  ;;  %243 = vst [vmem:[#allocation2 + $0xc] sm:$0x1] %v3024_v3  ;;  %2680 = vmatpush3.bf16.msra.mxu1 %v2877_v1  ;;  %v2879_v4 = vld [vmem:[%s3629_s1 + $0x78] sm:$0xff]   ;;  %v2883_v8 = vld [vmem:[%s3629_s1 + $0x70] sm:$0xff]  }
   0xf   : > { %244 = vst [vmem:[#allocation2 + $0x10] sm:$0xf] %v3024_v3  ;;  %245 = vst [vmem:[#allocation2 + $0x14] sm:$0x1] %v3024_v3  ;;  %2681 = vmatprep.subr.bf16.mxu1 %v2878_v2  ;;  %2639 = vmatprep.subr.bf16.mxu0 %v2879_v4  ;;  %v2881_v6 = vld [vmem:[%s3629_s1 + $0x38] sm:$0xff]   ;;  %v2884_v9 = vld [vmem:[%s3629_s1 + $0xa8] sm:$0xff]  }
  0x10   : > { %246 = vst [vmem:[#allocation2 + $0x18] sm:$0xf] %v3024_v3  ;;  %247 = vst [vmem:[#allocation2 + $0x1c] sm:$0x1] %v3024_v3  ;;  %2640 = vmatpush3.bf16.msra.mxu0 %v2881_v6  ;;  %v2885_v10 = vld [vmem:[%s3629_s1 + $0x30] sm:$0xff]   ;;  %v2886_v11 = vld [vmem:[%s3629_s1 + $0xe0] sm:$0xff]  }
  0x11   : > { %248 = vst [vmem:[#allocation2 + $0x20] sm:$0xf] %v3024_v3  ;;  %249 = vst [vmem:[#allocation2 + $0x24] sm:$0x1] %v3024_v3  ;;  %2641 = vmatprep.subr.bf16.mxu0 %v2883_v8  ;;  %v2887_v12 = vld [vmem:[%s3629_s1 + $0x68] sm:$0xff]   ;;  %v2888_v13 = vld [vmem:[%s3629_s1 + $0xa0] sm:$0xff]  }
  0x12   : > { %250 = vst [vmem:[#allocation2 + $0x28] sm:$0xf] %v3024_v3  ;;  %251 = vst [vmem:[#allocation2 + $0x2c] sm:$0x1] %v3024_v3  ;;  %2682 = vmatpush3.bf16.msra.mxu1 %v2880_v5  ;;  %v2889_v14 = vld [vmem:[%s3629_s1 + $0x28] sm:$0xff]   ;;  %v2890_v15 = vld [vmem:[%s3629_s1 + $0xd8] sm:$0xff]  }
  0x13   : > { %252 = vst [vmem:[#allocation2 + $0x30] sm:$0xf] %v3024_v3  ;;  %253 = vst [vmem:[#allocation2 + $0x34] sm:$0x1] %v3024_v3  ;;  %2683 = vmatprep.subr.bf16.mxu1 %v2882_v7  ;;  %v2891_v16 = vld [vmem:[%s3629_s1 + $0x60] sm:$0xff]   ;;  %v2892_v17 = vld [vmem:[%s3629_s1 + $0x98] sm:$0xff]  }
  0x14   : > { %254 = vst [vmem:[#allocation2 + $0x38] sm:$0xf] %v3024_v3  ;;  %255 = vst [vmem:[#allocation2 + $0x3c] sm:$0x1] %v3024_v3  ;;  %2642 = vmatpush3.bf16.msra.mxu0 %v2885_v10  ;;  %v2893_v18 = vld [vmem:[%s3629_s1 + $0x20] sm:$0xff]   ;;  %v2894_v19 = vld [vmem:[%s3629_s1 + $0xd0] sm:$0xff]  }
  0x15   : > { %256 = vst [vmem:[#allocation2 + $0x40] sm:$0xf] %v3024_v3  ;;  %257 = vst [vmem:[#allocation2 + $0x44] sm:$0x1] %v3024_v3  ;;  %2643 = vmatprep.subr.bf16.mxu0 %v2887_v12  ;;  %v2895_v20 = vld [vmem:[%s3629_s1 + $0x58] sm:$0xff]   ;;  %v2896_v21 = vld [vmem:[%s3629_s1 + $0x90] sm:$0xff]  }
  0x16   : > { %258 = vst [vmem:[#allocation2 + $0x48] sm:$0xf] %v3024_v3  ;;  %259 = vst [vmem:[#allocation2 + $0x4c] sm:$0x1] %v3024_v3  ;;  %2684 = vmatpush3.bf16.msra.mxu1 %v2884_v9  ;;  %s3659_s12 = smov (!%p203_p4, %s3014_s12), 1  ;;  %v2897_v22 = vld [vmem:[%s3629_s1 + $0x18] sm:$0xff]  }
  0x17   : > { %2685 = vmatprep.subr.bf16.mxu1 %v2886_v11  ;;  %v2898_v23 = vld [vmem:[%s3629_s1 + $0xc8] sm:$0xff]   ;;  %v2899_v24 = vld [vmem:[%s3629_s1 + $0x50] sm:$0xff]   ;;  %s2629_s20 = sshll.u32 %s3659_s12, 5  ;;  %v2902_v27 = vld [vmem:[%s3629_s1 + $0xc0] sm:$0xff]   ;;  %vm347_vm1 = vcmask 24576   ;;  %vm590_vm2 = vcmask 1042432  }
  0x18   : > { %2644 = vmatpush3.bf16.msra.mxu0 %v2889_v14  ;;  %v2900_v25 = vld [vmem:[%s3629_s1 + $0x88] sm:$0xff]   ;;  %v2901_v26 = vld [vmem:[%s3629_s1 + $0x10] sm:$0xff]   ;;  %s3159_s29 = scalar_lea.vmem %s3628_s0, %s2629_s20  ;;  %v2904_v29 = vld [vmem:[%s3629_s1 + $0x80] sm:$0xff]   ;;  %vm591_vm3 = vcmask 1046532   ;;  %vm342_vm4 = vsmask.f32 7938  ;;  %s3572_s7 = scalar_lea.vmem %s3630_s2, %s2629_s20 }
  0x19   : > { %2645 = vmatprep.subr.bf16.mxu0 %v2891_v16  ;;  %v2903_v28 = vld [vmem:[%s3629_s1 + $0x48] sm:$0xff]   ;;  %v232_v31 = vld [vmem:[%s3159_s29] sm:$0xf]  ;;  %v233_v32 = vld [vmem:[%s3159_s29 + $0x4] sm:$0xf]  ;;  %vm2279_vm12 = vcmask 257024  }
  0x1a   : > { %2686 = vmatpush3.bf16.msra.mxu1 %v2888_v13  ;;  %v2905_v30 = vld [vmem:[%s3629_s1 + $0x8] sm:$0xff]   ;;  %v261_v33 = vshrl.u32 %v232_v31, 16  ;;  %v264_v34 = vshll.u32 %v232_v31, 16  ;;  %v269_v35 = vshrl.u32 %v233_v32, 16  ;;  %v272_v36 = vshll.u32 %v233_v32, 16  ;;  %vm3170_vm6 = vmor %vm590_vm2, %vm591_vm3  ;;  %v2909_v52 = vld [vmem:[%s3629_s1 + $0x1f8] sm:$0xff]  }
  0x1b   : > { %2687 = vmatprep.subr.bf16.mxu1 %v2890_v15  ;;  %v344_v37 = vld [vmem:[#allocation2 + $0x8] sm:$0xf]  ;;  %vm348_vm5 = vsmask.f32 256  ;;  %v350_v38 = vld [vmem:[#allocation2 + $0xc] sm:$0x1]  ;;  %vm3177_vm7 = vmand %vm341_vm0, %vm342_vm4 }
  0x1c   : > { %2646 = vmatpush3.bf16.msra.mxu0 %v2893_v18  ;;  %v353_v39 = vld [vmem:[#allocation2 + $0x10] sm:$0xf]  ;;  %v263_v41 = vrot.slane %v261_v33, 7  ;;  %v3174_v42 = vrot.slane %v269_v35, 7  ;;  %v558_v44 = vld [vmem:[#allocation2] sm:$0xe]  ;;  %vm3182_vm8 = vmand %vm347_vm1, %vm348_vm5 }
  0x1d   : > { %2647 = vmatprep.subr.bf16.mxu0 %v2895_v20  ;;  %v559_v45 = vld [vmem:[#allocation2 + $0x4] sm:$0x1]  ;;  %v2487_v47 = vrot.slane %v558_v44, 9  ;;  %v395_v59 = vld [vmem:[#allocation2] sm:$0xf]  ;;  %v2917_v1 = vld [vmem:[%s3629_s1 + $0x178] sm:$0xff]  }
  0x1e   : > { %2688 = vmatpush3.bf16.msra.mxu1 %v2892_v17  ;;  %v595_v48 = vrot.slane %v559_v45, 5  ;;  %v266_v49 = vor.u32 %v264_v34, %v263_v41  ;;  %v267_v50 = vrot.slane %v263_v41, 4  ;;  %v274_v51 = vor.u32 %v272_v36, %v3174_v42  ;;  %v2910_v53 = vld [vmem:[%s3629_s1 + $0x40] sm:$0xff]   ;;  %403 = vst [vmem:[#allocation3] sm:$0xf] %v395_v59  ;;  %s2486_s20 = sshll.u32 %s3659_s12, 1 }
  0x1f   : > { %2689 = vmatprep.subr.bf16.mxu1 %v2894_v19  ;;  %v2912_v58 = vld [vmem:[%s3629_s1] sm:$0xff]   ;;  %vm427_vm9 = vsmask.f32 3328  ;;  %vm428_vm10 = vsmask.f32 7440  ;;  %v275_v4 = vrot.slane %v3174_v42, 4  ;;  %s226_s10 = scalar_lea.vmem %s3631_s3, %s2486_s20 }
  0x20   : > { %2648 = vmatpush3.bf16.msra.mxu0 %v2897_v22  ;;  %v596_v54 = vsel %vm3170_vm6, %v2487_v47, %v595_v48  ;;  %v345_v55 = vsel %vm3177_vm7, %v266_v49, %v344_v37  ;;  %v351_v56 = vsel %vm3182_vm8, %v267_v50, %v350_v38  ;;  %v354_v57 = vsel %vm3177_vm7, %v274_v51, %v353_v39  ;;  %v411_v60 = vld [vmem:[#allocation2] sm:$0xf]  ;;  %v412_v61 = vld [vmem:[#allocation2 + $0x4] sm:$0x1]  ;;  %v234_v6 = vld [vmem:[%s3159_s29 + $0x8] sm:$0xf] }
  0x21   : > { %2649 = vmatprep.subr.bf16.mxu0 %v2899_v24  ;;  %633 = vst [vmem:[#allocation3 + $0x8] sm:$0xf] %v596_v54  ;;  %346 = vst [vmem:[#allocation2 + $0x8] sm:$0xf] %v345_v55  ;;  %v431_v62 = vshrl.u32 %v411_v60, 16  ;;  %v434_v63 = vshll.u32 %v411_v60, 16 }
  0x22   : > { %2690 = vmatpush3.bf16.msra.mxu1 %v2896_v21  ;;  %352 = vst [vmem:[#allocation2 + $0xc] sm:$0x1] %v351_v56  ;;  %355 = vst [vmem:[#allocation2 + $0x10] sm:$0xf] %v354_v57  ;;  %v440_v0 = vshll.u32 %v412_v61, 16  ;;  %v277_v19 = vshrl.u32 %v234_v6, 16 }
  0x23   : > { %2691 = vmatprep.subr.bf16.mxu1 %v2898_v23  ;;  %v433_v2 = vrot.slane %v431_v62, 4  ;;  %v436_v3 = vrot.slane %v434_v63, 5  ;;  %vm3211_vm11 = vmor %vm427_vm9, %vm428_vm10  ;;  %v235_v24 = vld [vmem:[%s3159_s29 + $0xc] sm:$0xf]  ;;  %v359_v34 = vld [vmem:[#allocation2 + $0x18] sm:$0xf] }
  0x24   : > { %2650 = vmatpush3.bf16.msra.mxu0 %v2901_v26  ;;  %v442_v5 = vrot.slane %v440_v0, 5  ;;  %v279_v26 = vrot.slane %v277_v19, 7  ;;  %v288_v33 = vshll.u32 %v235_v24, 16  ;;  %v362_v39 = vld [vmem:[#allocation2 + $0x1c] sm:$0x1]  ;;  %v2913_v55 = vld [vmem:[%s3629_s1 + $0x1f0] sm:$0xff]  }
  0x25   : > { %2651 = vmatprep.subr.bf16.mxu0 %v2903_v28  ;;  %v437_v10 = vor.u32 %v436_v3, %v433_v2  ;;  %v285_v28 = vshrl.u32 %v235_v24, 16  ;;  %v365_v42 = vld [vmem:[#allocation2 + $0x20] sm:$0xf]  ;;  %v2911_v48 = vld [vmem:[%s3629_s1 + $0x1b8] sm:$0xff]   ;;  %v2918_v56 = vld [vmem:[%s3629_s1 + $0x1b0] sm:$0xff]   ;;  %vm2288_vm13 = vcmask 261120  }
  0x26   : > { %2692 = vmatpush3.bf16.msra.mxu1 %v2900_v25  ;;  %v283_v36 = vrot.slane %v279_v26, 4  ;;  %v2923_v60 = vld [vmem:[%s3629_s1 + $0x1e8] sm:$0xff]   ;;  %vm2310_vm14 = vcmask 253952  }
  0x27   : > { %2693 = vmatprep.subr.bf16.mxu1 %v2902_v27  ;;  %v438_v18 = vrot.slane %v437_v10, 4  ;;  %v280_v27 = vshll.u32 %v234_v6, 16  ;;  %v3220_v37 = vrot.slane %v285_v28, 7  ;;  %v2919_v6 = vld [vmem:[%s3629_s1 + $0x138] sm:$0xff]   ;;  %v2925_v10 = vld [vmem:[%s3629_s1 + $0x1a8] sm:$0xff]  }
  0x28   : > { %2652 = vmatpush3.bf16.msra.mxu0 %v2905_v30  ;;  %v560_v7 = vld [vmem:[#allocation2 + $0x8] sm:$0xe]  ;;  %v363_v47 = vsel %vm3182_vm8, %v283_v36, %v362_v39  ;;  %v236_v36 = vld [vmem:[%s3159_s29 + $0x10] sm:$0xf]  ;;  %v237_v39 = vld [vmem:[%s3159_s29 + $0x14] sm:$0xf] }
  0x29   : > { %2653 = vmatprep.subr.bf16.mxu0 %v2910_v53  ;;  %v561_v8 = vld [vmem:[#allocation2 + $0xc] sm:$0x1]  ;;  %v641_v9 = vld [vmem:[#allocation2 + $0x8] sm:$0xf]  ;;  %v2488_v11 = vrot.slane %v560_v7, 9  ;;  %v443_v25 = vsel %vm3211_vm11, %v438_v18, %v442_v5  ;;  %v282_v35 = vor.u32 %v280_v27, %v279_v26  ;;  %v290_v44 = vor.u32 %v288_v33, %v3220_v37 }
  0x2a   : > { %2694 = vmatpush3.bf16.msra.mxu1 %v2904_v29  ;;  %v599_v12 = vrot.slane %v561_v8, 5  ;;  %v642_v13 = vld [vmem:[#allocation2 + $0x10] sm:$0xf]  ;;  %649 = vst [vmem:[#allocation3 + $0xc] sm:$0xf] %v641_v9  ;;  %v291_v28 = vrot.slane %v3220_v37, 4 }
  0x2b   : > { %2759 = vmatprep.subr.bf16.mxu1 %v2909_v52  ;;  %v396_v14 = vld [vmem:[#allocation2 + $0x8] sm:$0xf]  ;;  %650 = vst [vmem:[#allocation3 + $0x30] sm:$0xf] %v642_v13  ;;  %v414_v17 = vld [vmem:[#allocation2 + $0xc] sm:$0x1]  ;;  %v360_v45 = vsel %vm3177_vm7, %v282_v35, %v359_v34  ;;  %v366_v50 = vsel %vm3177_vm7, %v290_v44, %v365_v42 }
  0x2c   : > { %2654 = vmatpush3.bf16.msra.mxu0 %v2912_v58  ;;  %404 = vst [vmem:[#allocation3 + $0x24] sm:$0xf] %v396_v14  ;;  %v413_v16 = vld [vmem:[#allocation2 + $0x8] sm:$0xf]  ;;  %v600_v20 = vsel %vm3170_vm6, %v2488_v11, %v599_v12  ;;  %v454_v23 = vshll.u32 %v414_v17, 16  ;;  %v2924_v14 = vld [vmem:[%s3629_s1 + $0x170] sm:$0xff]  }
  0x2d   : > { %2719 = vmatprep.subr.bf16.mxu0 %v2917_v1  ;;  %v445_v21 = vshrl.u32 %v413_v16, 16  ;;  %v448_v22 = vshll.u32 %v413_v16, 16  ;;  %634 = vst [vmem:[#allocation3 + $0x2c] sm:$0xf] %v600_v20  ;;  %v356_v29 = vld [vmem:[#allocation2 + $0x14] sm:$0x1] }
  0x2e   : > { %v456_v32 = vrot.slane %v454_v23, 5  ;;  %550 = vst [vmem:[#allocation3 + $0x4] sm:$0xf] %v443_v25  ;;  %v357_v38 = vsel %vm3182_vm8, %v275_v4, %v356_v29  ;;  %361 = vst [vmem:[#allocation2 + $0x18] sm:$0xf] %v360_v45  ;;  %v2927_v23 = vld [vmem:[%s3629_s1 + $0x1e0] sm:$0xff]  }
  0x2f   : > { %v447_v30 = vrot.slane %v445_v21, 4  ;;  %v450_v31 = vrot.slane %v448_v22, 5  ;;  %358 = vst [vmem:[#allocation2 + $0x14] sm:$0x1] %v357_v38  ;;  %364 = vst [vmem:[#allocation2 + $0x1c] sm:$0x1] %v363_v47 }
  0x30   : > { %v562_v51 = vld [vmem:[#allocation2 + $0x10] sm:$0xe]  ;;  %367 = vst [vmem:[#allocation2 + $0x20] sm:$0xf] %v366_v50  ;;  %v2930_v33 = vld [vmem:[%s3629_s1 + $0x168] sm:$0xff]   ;;  %v2931_v35 = vld [vmem:[%s3629_s1 + $0x1a0] sm:$0xff]  }
  0x31   : > { %v451_v41 = vor.u32 %v450_v31, %v447_v30  ;;  %v2489_v57 = vrot.slane %v562_v51, 9  ;;  %v397_v58 = vld [vmem:[#allocation2 + $0x10] sm:$0xf]  ;;  %v296_v42 = vshll.u32 %v236_v36, 16  ;;  %v368_v44 = vld [vmem:[#allocation2 + $0x24] sm:$0x1] }
  0x32   : > { %v2908_v53 = vld [vmem:[#allocation3 + $0xc] ss:$36 sps:$4 sm:$0xff]   ;;  %405 = vst [vmem:[#allocation3 + $0x48] sm:$0xf] %v397_v58  ;;  %v415_v61 = vld [vmem:[#allocation2 + $0x10] sm:$0xf] }
  0x33   : > { %v452_v49 = vrot.slane %v451_v41, 4  ;;  %2019 = vmatprep.mubr.bf16.mxu1 %v2908_v53  ;;  %v459_v0 = vshrl.u32 %v415_v61, 16  ;;  %v462_v1 = vshll.u32 %v415_v61, 16  ;;  %v2914_v19 = vld [vmem:[#allocation3] ss:$36 sps:$4 sm:$0xff]   ;;  %v293_v41 = vshrl.u32 %v236_v36, 16 }
  0x34   : > { %v2906_v52 = vld [vmem:[#allocation3 + $0x8] ss:$36 sps:$4 sm:$0xff]   ;;  %v2926_v29 = vld [vmem:[%s3629_s1 + $0x130] sm:$0xff]   ;;  %v2933_v45 = vld [vmem:[%s3629_s1 + $0x128] sm:$0xff]   ;;  %v301_v47 = vshrl.u32 %v237_v39, 16 }
  0x35   : > { %v457_v54 = vsel %vm3211_vm11, %v452_v49, %v456_v32  ;;  %2020 = vmatmul.mubr.bf16.vlgmr.msra.gmra.mxu1 %v2906_v52  ;;  %v564_v3 = vld [vmem:[#allocation2 + $0x18] sm:$0xe]  ;;  %v461_v17 = vrot.slane %v459_v0, 4  ;;  %v464_v18 = vrot.slane %v462_v1, 5  ;;  %v369_v49 = vsel %vm3182_vm8, %v291_v28, %v368_v44  ;;  %v371_v53 = vld [vmem:[#allocation2 + $0x28] sm:$0xf] }
  0x36   : > { %551 = vst [vmem:[#allocation3 + $0x28] sm:$0xf] %v457_v54  ;;  %v563_v59 = vld [vmem:[#allocation2 + $0x14] sm:$0x1]  ;;  %2760 = vmatpush3.bf16.msra.mxu1 %v2911_v48  ;;  %v565_v4 = vld [vmem:[#allocation2 + $0x1c] sm:$0x1] }
  0x37   : > { %v416_v62 = vld [vmem:[#allocation2 + $0x14] sm:$0x1]  ;;  %v603_v63 = vrot.slane %v563_v59, 5  ;;  %2761 = vmatprep.subr.bf16.mxu1 %v2913_v55  ;;  %v643_v5 = vld [vmem:[#allocation2 + $0x18] sm:$0xf]  ;;  %v2490_v8 = vrot.slane %v564_v3, 9  ;;  %v465_v24 = vor.u32 %v464_v18, %v461_v17 }
  0x38   : > { %v468_v2 = vshll.u32 %v416_v62, 16  ;;  %v607_v9 = vrot.slane %v565_v4, 5  ;;  %651 = vst [vmem:[#allocation3 + $0x54] sm:$0xf] %v643_v5  ;;  %v398_v11 = vld [vmem:[#allocation2 + $0x18] sm:$0xf] }
  0x39   : > { %v604_v7 = vsel %vm3170_vm6, %v2489_v57, %v603_v63  ;;  %v417_v12 = vld [vmem:[#allocation2 + $0x18] sm:$0xf]  ;;  %v644_v13 = vld [vmem:[#allocation2 + $0x20] sm:$0xf]  ;;  %406 = vst [vmem:[#allocation3 + $0x6c] sm:$0xf] %v398_v11 }
  0x3a   : > { %635 = vst [vmem:[#allocation3 + $0x50] sm:$0xf] %v604_v7  ;;  %v418_v16 = vld [vmem:[#allocation2 + $0x1c] sm:$0x1]  ;;  %2762 = vmatpush3.bf16.msra.mxu1 %v2918_v56  ;;  %v608_v21 = vsel %vm3170_vm6, %v2490_v8, %v607_v9  ;;  %652 = vst [vmem:[#allocation3 + $0x78] sm:$0xf] %v644_v13 }
  0x3b   : > { %v470_v22 = vrot.slane %v468_v2, 5  ;;  %636 = vst [vmem:[#allocation3 + $0x74] sm:$0xf] %v608_v21  ;;  %2763 = vmatprep.subr.bf16.mxu1 %v2923_v60  ;;  %v473_v25 = vshrl.u32 %v417_v12, 16  ;;  %v476_v26 = vshll.u32 %v417_v12, 16  ;;  %v482_v27 = vshll.u32 %v418_v16, 16 }
  0x3c   : > { %v466_v30 = vrot.slane %v465_v24, 4  ;;  %v304_v48 = vshll.u32 %v237_v39, 16  ;;  %v2937_v50 = vld [vmem:[%s3629_s1 + $0x1d8] sm:$0xff]   ;;  %v295_v52 = vrot.slane %v293_v41, 7  ;;  %370 = vst [vmem:[#allocation2 + $0x24] sm:$0x1] %v369_v49 }
  0x3d   : > { %v2916_v20 = vld [vmem:[#allocation3 + $0x4] ss:$36 sps:$4 sm:$0xff]   ;;  %v475_v31 = vrot.slane %v473_v25, 4  ;;  %v478_v32 = vrot.slane %v476_v26, 5  ;;  %v484_v34 = vrot.slane %v482_v27, 5  ;;  %v3283_v57 = vrot.slane %v301_v47, 7 }
  0x3e   : > { %1954 = vmatprep.mubr.bf16.mxu0 %v2916_v20  ;;  %2764 = vmatpush3.bf16.msra.mxu1 %v2925_v10  ;;  %v471_v37 = vsel %vm3211_vm11, %v466_v30, %v470_v22  ;;  %v374_v54 = vld [vmem:[#allocation2 + $0x2c] sm:$0x1]  ;;  %v298_v59 = vor.u32 %v296_v42, %v295_v52  ;;  %v299_v60 = vrot.slane %v295_v52, 4  ;;  %v377_v61 = vld [vmem:[#allocation2 + $0x30] sm:$0xf]  ;;  %v2938_v62 = vld [vmem:[%s3629_s1 + $0x160] sm:$0xff]  }
  0x3f   : > { %1955 = vmatmul.mubr.bf16.vlgmr.msra.gmra.mxu0 %v2914_v19  ;;  %2765 = vmatprep.subr.bf16.mxu1 %v2927_v23  ;;  %v479_v38 = vor.u32 %v478_v32, %v475_v31  ;;  %552 = vst [vmem:[#allocation3 + $0x4c] sm:$0xf] %v471_v37  ;;  %v306_v63 = vor.u32 %v304_v48, %v3283_v57  ;;  %v566_v0 = vld [vmem:[#allocation2 + $0x20] sm:$0xe]  ;;  %v2939_v4 = vld [vmem:[%s3629_s1 + $0x198] sm:$0xff]   ;;  %v307_v7 = vrot.slane %v3283_v57, 4 }
  0x40   : > { %2720 = vmatpush3.bf16.msra.mxu0 %v2919_v6  ;;  %v372_v1 = vsel %vm3177_vm7, %v298_v59, %v371_v53  ;;  %v375_v2 = vsel %vm3182_vm8, %v299_v60, %v374_v54  ;;  %v2491_v5 = vrot.slane %v566_v0, 9  ;;  %v2940_v6 = vld [vmem:[%s3629_s1 + $0x120] sm:$0xff]   ;;  %v2941_v9 = vld [vmem:[%s3629_s1 + $0x1d0] sm:$0xff]   ;;  %v2944_v13 = vld [vmem:[%s3629_s1 + $0x158] sm:$0xff]  }
  0x41   : > { %2721 = vmatprep.subr.bf16.mxu0 %v2924_v14  ;;  %v480_v51 = vrot.slane %v479_v38, 4  ;;  %v2920_v55 = vld [vmem:[#allocation3 + $0x54] ss:$36 sps:$4 sm:$0xff]   ;;  %373 = vst [vmem:[#allocation2 + $0x28] sm:$0xf] %v372_v1  ;;  %v378_v3 = vsel %vm3177_vm7, %v306_v63, %v377_v61  ;;  %v2947_v41 = vld [vmem:[%s3629_s1 + $0x118] sm:$0xff]  }
  0x42   : > { %v2922_v56 = vld [vmem:[#allocation3 + $0x50] ss:$36 sps:$4 sm:$0xff]   ;;  %2766 = vmatpush3.bf16.msra.mxu1 %v2931_v35  ;;  %2027 = vmatprep.mubr.bf16.mxu1 %v2920_v55  ;;  %376 = vst [vmem:[#allocation2 + $0x2c] sm:$0x1] %v375_v2  ;;  %379 = vst [vmem:[#allocation2 + $0x30] sm:$0xf] %v378_v3 }
  0x43   : > { %v485_v58 = vsel %vm3211_vm11, %v480_v51, %v484_v34  ;;  %2767 = vmatprep.subr.bf16.mxu1 %v2937_v50  ;;  %2028 = vmatmul.mubr.bf16.gmra.mxu1 %v2922_v56  ;;  %v567_v8 = vld [vmem:[#allocation2 + $0x24] sm:$0x1]  ;;  %v399_v11 = vld [vmem:[#allocation2 + $0x20] sm:$0xf]  ;;  %v2932_v19 = vld [vmem:[#allocation3 + $0x48] ss:$36 sps:$4 sm:$0xff]  }
  0x44   : > { %2722 = vmatpush3.bf16.msra.mxu0 %v2926_v29  ;;  %553 = vst [vmem:[#allocation3 + $0x70] sm:$0xf] %v485_v58  ;;  %v611_v10 = vrot.slane %v567_v8, 5  ;;  %v419_v12 = vld [vmem:[#allocation2 + $0x20] sm:$0xf]  ;;  %v2945_v35 = vld [vmem:[%s3629_s1 + $0x190] sm:$0xff]  }
  0x45   : > { %2723 = vmatprep.subr.bf16.mxu0 %v2930_v33  ;;  %407 = vst [vmem:[#allocation3 + $0x90] sm:$0xf] %v399_v11  ;;  %v420_v14 = vld [vmem:[#allocation2 + $0x24] sm:$0x1]  ;;  %v487_v16 = vshrl.u32 %v419_v12, 16  ;;  %v490_v17 = vshll.u32 %v419_v12, 16 }
  0x46   : > { %2768 = vmatpush3.bf16.msra.mxu1 %v2939_v4  ;;  %v612_v20 = vsel %vm3170_vm6, %v2491_v5, %v611_v10  ;;  %v496_v21 = vshll.u32 %v420_v14, 16  ;;  %v2951_v44 = vld [vmem:[%s3629_s1 + $0x1c8] sm:$0xff]   ;;  %v238_v49 = vld [vmem:[%s3159_s29 + $0x18] sm:$0xf]  ;;  %v239_v50 = vld [vmem:[%s3159_s29 + $0x1c] sm:$0xf] }
  0x47   : > { %2769 = vmatprep.subr.bf16.mxu1 %v2941_v9  ;;  %637 = vst [vmem:[#allocation3 + $0x98] sm:$0xf] %v612_v20  ;;  %v489_v22 = vrot.slane %v487_v16, 4  ;;  %v492_v23 = vrot.slane %v490_v17, 5  ;;  %v309_v52 = vshrl.u32 %v238_v49, 16  ;;  %v312_v53 = vshll.u32 %v238_v49, 16 }
  0x48   : > { %2724 = vmatpush3.bf16.msra.mxu0 %v2933_v45  ;;  %v568_v24 = vld [vmem:[#allocation2 + $0x28] sm:$0xe]  ;;  %v498_v34 = vrot.slane %v496_v21, 5  ;;  %v317_v54 = vshrl.u32 %v239_v50, 16  ;;  %v380_v55 = vld [vmem:[#allocation2 + $0x34] sm:$0x1] }
  0x49   : > { %2725 = vmatprep.subr.bf16.mxu0 %v2938_v62  ;;  %v569_v25 = vld [vmem:[#allocation2 + $0x2c] sm:$0x1]  ;;  %v645_v26 = vld [vmem:[#allocation2 + $0x28] sm:$0xf]  ;;  %v2492_v27 = vrot.slane %v568_v24, 9  ;;  %v493_v31 = vor.u32 %v492_v23, %v489_v22  ;;  %v320_v58 = vshll.u32 %v239_v50, 16  ;;  %v381_v59 = vsel %vm3182_vm8, %v307_v7, %v380_v55 }
  0x4a   : > { %v615_v28 = vrot.slane %v569_v25, 5  ;;  %v646_v29 = vld [vmem:[#allocation2 + $0x30] sm:$0xf]  ;;  %653 = vst [vmem:[#allocation3 + $0x9c] sm:$0xf] %v645_v26  ;;  %2770 = vmatpush3.bf16.msra.mxu1 %v2945_v35  ;;  %v311_v63 = vrot.slane %v309_v52, 7 }
  0x4b   : > { %v2928_v18 = vld [vmem:[#allocation3 + $0x4c] ss:$36 sps:$4 sm:$0xff]   ;;  %v400_v30 = vld [vmem:[#allocation2 + $0x28] sm:$0xf]  ;;  %654 = vst [vmem:[#allocation3 + $0xc0] sm:$0xf] %v646_v29  ;;  %2771 = vmatprep.subr.bf16.mxu1 %v2951_v44 }
  0x4c   : > { %2726 = vmatpush3.bf16.msra.mxu0 %v2940_v6  ;;  %1962 = vmatprep.mubr.bf16.mxu0 %v2928_v18  ;;  %408 = vst [vmem:[#allocation3 + $0xb4] sm:$0xf] %v400_v30  ;;  %v421_v32 = vld [vmem:[#allocation2 + $0x28] sm:$0xf]  ;;  %v422_v33 = vld [vmem:[#allocation2 + $0x2c] sm:$0x1]  ;;  %v616_v36 = vsel %vm3170_vm6, %v2492_v27, %v615_v28  ;;  %v314_v5 = vor.u32 %v312_v53, %v311_v63 }
  0x4d   : > { %2727 = vmatprep.subr.bf16.mxu0 %v2944_v13  ;;  %1963 = vmatmul.mubr.bf16.gmra.mxu0 %v2932_v19  ;;  %v494_v37 = vrot.slane %v493_v31, 4  ;;  %v501_v38 = vshrl.u32 %v421_v32, 16  ;;  %v504_v39 = vshll.u32 %v421_v32, 16  ;;  %638 = vst [vmem:[#allocation3 + $0xbc] sm:$0xf] %v616_v36  ;;  %v510_v42 = vshll.u32 %v422_v33, 16 }
  0x4e   : > { %v383_v60 = vld [vmem:[#allocation2 + $0x38] sm:$0xf]  ;;  %v386_v61 = vld [vmem:[#allocation2 + $0x3c] sm:$0x1]  ;;  %v2952_v62 = vld [vmem:[%s3629_s1 + $0x150] sm:$0xff]   ;;  %v3334_v0 = vrot.slane %v317_v54, 7 }
  0x4f   : > { %v499_v45 = vsel %vm3211_vm11, %v494_v37, %v498_v34  ;;  %v503_v47 = vrot.slane %v501_v38, 4  ;;  %v506_v48 = vrot.slane %v504_v39, 5  ;;  %v512_v51 = vrot.slane %v510_v42, 5  ;;  %382 = vst [vmem:[#allocation2 + $0x34] sm:$0x1] %v381_v59  ;;  %v2953_v2 = vld [vmem:[%s3629_s1 + $0x188] sm:$0xff]  }
  0x50   : > { %2728 = vmatpush3.bf16.msra.mxu0 %v2947_v41  ;;  %554 = vst [vmem:[#allocation3 + $0x94] sm:$0xf] %v499_v45  ;;  %v389_v1 = vld [vmem:[#allocation2 + $0x40] sm:$0xf]  ;;  %v570_v57 = vld [vmem:[#allocation2 + $0x30] sm:$0xe]  ;;  %v322_v7 = vor.u32 %v320_v58, %v3334_v0  ;;  %2772 = vmatpush3.bf16.msra.mxu1 %v2953_v2  ;;  %v384_v11 = vsel %vm3177_vm7, %v314_v5, %v383_v60 }
  0x51   : > { %v507_v56 = vor.u32 %v506_v48, %v503_v47  ;;  %2729 = vmatprep.subr.bf16.mxu0 %v2952_v62  ;;  %v2954_v4 = vld [vmem:[%s3629_s1 + $0x110] sm:$0xff]   ;;  %v315_v6 = vrot.slane %v311_v63, 4  ;;  %385 = vst [vmem:[#allocation2 + $0x38] sm:$0xf] %v384_v11  ;;  %v2493_v14 = vrot.slane %v570_v57, 9  ;;  %v2955_v16 = vld [vmem:[%s3629_s1 + $0x1c0] sm:$0xff]  }
  0x52   : > { %v2934_v8 = vld [vmem:[#allocation3 + $0x9c] ss:$36 sps:$4 sm:$0xff]   ;;  %v390_v13 = vsel %vm3177_vm7, %v322_v7, %v389_v1  ;;  %2773 = vmatprep.subr.bf16.mxu1 %v2955_v16  ;;  %v2959_v25 = vld [vmem:[%s3629_s1 + $0x180] sm:$0xff]   ;;  %v883_v54 = vld [vmem:[#allocation2 + $0x18] sm:$0xf] }
  0x53   : > { %v508_v3 = vrot.slane %v507_v56, 4  ;;  %v387_v12 = vsel %vm3182_vm8, %v315_v6, %v386_v61  ;;  %2035 = vmatprep.mubr.bf16.mxu1 %v2934_v8  ;;  %391 = vst [vmem:[#allocation2 + $0x40] sm:$0xf] %v390_v13  ;;  %v401_v18 = vld [vmem:[#allocation2 + $0x30] sm:$0xf]  ;;  %v2958_v23 = vld [vmem:[%s3629_s1 + $0x148] sm:$0xff]  }
  0x54   : > { %v2936_v9 = vld [vmem:[#allocation3 + $0x98] ss:$36 sps:$4 sm:$0xff]   ;;  %2730 = vmatpush3.bf16.msra.mxu0 %v2954_v4  ;;  %388 = vst [vmem:[#allocation2 + $0x3c] sm:$0x1] %v387_v12  ;;  %v423_v19 = vld [vmem:[#allocation2 + $0x30] sm:$0xf]  ;;  %2774 = vmatpush3.bf16.msra.mxu1 %v2959_v25 }
  0x55   : > { %v513_v10 = vsel %vm3211_vm11, %v508_v3, %v512_v51  ;;  %2036 = vmatmul.mubr.bf16.gmra.mxu1 %v2936_v9  ;;  %409 = vst [vmem:[#allocation3 + $0xd8] sm:$0xf] %v401_v18  ;;  %v515_v22 = vshrl.u32 %v423_v19, 16  ;;  %v518_v43 = vshll.u32 %v423_v19, 16  ;;  %2731 = vmatprep.subr.bf16.mxu0 %v2958_v23  ;;  %v2946_v30 = vld [vmem:[#allocation3 + $0x90] ss:$36 sps:$4 sm:$0xff]  }
  0x56   : > { %555 = vst [vmem:[#allocation3 + $0xb8] sm:$0xf] %v513_v10  ;;  %v571_v17 = vld [vmem:[#allocation2 + $0x34] sm:$0x1]  ;;  %v2961_v45 = vld [vmem:[%s3629_s1 + $0x108] sm:$0xff]   ;;  %v3370_v51 = vld [vmem:[%s3629_s1 + $0x238] sm:$0xff]  }
  0x57   : > { %v619_v20 = vrot.slane %v571_v17, 5  ;;  %v424_v21 = vld [vmem:[#allocation2 + $0x34] sm:$0x1]  ;;  %v517_v27 = vrot.slane %v515_v22, 4  ;;  %v520_v28 = vrot.slane %v518_v43, 5  ;;  %2835 = vmatprep.subr.bf16.mxu1 %v3370_v51  ;;  %v2966_v60 = vld [vmem:[%s3629_s1 + $0x140] sm:$0xff]  }
  0x58   : > { %v524_v24 = vshll.u32 %v424_v21, 16  ;;  %v572_v32 = vld [vmem:[#allocation2 + $0x38] sm:$0xe]  ;;  %2732 = vmatpush3.bf16.msra.mxu0 %v2961_v45  ;;  %v882_v53 = vld [vmem:[#allocation2 + $0x10] sm:$0xf]  ;;  %v2967_v4 = vld [vmem:[%s3629_s1 + $0x100] sm:$0xff]  }
  0x59   : > { %v620_v26 = vsel %vm3170_vm6, %v2493_v14, %v619_v20  ;;  %v647_v34 = vld [vmem:[#allocation2 + $0x38] sm:$0xf]  ;;  %v521_v35 = vor.u32 %v520_v28, %v517_v27  ;;  %v2494_v36 = vrot.slane %v572_v32, 9  ;;  %890 = vst [vmem:[#allocation3 + $0x18] sm:$0xf] %v882_v53  ;;  %2733 = vmatprep.subr.bf16.mxu0 %v2966_v60 }
  0x5a   : > { %639 = vst [vmem:[#allocation3 + $0xe0] sm:$0xf] %v620_v26  ;;  %v526_v31 = vrot.slane %v524_v24, 5  ;;  %v648_v38 = vld [vmem:[#allocation2 + $0x40] sm:$0xf] }
  0x5b   : > { %v573_v33 = vld [vmem:[#allocation2 + $0x3c] sm:$0x1]  ;;  %655 = vst [vmem:[#allocation3 + $0xe4] sm:$0xf] %v647_v34  ;;  %v402_v39 = vld [vmem:[#allocation2 + $0x38] sm:$0xf] }
  0x5c   : > { %v623_v37 = vrot.slane %v573_v33, 5  ;;  %656 = vst [vmem:[#allocation3 + $0x108] sm:$0xf] %v648_v38  ;;  %410 = vst [vmem:[#allocation3 + $0xfc] sm:$0xf] %v402_v39  ;;  %v522_v44 = vrot.slane %v521_v35, 4  ;;  %2734 = vmatpush3.bf16.msra.mxu0 %v2967_v4 }
  0x5d   : > { %v2942_v29 = vld [vmem:[#allocation3 + $0x94] ss:$36 sps:$4 sm:$0xff]   ;;  %v425_v41 = vld [vmem:[#allocation2 + $0x38] sm:$0xf]  ;;  %v426_v42 = vld [vmem:[#allocation2 + $0x3c] sm:$0x1]  ;;  %2811 = vmatprep.subr.bf16.mxu0 %v3370_v51 }
  0x5e   : > { %1970 = vmatprep.mubr.bf16.mxu0 %v2942_v29  ;;  %v624_v47 = vsel %vm3170_vm6, %v2494_v36, %v623_v37  ;;  %v529_v48 = vshrl.u32 %v425_v41, 16  ;;  %v532_v49 = vshll.u32 %v425_v41, 16  ;;  %v538_v50 = vshll.u32 %v426_v42, 16  ;;  %891 = vst [vmem:[#allocation3 + $0x3c] sm:$0xf] %v883_v54 }
  0x5f   : > { %1971 = vmatmul.mubr.bf16.gmra.mxu0 %v2946_v30  ;;  %640 = vst [vmem:[#allocation3 + $0x104] sm:$0xf] %v624_v47  ;;  %v527_v52 = vsel %vm3211_vm11, %v522_v44, %v526_v31  ;;  %v898_v59 = vld [vmem:[#allocation2 + $0x10] sm:$0xf]  ;;  %v899_v61 = vld [vmem:[#allocation2 + $0x14] sm:$0x1] }
  0x60   : > { %v531_v55 = vrot.slane %v529_v48, 4  ;;  %v534_v56 = vrot.slane %v532_v49, 5  ;;  %v540_v58 = vrot.slane %v538_v50, 5  ;;  %556 = vst [vmem:[#allocation3 + $0xdc] sm:$0xf] %v527_v52  ;;  %v915_v2 = vshrl.u32 %v898_v59, 16 }
  0x61   : > { %v900_v62 = vld [vmem:[#allocation2 + $0x18] sm:$0xf]  ;;  %v901_v63 = vld [vmem:[#allocation2 + $0x1c] sm:$0x1]  ;;  %v918_v3 = vshll.u32 %v898_v59, 16  ;;  %v924_v57 = vshll.u32 %v899_v61, 16 }
  0x62   : > { %v535_v1 = vor.u32 %v534_v56, %v531_v55  ;;  %v929_v5 = vshrl.u32 %v900_v62, 16  ;;  %v932_v6 = vshll.u32 %v900_v62, 16  ;;  %v938_v7 = vshll.u32 %v901_v63, 16  ;;  %v657_v43 = vld [vmem:[#allocation2 + $0x8] sm:$0xf] }
  0x63   : > { %v917_v9 = vrot.slane %v915_v2, 4  ;;  %v920_v10 = vrot.slane %v918_v3, 5  ;;  %v2948_v13 = vld [vmem:[#allocation3 + $0xe4] ss:$36 sps:$4 sm:$0xff]   ;;  %v926_v18 = vrot.slane %v924_v57, 5  ;;  %v674_v27 = vshrl.u32 %v657_v43, 16 }
  0x64   : > { %v536_v8 = vrot.slane %v535_v1, 4  ;;  %v931_v11 = vrot.slane %v929_v5, 4  ;;  %v934_v12 = vrot.slane %v932_v6, 5  ;;  %v940_v20 = vrot.slane %v938_v7, 5  ;;  %2043 = vmatprep.mubr.bf16.mxu1 %v2948_v13  ;;  %v658_v23 = vld [vmem:[#allocation2 + $0xc] sm:$0x1] }
  0x65   : > { %v921_v17 = vor.u32 %v920_v10, %v917_v9  ;;  %v659_v25 = vld [vmem:[#allocation2 + $0x10] sm:$0xf]  ;;  %v660_v26 = vld [vmem:[#allocation2 + $0x14] sm:$0x1]  ;;  %v677_v28 = vshll.u32 %v657_v43, 16  ;;  %v683_v30 = vshll.u32 %v658_v23, 16 }
  0x66   : > { %v2950_v14 = vld [vmem:[#allocation3 + $0xe0] ss:$36 sps:$4 sm:$0xff]   ;;  %v541_v16 = vsel %vm3211_vm11, %v536_v8, %v540_v58  ;;  %v935_v19 = vor.u32 %v934_v12, %v931_v11  ;;  %v688_v31 = vshrl.u32 %v659_v25, 16  ;;  %v691_v32 = vshll.u32 %v659_v25, 16  ;;  %v801_v33 = vld [vmem:[#allocation2 + $0x8] sm:$0xe] }
  0x67   : > { %557 = vst [vmem:[#allocation3 + $0x100] sm:$0xf] %v541_v16  ;;  %v922_v21 = vrot.slane %v921_v17, 4  ;;  %2044 = vmatmul.mubr.bf16.gmra.mxu1 %v2950_v14  ;;  %v676_v34 = vrot.slane %v674_v27, 4  ;;  %v679_v35 = vrot.slane %v677_v28, 5  ;;  %v697_v36 = vshll.u32 %v660_v26, 16 }
  0x68   : > { %v936_v22 = vrot.slane %v935_v19, 4  ;;  %v802_v37 = vld [vmem:[#allocation2 + $0xc] sm:$0x1]  ;;  %v2495_v38 = vrot.slane %v801_v33, 9  ;;  %v690_v39 = vrot.slane %v688_v31, 4  ;;  %v693_v41 = vrot.slane %v691_v32, 5 }
  0x69   : > { %v927_v24 = vsel %vm3211_vm11, %v922_v21, %v926_v18  ;;  %v803_v42 = vld [vmem:[#allocation2 + $0x10] sm:$0xe]  ;;  %v835_v44 = vrot.slane %v802_v37, 5  ;;  %v2960_v47 = vld [vmem:[#allocation3 + $0xd8] ss:$36 sps:$4 sm:$0xff]   ;;  %v680_v48 = vor.u32 %v679_v35, %v676_v34  ;;  %v685_v49 = vrot.slane %v683_v30, 5 }
  0x6a   : > { %v941_v29 = vsel %vm3211_vm11, %v936_v22, %v940_v20  ;;  %1034 = vst [vmem:[#allocation3 + $0x1c] sm:$0xf] %v927_v24  ;;  %v694_v50 = vor.u32 %v693_v41, %v690_v39  ;;  %v699_v52 = vrot.slane %v697_v36, 5  ;;  %v804_v53 = vld [vmem:[#allocation2 + $0x14] sm:$0x1]  ;;  %v2496_v55 = vrot.slane %v803_v42, 9 }
  0x6b   : > { %1035 = vst [vmem:[#allocation3 + $0x40] sm:$0xf] %v941_v29  ;;  %v836_v54 = vsel %vm3170_vm6, %v2495_v38, %v835_v44  ;;  %v884_v56 = vld [vmem:[#allocation2 + $0x20] sm:$0xf]  ;;  %v681_v58 = vrot.slane %v680_v48, 4  ;;  %v839_v59 = vrot.slane %v804_v53, 5 }
  0x6c   : > { %873 = vst [vmem:[#allocation3 + $0x14] sm:$0xf] %v836_v54  ;;  %v885_v60 = vld [vmem:[#allocation2 + $0x28] sm:$0xf]  ;;  %892 = vst [vmem:[#allocation3 + $0x60] sm:$0xf] %v884_v56 }
  0x6d   : > { %v902_v61 = vld [vmem:[#allocation2 + $0x20] sm:$0xf]  ;;  %v695_v62 = vrot.slane %v694_v50, 4  ;;  %893 = vst [vmem:[#allocation3 + $0x84] sm:$0xf] %v885_v60  ;;  %v686_v3 = vsel %vm3211_vm11, %v681_v58, %v685_v49  ;;  %v840_v57 = vsel %vm3170_vm6, %v2496_v55, %v839_v59  ;;  %v3399_v11 = vld [vmem:[%s3629_s1 + $0x230] sm:$0xff]  }
  0x6e   : > { %v2956_v45 = vld [vmem:[#allocation3 + $0xdc] ss:$36 sps:$4 sm:$0xff]   ;;  %v903_v63 = vld [vmem:[#allocation2 + $0x24] sm:$0x1]  ;;  %v904_v1 = vld [vmem:[#allocation2 + $0x28] sm:$0xf] }
  0x6f   : > { %1978 = vmatprep.mubr.bf16.mxu0 %v2956_v45  ;;  %v943_v2 = vshrl.u32 %v902_v61, 16  ;;  %v905_v4 = vld [vmem:[#allocation2 + $0x2c] sm:$0x1]  ;;  %v946_v5 = vshll.u32 %v902_v61, 16  ;;  %v952_v6 = vshll.u32 %v903_v63, 16  ;;  %v700_v9 = vsel %vm3211_vm11, %v695_v62, %v699_v52  ;;  %v3413_v37 = vld [vmem:[%s3629_s1 + $0x220] sm:$0xff]  }
  0x70   : > { %1979 = vmatmul.mubr.bf16.gmra.mxu0 %v2960_v47  ;;  %v2962_v7 = vld [vmem:[#allocation3 + $0x18] ss:$36 sps:$4 sm:$0xff]   ;;  %793 = vst [vmem:[#allocation3 + $0x10] sm:$0xf] %v686_v3  ;;  %874 = vst [vmem:[#allocation3 + $0x38] sm:$0xf] %v840_v57 }
  0x71   : > { %v945_v10 = vrot.slane %v943_v2, 4  ;;  %794 = vst [vmem:[#allocation3 + $0x34] sm:$0xf] %v700_v9  ;;  %v948_v12 = vrot.slane %v946_v5, 5  ;;  %v957_v13 = vshrl.u32 %v904_v1, 16  ;;  %v960_v14 = vshll.u32 %v904_v1, 16 }
  0x72   : > { %v2964_v8 = vld [vmem:[#allocation3 + $0x1c] ss:$36 sps:$4 sm:$0xff]   ;;  %v954_v16 = vrot.slane %v952_v6, 5  ;;  %v966_v17 = vshll.u32 %v905_v4, 16  ;;  %v661_v21 = vld [vmem:[#allocation2 + $0x18] sm:$0xf] }
  0x73   : > { %2149 = vmatprep.mubr.bf16.mxu1 %v2964_v8  ;;  %v949_v18 = vor.u32 %v948_v12, %v945_v10  ;;  %v959_v19 = vrot.slane %v957_v13, 4  ;;  %v962_v20 = vrot.slane %v960_v14, 5  ;;  %v662_v43 = vld [vmem:[#allocation2 + $0x1c] sm:$0x1]  ;;  %v663_v23 = vld [vmem:[#allocation2 + $0x20] sm:$0xf] }
  0x74   : > { %2150 = vmatmul.mubr.bf16.vlgmr.msra.gmra.mxu1 %v2962_v7  ;;  %v968_v22 = vrot.slane %v966_v17, 5  ;;  %v702_v24 = vshrl.u32 %v661_v21, 16  ;;  %v3406_v27 = vld [vmem:[%s3629_s1 + $0x228] sm:$0xff]   ;;  %v664_v28 = vld [vmem:[#allocation2 + $0x24] sm:$0x1]  ;;  %v705_v29 = vshll.u32 %v661_v21, 16 }
  0x75   : > { %2843 = vmatpush3.bf16.msra.mxu1 %v3370_v51  ;;  %v950_v25 = vrot.slane %v949_v18, 4  ;;  %v963_v26 = vor.u32 %v962_v20, %v959_v19  ;;  %v711_v30 = vshll.u32 %v662_v43, 16  ;;  %v716_v32 = vshrl.u32 %v663_v23, 16  ;;  %v805_v34 = vld [vmem:[#allocation2 + $0x18] sm:$0xe]  ;;  %v3442_v43 = vld [vmem:[%s3629_s1 + $0x210] sm:$0xff]  }
  0x76   : > { %2836 = vmatprep.subr.bf16.mxu1 %v3399_v11  ;;  %v704_v31 = vrot.slane %v702_v24, 4  ;;  %v719_v33 = vshll.u32 %v663_v23, 16  ;;  %v707_v38 = vrot.slane %v705_v29, 5  ;;  %v725_v39 = vshll.u32 %v664_v28, 16  ;;  %v806_v41 = vld [vmem:[#allocation2 + $0x1c] sm:$0x1] }
  0x77   : > { %v955_v35 = vsel %vm3211_vm11, %v950_v25, %v954_v16  ;;  %v964_v36 = vrot.slane %v963_v26, 4  ;;  %v2971_v44 = vld [vmem:[#allocation3 + $0x14] ss:$36 sps:$4 sm:$0xff]   ;;  %v718_v45 = vrot.slane %v716_v32, 4  ;;  %v713_v49 = vrot.slane %v711_v30, 5  ;;  %v3432_v9 = vld [vmem:[%s3629_s1 + $0x218] sm:$0xff]  }
  0x78   : > { %v2969_v42 = vld [vmem:[#allocation3 + $0x10] ss:$36 sps:$4 sm:$0xff]   ;;  %1036 = vst [vmem:[#allocation3 + $0x64] sm:$0xf] %v955_v35  ;;  %v708_v48 = vor.u32 %v707_v38, %v704_v31  ;;  %v721_v50 = vrot.slane %v719_v33, 5  ;;  %2084 = vmatprep.mubr.bf16.mxu0 %v2971_v44  ;;  %v2497_v54 = vrot.slane %v805_v34, 9 }
  0x79   : > { %2844 = vmatpush3.bf16.msra.mxu1 %v3399_v11  ;;  %v969_v47 = vsel %vm3211_vm11, %v964_v36, %v968_v22  ;;  %v807_v52 = vld [vmem:[#allocation2 + $0x20] sm:$0xe]  ;;  %v808_v53 = vld [vmem:[#allocation2 + $0x24] sm:$0x1]  ;;  %v843_v55 = vrot.slane %v806_v41, 5  ;;  %2085 = vmatmul.mubr.bf16.vlgmr.msra.gmra.mxu0 %v2969_v42  ;;  %v727_v62 = vrot.slane %v725_v39, 5 }
  0x7a   : > { %2837 = vmatprep.subr.bf16.mxu1 %v3406_v27  ;;  %1037 = vst [vmem:[#allocation3 + $0x88] sm:$0xf] %v969_v47  ;;  %v2498_v56 = vrot.slane %v807_v52, 9  ;;  %v847_v58 = vrot.slane %v808_v53, 5  ;;  %v886_v59 = vld [vmem:[#allocation2 + $0x30] sm:$0xf]  ;;  %v722_v61 = vor.u32 %v721_v50, %v718_v45  ;;  %2812 = vmatpush3.bf16.msra.mxu0 %v3370_v51 }
  0x7b   : > { %v709_v60 = vrot.slane %v708_v48, 4  ;;  %v887_v63 = vld [vmem:[#allocation2 + $0x38] sm:$0xf]  ;;  %894 = vst [vmem:[#allocation3 + $0xa8] sm:$0xf] %v886_v59  ;;  %v844_v2 = vsel %vm3170_vm6, %v2497_v54, %v843_v55  ;;  %2813 = vmatprep.subr.bf16.mxu0 %v3399_v11  ;;  %v323_v16 = vrot.slane %v3334_v0, 4 }
  0x7c   : > { %v906_v1 = vld [vmem:[#allocation2 + $0x30] sm:$0xf]  ;;  %v848_v3 = vsel %vm3170_vm6, %v2498_v56, %v847_v58  ;;  %895 = vst [vmem:[#allocation3 + $0xcc] sm:$0xf] %v887_v63  ;;  %v907_v57 = vld [vmem:[#allocation2 + $0x34] sm:$0x1] }
  0x7d   : > { %2845 = vmatpush3.bf16.msra.mxu1 %v3406_v27  ;;  %v908_v4 = vld [vmem:[#allocation2 + $0x38] sm:$0xf]  ;;  %v909_v5 = vld [vmem:[#allocation2 + $0x3c] sm:$0x1]  ;;  %v714_v6 = vsel %vm3211_vm11, %v709_v60, %v713_v49  ;;  %v723_v51 = vrot.slane %v722_v61, 4  ;;  %v971_v7 = vshrl.u32 %v906_v1, 16 }
  0x7e   : > { %2838 = vmatprep.subr.bf16.mxu1 %v3413_v37  ;;  %875 = vst [vmem:[#allocation3 + $0x5c] sm:$0xf] %v844_v2  ;;  %876 = vst [vmem:[#allocation3 + $0x80] sm:$0xf] %v848_v3  ;;  %v974_v8 = vshll.u32 %v906_v1, 16  ;;  %v980_v10 = vshll.u32 %v907_v57, 16  ;;  %2814 = vmatpush3.bf16.msra.mxu0 %v3399_v11 }
  0x7f   : > { %795 = vst [vmem:[#allocation3 + $0x58] sm:$0xf] %v714_v6  ;;  %v985_v12 = vshrl.u32 %v908_v4, 16  ;;  %v988_v13 = vshll.u32 %v908_v4, 16  ;;  %v994_v14 = vshll.u32 %v909_v5, 16  ;;  %v728_v17 = vsel %vm3211_vm11, %v723_v51, %v727_v62  ;;  %2815 = vmatprep.subr.bf16.mxu0 %v3406_v27  ;;  %v3457_v55 = vld [vmem:[%s3629_s1 + $0x208] sm:$0xff]  }
  0x80   : > { %v973_v18 = vrot.slane %v971_v7, 4  ;;  %v976_v19 = vrot.slane %v974_v8, 5  ;;  %796 = vst [vmem:[#allocation3 + $0x7c] sm:$0xf] %v728_v17  ;;  %v982_v20 = vrot.slane %v980_v10, 5  ;;  %v3471_v0 = vld [vmem:[%s3629_s1 + $0x200] sm:$0xff]  }
  0x81   : > { %2846 = vmatpush3.bf16.msra.mxu1 %v3413_v37  ;;  %v987_v21 = vrot.slane %v985_v12, 4  ;;  %v990_v22 = vrot.slane %v988_v13, 5  ;;  %v2972_v23 = vld [vmem:[#allocation3 + $0x64] ss:$36 sps:$4 sm:$0xff]   ;;  %v996_v26 = vrot.slane %v994_v14, 5 }
  0x82   : > { %v2974_v24 = vld [vmem:[#allocation3 + $0x60] ss:$36 sps:$4 sm:$0xff]   ;;  %v977_v25 = vor.u32 %v976_v19, %v973_v18  ;;  %2839 = vmatprep.subr.bf16.mxu1 %v3432_v9  ;;  %v665_v28 = vld [vmem:[#allocation2 + $0x28] sm:$0xf]  ;;  %v666_v29 = vld [vmem:[#allocation2 + $0x2c] sm:$0x1]  ;;  %2157 = vmatprep.mubr.bf16.mxu1 %v2972_v23 }
  0x83   : > { %v991_v11 = vor.u32 %v990_v22, %v987_v21  ;;  %v667_v30 = vld [vmem:[#allocation2 + $0x30] sm:$0xf]  ;;  %v668_v32 = vld [vmem:[#allocation2 + $0x34] sm:$0x1]  ;;  %v730_v33 = vshrl.u32 %v665_v28, 16  ;;  %v733_v34 = vshll.u32 %v665_v28, 16  ;;  %2158 = vmatmul.mubr.bf16.gmra.mxu1 %v2974_v24  ;;  %2816 = vmatpush3.bf16.msra.mxu0 %v3406_v27 }
  0x84   : > { %v978_v31 = vrot.slane %v977_v25, 4  ;;  %v739_v35 = vshll.u32 %v666_v29, 16  ;;  %v744_v38 = vshrl.u32 %v667_v30, 16  ;;  %v747_v39 = vshll.u32 %v667_v30, 16  ;;  %v809_v42 = vld [vmem:[#allocation2 + $0x28] sm:$0xe]  ;;  %2817 = vmatprep.subr.bf16.mxu0 %v3413_v37 }
  0x85   : > { %v992_v36 = vrot.slane %v991_v11, 4  ;;  %v753_v41 = vshll.u32 %v668_v32, 16  ;;  %2847 = vmatpush3.bf16.msra.mxu1 %v3432_v9  ;;  %v732_v45 = vrot.slane %v730_v33, 4  ;;  %v735_v47 = vrot.slane %v733_v34, 5  ;;  %v810_v49 = vld [vmem:[#allocation2 + $0x2c] sm:$0x1] }
  0x86   : > { %v983_v44 = vsel %vm3211_vm11, %v978_v31, %v982_v20  ;;  %v741_v48 = vrot.slane %v739_v35, 5  ;;  %2840 = vmatprep.subr.bf16.mxu1 %v3442_v43  ;;  %v746_v27 = vrot.slane %v744_v38, 4  ;;  %v749_v52 = vrot.slane %v747_v39, 5  ;;  %v811_v54 = vld [vmem:[#allocation2 + $0x30] sm:$0xe] }
  0x87   : > { %v997_v50 = vsel %vm3211_vm11, %v992_v36, %v996_v26  ;;  %1038 = vst [vmem:[#allocation3 + $0xac] sm:$0xf] %v983_v44  ;;  %v755_v53 = vrot.slane %v753_v41, 5  ;;  %v2977_v56 = vld [vmem:[#allocation3 + $0x5c] ss:$36 sps:$4 sm:$0xff]   ;;  %v736_v59 = vor.u32 %v735_v47, %v732_v45  ;;  %v2499_v60 = vrot.slane %v809_v42, 9  ;;  %2818 = vmatpush3.bf16.msra.mxu0 %v3413_v37 }
  0x88   : > { %v2979_v58 = vld [vmem:[#allocation3 + $0x58] ss:$36 sps:$4 sm:$0xff]   ;;  %1039 = vst [vmem:[#allocation3 + $0xd0] sm:$0xf] %v997_v50  ;;  %v750_v61 = vor.u32 %v749_v52, %v746_v27  ;;  %v812_v62 = vld [vmem:[#allocation2 + $0x34] sm:$0x1]  ;;  %2092 = vmatprep.mubr.bf16.mxu0 %v2977_v56  ;;  %2819 = vmatprep.subr.bf16.mxu0 %v3432_v9 }
  0x89   : > { %v851_v63 = vrot.slane %v810_v49, 5  ;;  %v2500_v1 = vrot.slane %v811_v54, 9  ;;  %v392_v2 = vld [vmem:[#allocation2 + $0x44] sm:$0x1]  ;;  %v737_v3 = vrot.slane %v736_v59, 4  ;;  %v855_v57 = vrot.slane %v812_v62, 5  ;;  %2093 = vmatmul.mubr.bf16.gmra.mxu0 %v2979_v58  ;;  %2848 = vmatpush3.bf16.msra.mxu1 %v3442_v43 }
  0x8a   : > { %v393_v4 = vsel %vm3182_vm8, %v323_v16, %v392_v2  ;;  %v888_v5 = vld [vmem:[#allocation2 + $0x40] sm:$0xf]  ;;  %v889_v6 = vld [vmem:[#allocation2 + $0x48] sm:$0xf]  ;;  %v751_v51 = vrot.slane %v750_v61, 4  ;;  %2841 = vmatprep.subr.bf16.mxu1 %v3457_v55 }
  0x8b   : > { %v852_v37 = vsel %vm3170_vm6, %v2499_v60, %v851_v63  ;;  %394 = vst [vmem:[#allocation2 + $0x44] sm:$0x1] %v393_v4  ;;  %896 = vst [vmem:[#allocation3 + $0xf0] sm:$0xf] %v888_v5  ;;  %v910_v7 = vld [vmem:[#allocation2 + $0x40] sm:$0xf]  ;;  %v742_v46 = vsel %vm3211_vm11, %v737_v3, %v741_v48  ;;  %v856_v10 = vsel %vm3170_vm6, %v2500_v1, %v855_v57  ;;  %2820 = vmatpush3.bf16.msra.mxu0 %v3432_v9 }
  0x8c   : > { %897 = vst [vmem:[#allocation3 + $0x114] sm:$0xf] %v889_v6  ;;  %v912_v8 = vld [vmem:[#allocation2 + $0x48] sm:$0xf]  ;;  %877 = vst [vmem:[#allocation3 + $0xa4] sm:$0xf] %v852_v37  ;;  %v756_v16 = vsel %vm3211_vm11, %v751_v51, %v755_v53  ;;  %2821 = vmatprep.subr.bf16.mxu0 %v3442_v43 }
  0x8d   : > { %v913_v12 = vld [vmem:[#allocation2 + $0x4c] sm:$0x1]  ;;  %v999_v13 = vshrl.u32 %v910_v7, 16  ;;  %v1002_v14 = vshll.u32 %v910_v7, 16  ;;  %797 = vst [vmem:[#allocation3 + $0xa0] sm:$0xf] %v742_v46  ;;  %2849 = vmatpush3.bf16.msra.mxu1 %v3457_v55 }
  0x8e   : > { %878 = vst [vmem:[#allocation3 + $0xc8] sm:$0xf] %v856_v10  ;;  %v1013_v17 = vshrl.u32 %v912_v8, 16  ;;  %v1016_v18 = vshll.u32 %v912_v8, 16  ;;  %v1022_v19 = vshll.u32 %v913_v12, 16  ;;  %2842 = vmatprep.subr.bf16.mxu1 %v3471_v0 }
  0x8f   : > { %798 = vst [vmem:[#allocation3 + $0xc4] sm:$0xf] %v756_v16  ;;  %v1001_v20 = vrot.slane %v999_v13, 4  ;;  %v1004_v21 = vrot.slane %v1002_v14, 5  ;;  %v2980_v22 = vld [vmem:[#allocation3 + $0xac] ss:$36 sps:$4 sm:$0xff]   ;;  %2822 = vmatpush3.bf16.msra.mxu0 %v3442_v43 }
  0x90   : > { %v2982_v23 = vld [vmem:[#allocation3 + $0xa8] ss:$36 sps:$4 sm:$0xff]   ;;  %v1015_v24 = vrot.slane %v1013_v17, 4  ;;  %v1018_v26 = vrot.slane %v1016_v18, 5  ;;  %v1024_v11 = vrot.slane %v1022_v19, 5  ;;  %2165 = vmatprep.mubr.bf16.mxu1 %v2980_v22  ;;  %2823 = vmatprep.subr.bf16.mxu0 %v3457_v55 }
  0x91   : > { %v1005_v25 = vor.u32 %v1004_v21, %v1001_v20  ;;  %v669_v28 = vld [vmem:[#allocation2 + $0x38] sm:$0xf]  ;;  %v670_v9 = vld [vmem:[#allocation2 + $0x3c] sm:$0x1]  ;;  %v671_v29 = vld [vmem:[#allocation2 + $0x40] sm:$0xf]  ;;  %2166 = vmatmul.mubr.bf16.gmra.mxu1 %v2982_v23 }
  0x92   : > { %v758_v30 = vshrl.u32 %v669_v28, 16  ;;  %v761_v31 = vshll.u32 %v669_v28, 16  ;;  %v911_v32 = vld [vmem:[#allocation2 + $0x44] sm:$0x1]  ;;  %v1019_v34 = vor.u32 %v1018_v26, %v1015_v24  ;;  %v767_v36 = vshll.u32 %v670_v9, 16  ;;  %2850 = vmatpush3.bf16.msra.mxu1 %v3471_v0 }
  0x93   : > { %v1006_v33 = vrot.slane %v1005_v25, 4  ;;  %v672_v35 = vld [vmem:[#allocation2 + $0x44] sm:$0x1]  ;;  %v1008_v38 = vshll.u32 %v911_v32, 16  ;;  %v772_v42 = vshrl.u32 %v671_v29, 16  ;;  %v775_v47 = vshll.u32 %v671_v29, 16  ;;  %2824 = vmatpush3.bf16.msra.mxu0 %v3457_v55 }
  0x94   : > { %v760_v39 = vrot.slane %v758_v30, 4  ;;  %v763_v41 = vrot.slane %v761_v31, 5  ;;  %v813_v44 = vld [vmem:[#allocation2 + $0x38] sm:$0xe]  ;;  %v1020_v43 = vrot.slane %v1019_v34, 4  ;;  %v769_v45 = vrot.slane %v767_v36, 5  ;;  %2825 = vmatprep.subr.bf16.mxu0 %v3471_v0 }
  0x95   : > { %v781_v48 = vshll.u32 %v672_v35, 16  ;;  %v2985_v49 = vld [vmem:[#allocation3 + $0xa4] ss:$36 sps:$4 sm:$0xff]   ;;  %v1010_v27 = vrot.slane %v1008_v38, 5  ;;  %v774_v54 = vrot.slane %v772_v42, 4  ;;  %v777_v56 = vrot.slane %v775_v47, 5 }
  0x96   : > { %v2987_v50 = vld [vmem:[#allocation3 + $0xa0] ss:$36 sps:$4 sm:$0xff]   ;;  %v764_v52 = vor.u32 %v763_v41, %v760_v39  ;;  %v1025_v53 = vsel %vm3211_vm11, %v1020_v43, %v1024_v11  ;;  %v814_v59 = vld [vmem:[#allocation2 + $0x3c] sm:$0x1]  ;;  %2100 = vmatprep.mubr.bf16.mxu0 %v2985_v49  ;;  %v815_v62 = vld [vmem:[#allocation2 + $0x40] sm:$0xe] }
  0x97   : > { %v783_v58 = vrot.slane %v781_v48, 5  ;;  %v1011_v60 = vsel %vm3211_vm11, %v1006_v33, %v1010_v27  ;;  %1041 = vst [vmem:[#allocation3 + $0x118] sm:$0xf] %v1025_v53  ;;  %v816_v63 = vld [vmem:[#allocation2 + $0x44] sm:$0x1]  ;;  %v2501_v1 = vrot.slane %v813_v44, 9  ;;  %2101 = vmatmul.mubr.bf16.gmra.mxu0 %v2987_v50  ;;  %v778_v55 = vor.u32 %v777_v56, %v774_v54 }
  0x98   : > { %v765_v61 = vrot.slane %v764_v52, 4  ;;  %1040 = vst [vmem:[#allocation3 + $0xf4] sm:$0xf] %v1011_v60  ;;  %v859_v2 = vrot.slane %v814_v59, 5  ;;  %v2502_v3 = vrot.slane %v815_v62, 9  ;;  %v863_v57 = vrot.slane %v816_v63, 5  ;;  %2826 = vmatpush3.bf16.msra.mxu0 %v3471_v0 }
  0x99   : > { %v1050_v4 = vld [vmem:[#allocation2 + $0x30] sm:$0xe]  ;;  %v1051_v6 = vld [vmem:[#allocation2 + $0x34] sm:$0x1]  ;;  %v1052_v51 = vld [vmem:[#allocation2 + $0x38] sm:$0xe] }
  0x9a   : > { %v770_v5 = vsel %vm3211_vm11, %v765_v61, %v769_v45  ;;  %v1053_v37 = vld [vmem:[#allocation2 + $0x3c] sm:$0x1]  ;;  %v779_v7 = vrot.slane %v778_v55, 4  ;;  %v860_v8 = vsel %vm3170_vm6, %v2501_v1, %v859_v2  ;;  %v864_v46 = vsel %vm3170_vm6, %v2502_v3, %v863_v57  ;;  %v1054_v12 = vld [vmem:[#allocation2 + $0x40] sm:$0xe] }
  0x9b   : > { %799 = vst [vmem:[#allocation3 + $0xe8] sm:$0xf] %v770_v5  ;;  %v2507_v10 = vrot.slane %v1050_v4, 9  ;;  %v1055_v13 = vld [vmem:[#allocation2 + $0x44] sm:$0x1]  ;;  %v1092_v14 = vrot.slane %v1051_v6, 5 }
  0x9c   : > { %879 = vst [vmem:[#allocation3 + $0xec] sm:$0xf] %v860_v8  ;;  %880 = vst [vmem:[#allocation3 + $0x110] sm:$0xf] %v864_v46  ;;  %v2508_v16 = vrot.slane %v1052_v51, 9  ;;  %v1096_v17 = vrot.slane %v1053_v37, 5  ;;  %v784_v0 = vsel %vm3211_vm11, %v779_v7, %v783_v58 }
  0x9d   : > { %v1056_v18 = vld [vmem:[#allocation2 + $0x48] sm:$0xe]  ;;  %v2509_v19 = vrot.slane %v1054_v12, 9  ;;  %v1057_v20 = vld [vmem:[#allocation2 + $0x4c] sm:$0x1]  ;;  %v1100_v21 = vrot.slane %v1055_v13, 5  ;;  %v1093_v24 = vsel %vm3170_vm6, %v2507_v10, %v1092_v14 }
  0x9e   : > { %v2510_v22 = vrot.slane %v1056_v18, 9  ;;  %v1042_v23 = vld [vmem:[#allocation2 + $0x10] sm:$0xe]  ;;  %800 = vst [vmem:[#allocation3 + $0x10c] sm:$0xf] %v784_v0  ;;  %v1097_v25 = vsel %vm3170_vm6, %v2508_v16, %v1096_v17  ;;  %v1104_v26 = vrot.slane %v1057_v20, 5 }
  0x9f   : > { %v1043_v11 = vld [vmem:[#allocation2 + $0x14] sm:$0x1]  ;;  %v1044_v28 = vld [vmem:[#allocation2 + $0x18] sm:$0xe]  ;;  %v2503_v9 = vrot.slane %v1042_v23, 9  ;;  %v1101_v15 = vsel %vm3170_vm6, %v2509_v19, %v1100_v21 }
  0xa0   : > { %1118 = vst [vmem:[#allocation3 + $0xb0] sm:$0xf] %v1093_v24  ;;  %1119 = vst [vmem:[#allocation3 + $0xd4] sm:$0xf] %v1097_v25  ;;  %v1045_v29 = vld [vmem:[#allocation2 + $0x1c] sm:$0x1]  ;;  %v1105_v34 = vsel %vm3170_vm6, %v2510_v22, %v1104_v26 }
  0xa1   : > { %v1076_v30 = vrot.slane %v1043_v11, 5  ;;  %v2504_v31 = vrot.slane %v1044_v28, 9  ;;  %v2988_v32 = vld [vmem:[#allocation3 + $0xf4] ss:$36 sps:$4 sm:$0xff]   ;;  %1120 = vst [vmem:[#allocation3 + $0xf8] sm:$0xf] %v1101_v15 }
  0xa2   : > { %v2990_v33 = vld [vmem:[#allocation3 + $0xf0] ss:$36 sps:$4 sm:$0xff]   ;;  %v1080_v35 = vrot.slane %v1045_v29, 5  ;;  %1121 = vst [vmem:[#allocation3 + $0x11c] sm:$0xf] %v1105_v34  ;;  %2173 = vmatprep.mubr.bf16.mxu1 %v2988_v32 }
  0xa3   : > { %v1077_v36 = vsel %vm3170_vm6, %v2503_v9, %v1076_v30  ;;  %v1046_v38 = vld [vmem:[#allocation2 + $0x20] sm:$0xe]  ;;  %v1047_v39 = vld [vmem:[#allocation2 + $0x24] sm:$0x1]  ;;  %v1048_v41 = vld [vmem:[#allocation2 + $0x28] sm:$0xe]  ;;  %2174 = vmatmul.mubr.bf16.gmra.mxu1 %v2990_v33 }
  0xa4   : > { %v1081_v42 = vsel %vm3170_vm6, %v2504_v31, %v1080_v35  ;;  %1114 = vst [vmem:[#allocation3 + $0x20] sm:$0xf] %v1077_v36  ;;  %v1049_v44 = vld [vmem:[#allocation2 + $0x2c] sm:$0x1]  ;;  %v2505_v43 = vrot.slane %v1046_v38, 9  ;;  %v1084_v45 = vrot.slane %v1047_v39, 5 }
  0xa5   : > { %v2506_v47 = vrot.slane %v1048_v41, 9  ;;  %1115 = vst [vmem:[#allocation3 + $0x44] sm:$0xf] %v1081_v42  ;;  %v1088_v48 = vrot.slane %v1049_v44, 5  ;;  %v2993_v50 = vld [vmem:[#allocation3 + $0xec] ss:$36 sps:$4 sm:$0xff]  }
  0xa6   : > { %v1085_v49 = vsel %vm3170_vm6, %v2505_v43, %v1084_v45  ;;  %v2995_v27 = vld [vmem:[#allocation3 + $0xe8] ss:$36 sps:$4 sm:$0xff]   ;;  %2108 = vmatprep.mubr.bf16.mxu0 %v2993_v50 }
  0xa7   : > { %v1089_v52 = vsel %vm3170_vm6, %v2506_v47, %v1088_v48  ;;  %1116 = vst [vmem:[#allocation3 + $0x68] sm:$0xf] %v1085_v49  ;;  %v2996_v53 = vld [vmem:[#allocation3 + $0xb0] ss:$36 sps:$4 sm:$0xff]   ;;  %2109 = vmatmul.mubr.bf16.gmra.mxu0 %v2995_v27 }
  0xa8   : > { %1117 = vst [vmem:[#allocation3 + $0x8c] sm:$0xf] %v1089_v52  ;;  %2831 = vmatprep.mubr.bf16.mxu1 %v2996_v53 }
  0xa9   : > { %v2997_v54 = vld [vmem:[#allocation3 + $0xf8] ss:$36 sps:$4 sm:$0xff]  }
  0xab   : > { %2832 = vmatmul.mubr.bf16.vlgmr.msra.gmra.mxu1 %v2997_v54 }
  0xac   : > { %v2998_v56 = vld [vmem:[#allocation3 + $0x20] ss:$36 sps:$4 sm:$0xff]  }
  0xad   : > { %2827 = vmatprep.mubr.bf16.mxu0 %v2998_v56 }
  0xaf   : > { %v2999_v58 = vld [vmem:[#allocation3 + $0x68] ss:$36 sps:$4 sm:$0xff]  }
  0xb0   : > { %2828 = vmatmul.mubr.bf16.vlgmr.msra.gmra.mxu0 %v2999_v58 }
  0xf5   : > { %v2695_v59 = vpop.f32.mrf.mxu1 }
  0xf7   : > { %v2696_v60 = vpop.f32.mrf.mxu1 }
  0xf8   : > { %v3518_v61 = vadd.f32 %v2696_v60, %v2695_v59 }
  0xf9   : > { %v3520_v62 = vpop.f32.mrf.mxu1 }
  0xfb   : > { %v3522_v63 = vpop.f32.mrf.mxu1 }
  0xff   : > { %v2655_v40 = vpop.f32.mrf.mxu0 }
 0x101   : > { %v2656_v1 = vpop.f32.mrf.mxu0 }
 0x102   : > { %v2657_v52 = vadd.f32 %v2656_v1, %v2655_v40 }
 0x103   : > { %v2701_v55 = vpop.f32.mrf.mxu1  ;;  %v3524_v2 = vpop.f32.mrf.mxu0 }
 0x105   : > { %v2702_v3 = vpop.f32.mrf.mxu1  ;;  %v3526_v57 = vpop.f32.mrf.mxu0 }
 0x106   : > { %v2703_v56 = vadd.f32 %v2702_v3, %v2701_v55 }
 0x107   : > { %v3528_v4 = vpop.f32.mrf.mxu1 }
 0x109   : > { %v3530_v6 = vpop.f32.mrf.mxu1 }
 0x10a   : > { %v2706_v55 = vadd.f32 %v3530_v6, %v3528_v4 }
 0x10d   : > { %v2661_v5 = vpop.f32.mrf.mxu0 }
 0x10f   : > { %v2662_v51 = vpop.f32.mrf.mxu0 }
 0x110   : > { %v2663_v58 = vadd.f32 %v2662_v51, %v2661_v5 }
 0x111   : > { %v3532_v7 = vpop.f32.mrf.mxu0 }
 0x112   : > { %v2030_v3 = vadd.f32 %v2703_v56, %v2663_v58 }
 0x113   : > { %v3534_v46 = vpop.f32.mrf.mxu0 }
 0x114   : > { %v2666_v5 = vadd.f32 %v3534_v46, %v3532_v7  ;;  %v2660_v7 = vadd.f32 %v3526_v57, %v3524_v2 }
 0x115   : > { %v2707_v37 = vpop.f32.mrf.mxu1 }
 0x116   : > { %v2033_v46 = vadd.f32 %v2706_v55, %v2666_v5 }
 0x117   : > { %v2708_v8 = vpop.f32.mrf.mxu1 }
 0x118   : > { %v2709_v49 = vadd.f32 %v2708_v8, %v2707_v37  ;;  %v2022_v37 = vadd.f32 %v3518_v61, %v2657_v52 }
 0x119   : > { %v2710_v10 = vpop.f32.mrf.mxu1 }
 0x11b   : > { %v2711_v13 = vpop.f32.mrf.mxu1 }
 0x11c   : > { %v2712_v59 = vadd.f32 %v2711_v13, %v2710_v10 }
 0x11f   : > { %v2667_v12 = vpop.f32.mrf.mxu0 }
 0x121   : > { %v2668_v14 = vpop.f32.mrf.mxu0 }
 0x122   : > { %v2669_v50 = vadd.f32 %v2668_v14, %v2667_v12 }
 0x123   : > { %v2670_v17 = vpop.f32.mrf.mxu0 }
 0x125   : > { %v2671_v19 = vpop.f32.mrf.mxu0 }
 0x126   : > { %v2672_v60 = vadd.f32 %v2671_v19, %v2670_v17 }
 0x127   : > { %v2713_v16 = vpop.f32.mrf.mxu1 }
 0x128   : > { %v2041_v51 = vadd.f32 %v2712_v59, %v2672_v60 }
 0x129   : > { %v2714_v18 = vpop.f32.mrf.mxu1 }
 0x12b   : > { %v2716_v0 = vpop.f32.mrf.mxu1 }
 0x12d   : > { %v2717_v21 = vpop.f32.mrf.mxu1 }
 0x12e   : > { %v2718_v13 = vadd.f32 %v2717_v21, %v2716_v0 }
 0x130   : > { %v2673_v20 = vpop.f32.mrf.mxu0 }
 0x132   : > { %v2674_v22 = vpop.f32.mrf.mxu0 }
 0x134   : > { %v2676_v23 = vpop.f32.mrf.mxu0  ;;  %v3536_v24 = vpop.f32.mrf.mxu1 }
 0x136   : > { %v2677_v25 = vpop.f32.mrf.mxu0  ;;  %v3538_v26 = vpop.f32.mrf.mxu1 }
 0x137   : > { %3640 = vst [vmem:[#allocation4_spill] sm:$0xff] %v3538_v26 }
 0x138   : > { %v3540_v28 = vpop.f32.mrf.mxu1 }
 0x139   : > { %v2735_v11 = vpop.f32.mrf.mxu0  ;;  %3641 = vst [vmem:[#allocation5_spill] sm:$0xff] %v3540_v28  ;;  %v2038_v28 = vadd.f32 %v2709_v49, %v2669_v50 }
 0x13a   : > { %v3542_v15 = vpop.f32.mrf.mxu1 }
 0x13b   : > { %v2736_v9 = vpop.f32.mrf.mxu0  ;;  %3642 = vst [vmem:[#allocation6_spill] sm:$0xff] %v3542_v15 }
 0x13c   : > { %v2737_v14 = vadd.f32 %v2736_v9, %v2735_v11 }
 0x13d   : > { %v3544_v29 = vpop.f32.mrf.mxu0 }
 0x13e   : > { %3643 = vst [vmem:[#allocation7_spill] sm:$0xff] %v3544_v29  ;;  %v3647_v0 = vld [vmem:[#allocation4_spill] sm:$0xff]  ;;  %v2087_v9 = vadd.f32 %v2737_v14, %v2022_v37 }
 0x13f   : > { %v3546_v32 = vpop.f32.mrf.mxu0  ;;  %v2777_v21 = vadd.f32 %v3647_v0, %v3536_v24 }
 0x140   : > { %3644 = vst [vmem:[#allocation8_spill] sm:$0xff] %v3546_v32  ;;  %v2700_v32 = vadd.f32 %v3522_v63, %v3520_v62  ;;  %v2678_v63 = vadd.f32 %v2677_v25, %v2676_v23 }
 0x142   : > { %v2049_v11 = vadd.f32 %v2718_v13, %v2678_v63 }
 0x143   : > { %v2781_v30 = vpop.f32.mrf.mxu1 }
 0x145   : > { %v2782_v31 = vpop.f32.mrf.mxu1 }
 0x146   : > { %v2783_v17 = vadd.f32 %v2782_v31, %v2781_v30 }
 0x147   : > { %v3548_v33 = vpop.f32.mrf.mxu1 }
 0x148   : > { %3645 = vst [vmem:[#allocation9_spill] sm:$0xff] %v3548_v33  ;;  %v2675_v33 = vadd.f32 %v2674_v22, %v2673_v20 }
 0x149   : > { %v2741_v34 = vpop.f32.mrf.mxu0  ;;  %v3550_v36 = vpop.f32.mrf.mxu1 }
 0x14a   : > { %3646 = vst [vmem:[#allocation10_spill] sm:$0xff] %v3550_v36  ;;  %v2715_v36 = vadd.f32 %v2714_v18, %v2713_v16 }
 0x14b   : > { %v2742_v35 = vpop.f32.mrf.mxu0 }
 0x14c   : > { %v2743_v29 = vadd.f32 %v2742_v35, %v2741_v34  ;;  %v2046_v62 = vadd.f32 %v2715_v36, %v2675_v33 }
 0x14d   : > { %v2744_v38 = vpop.f32.mrf.mxu0 }
 0x14e   : > { %v2095_v61 = vadd.f32 %v2743_v29, %v2030_v3  ;;  %v3649_v29 = vld [vmem:[#allocation8_spill] sm:$0xff] }
 0x14f   : > { %v2745_v41 = vpop.f32.mrf.mxu0 }
 0x150   : > { %v2746_v22 = vadd.f32 %v2745_v41, %v2744_v38  ;;  %v2160_v36 = vadd.f32 %v2783_v17, %v2095_v61  ;;  %v3650_v38 = vld [vmem:[#allocation9_spill] sm:$0xff] }
 0x151   : > { %v2787_v39 = vpop.f32.mrf.mxu1 }
 0x153   : > { %v2788_v42 = vpop.f32.mrf.mxu1 }
 0x154   : > { %v2789_v8 = vadd.f32 %v2788_v42, %v2787_v39  ;;  %v3651_v39 = vld [vmem:[#allocation10_spill] sm:$0xff]  ;;  %v2098_v42 = vadd.f32 %v2746_v22, %v2033_v46 }
 0x155   : > { %v2790_v43 = vpop.f32.mrf.mxu1  ;;  %v2786_v41 = vadd.f32 %v3651_v39, %v3650_v38 }
 0x157   : > { %v2747_v44 = vpop.f32.mrf.mxu0  ;;  %v2791_v47 = vpop.f32.mrf.mxu1 }
 0x159   : > { %v2748_v45 = vpop.f32.mrf.mxu0 }
 0x15a   : > { %v2749_v53 = vadd.f32 %v2748_v45, %v2747_v44  ;;  %v2025_v45 = vadd.f32 %v2700_v32, %v2660_v7 }
 0x15b   : > { %v2750_v48 = vpop.f32.mrf.mxu0 }
 0x15c   : > { %v2103_v40 = vadd.f32 %v2749_v53, %v2038_v28  ;;  %v2792_v28 = vadd.f32 %v2791_v47, %v2790_v43  ;;  %v3652_v53 = vld [vmem:[#allocation5_spill] sm:$0xff] }
 0x15d   : > { %v2751_v54 = vpop.f32.mrf.mxu0 }
 0x15e   : > { %v2752_v1 = vadd.f32 %v2751_v54, %v2750_v48  ;;  %v2168_v34 = vadd.f32 %v2789_v8, %v2103_v40  ;;  %v3653_v54 = vld [vmem:[#allocation6_spill] sm:$0xff]  ;;  %v2152_v8 = vadd.f32 %v2777_v21, %v2087_v9  ;;  %v2163_v40 = vadd.f32 %v2786_v41, %v2098_v42 }
 0x15f   : > { %v2780_v56 = vadd.f32 %v3653_v54, %v3652_v53 }
 0x160   : > { %v2106_v4 = vadd.f32 %v2752_v1, %v2041_v51 }
 0x163   : > { %v2793_v27 = vpop.f32.mrf.mxu1 }
 0x165   : > { %v2794_v15 = vpop.f32.mrf.mxu1 }
 0x166   : > { %v2795_v18 = vadd.f32 %v2794_v15, %v2793_v27  ;;  %v3648_v15 = vld [vmem:[#allocation7_spill] sm:$0xff] }
 0x167   : > { %v2796_v26 = vpop.f32.mrf.mxu1  ;;  %v2753_v12 = vpop.f32.mrf.mxu0  ;;  %v2740_v30 = vadd.f32 %v3649_v29, %v3648_v15 }
 0x169   : > { %v2797_v10 = vpop.f32.mrf.mxu1  ;;  %v2754_v16 = vpop.f32.mrf.mxu0  ;;  %v2090_v58 = vadd.f32 %v2740_v30, %v2025_v45 }
 0x16a   : > { %v2755_v19 = vadd.f32 %v2754_v16, %v2753_v12  ;;  %v2798_v35 = vadd.f32 %v2797_v10, %v2796_v26  ;;  %v2171_v26 = vadd.f32 %v2792_v28, %v2106_v4 }
 0x16b   : > { %v2833_v20 = vpop.f32.mrf.mxu1  ;;  %v2756_v6 = vpop.f32.mrf.mxu0  ;;  %v2155_v10 = vadd.f32 %v2780_v56, %v2090_v58 }
 0x16c   : > { %v2111_v23 = vadd.f32 %v2755_v19, %v2046_v62 }
 0x16d   : > { %v2232_v25 = vpop.f32.mrf.mxu1  ;;  %v2757_v33 = vpop.f32.mrf.mxu0 }
 0x16e   : > { %v3565_v31 = vadd.f32 %v2232_v25, %v2168_v34  ;;  %v2176_v2 = vadd.f32 %v2795_v18, %v2111_v23  ;;  %v2758_v57 = vadd.f32 %v2757_v33, %v2756_v6 }
 0x16f   : > { %v2834_v24 = vpop.f32.mrf.mxu1 }
 0x170   : > { %v2635_v44 = vpack.c.bf16 %v3565_v31, %v3565_v31  ;;  %v2829_v43 = vpop.f32.mrf.mxu0  ;;  %v2241_v47 = vadd.f32 %v2833_v20, %v2176_v2  ;;  %v2114_v48 = vadd.f32 %v2758_v57, %v2049_v11  ;;  %v2316_v46 = vmul.f32 %v3565_v31, %v3565_v31 }
 0x171   : > { %v2225_v49 = vadd.f32 %v2829_v43, %v2160_v36  ;;  %v2235_v50 = vpop.f32.mrf.mxu1  ;;  %v2296_v11 = vsel %vm2288_vm13, %v3565_v31, 0.0 }
 0x172   : > { %2284 = vst.msk [vmem:[%s3572_s7 + $0x10] sm:$0xf] %vm2279_vm12, %v2635_v44  ;;  %v2236_v27 = vadd.f32 %v2235_v50, %v2171_v26  ;;  %v2216_v52 = vpop.f32.mrf.mxu0  ;;  %v2637_v59 = vpack.c.bf16 %v2241_v47, %v2241_v47  ;;  %v2179_v60 = vadd.f32 %v2798_v35, %v2114_v48  ;;  %v2318_v33 = vmul.f32 %v2241_v47, %v2241_v47 }
 0x173   : > { %v2633_v37 = vpack.c.bf16 %v2225_v49, %v2225_v49  ;;  %v2217_v55 = vadd.f32 %v2216_v52, %v2152_v8  ;;  %v2314_v16 = vmul.f32 %v2225_v49, %v2225_v49  ;;  %v2292_v22 = vsel %vm2288_vm13, %v2225_v49, 0.0 }
 0x174   : > { %v2636_v32 = vpack.c.bf16 %v2236_v27, %v2236_v27  ;;  %v2830_v1 = vpop.f32.mrf.mxu0  ;;  %2286 = vst.msk [vmem:[%s3572_s7 + $0x18] sm:$0xf] %vm2279_vm12, %v2637_v59  ;;  %v2244_v12 = vadd.f32 %v2834_v24, %v2179_v60  ;;  %v2317_v9 = vmul.f32 %v2236_v27, %v2236_v27  ;;  %v2327_v35 = vsel %vm2288_vm13, %v2316_v46, 0.0 }
 0x175   : > { %2282 = vst.msk [vmem:[%s3572_s7 + $0x8] sm:$0xf] %vm2279_vm12, %v2633_v37  ;;  %v2228_v3 = vadd.f32 %v2830_v1, %v2163_v40  ;;  %v2631_v13 = vpack.c.bf16 %v2217_v55, %v2217_v55  ;;  %v2312_v63 = vmul.f32 %v2217_v55, %v2217_v55  ;;  %v2289_v17 = vsel %vm2288_vm13, %v2217_v55, 0.0 }
 0x176   : > { %2285 = vst.msk [vmem:[%s3572_s7 + $0x14] sm:$0xf] %vm2279_vm12, %v2636_v32  ;;  %v2219_v5 = vpop.f32.mrf.mxu0  ;;  %v2638_v51 = vpack.c.bf16 %v2244_v12, %v2244_v12  ;;  %v2323_v0 = vsel %vm2288_vm13, %v2314_v16, 0.0  ;;  %v2298_v2 = vsel %vm2288_vm13, %v2236_v27, 0.0  ;;  %v2300_v36 = vsel %vm2288_vm13, %v2241_v47, 0.0 }
 0x177   : > { %v2634_v62 = vpack.c.bf16 %v2228_v3, %v2228_v3  ;;  %v2220_v14 = vadd.f32 %v2219_v5, %v2155_v10  ;;  %2280 = vst.msk [vmem:[%s3572_s7] sm:$0xf] %vm2279_vm12, %v2631_v13  ;;  %v2320_v28 = vsel %vm2288_vm13, %v2312_v63, 0.0  ;;  %v2315_v4 = vmul.f32 %v2228_v3, %v2228_v3 }
 0x178   : > { %2287 = vst.msk [vmem:[%s3572_s7 + $0x1c] sm:$0xf] %vm2279_vm12, %v2638_v51  ;;  %v2294_v21 = vsel %vm2288_vm13, %v2228_v3, 0.0  ;;  %v2319_v38 = vmul.f32 %v2244_v12, %v2244_v12  ;;  %v2329_v39 = vsel %vm2288_vm13, %v2317_v9, 0.0  ;;  %v2331_v42 = vsel %vm2288_vm13, %v2318_v33, 0.0 }
 0x179   : > { %2283 = vst.msk [vmem:[%s3572_s7 + $0xc] sm:$0xf] %vm2279_vm12, %v2634_v62  ;;  %v2632_v61 = vpack.c.bf16 %v2220_v14, %v2220_v14  ;;  %v2290_v18 = vsel %vm2288_vm13, %v2220_v14, 0.0  ;;  %v2313_v19 = vmul.f32 %v2220_v14, %v2220_v14  ;;  %v2325_v15 = vsel %vm2288_vm13, %v2315_v4, 0.0 }
 0x17a   : > { %v2291_v20 = vadd.f32 %v2290_v18, %v2289_v17  ;;  %v2302_v44 = vsel %vm2288_vm13, %v2244_v12, 0.0  ;;  %v2333_v45 = vsel %vm2288_vm13, %v2319_v38, 0.0 }
 0x17b   : > { %2281 = vst.msk [vmem:[%s3572_s7 + $0x4] sm:$0xf] %vm2279_vm12, %v2632_v61  ;;  %v2321_v6 = vsel %vm2288_vm13, %v2313_v19, 0.0 }
 0x17c   : > { %v2293_v34 = vadd.f32 %v2292_v22, %v2291_v20  ;;  %v2322_v7 = vadd.f32 %v2321_v6, %v2320_v28 }
 0x17e   : > { %v2295_v23 = vadd.f32 %v2294_v21, %v2293_v34  ;;  %v2324_v25 = vadd.f32 %v2323_v0, %v2322_v7 }
 0x180   : > { %v2297_v29 = vadd.f32 %v2296_v11, %v2295_v23  ;;  %v2326_v30 = vadd.f32 %v2325_v15, %v2324_v25 }
 0x182   : > { %v2299_v57 = vadd.f32 %v2298_v2, %v2297_v29  ;;  %v2328_v24 = vadd.f32 %v2327_v35, %v2326_v30 }
 0x184   : > { %v2301_v41 = vadd.f32 %v2300_v36, %v2299_v57  ;;  %v2330_v31 = vadd.f32 %v2329_v39, %v2328_v24 }
 0x186   : > { %v2303_v43 = vadd.f32 %v2302_v44, %v2301_v41  ;;  %v2332_v26 = vadd.f32 %v2331_v42, %v2330_v31 }
 0x188   : > { %v2304_v48 = vrot.slane %v2303_v43, 4  ;;  %v2334_v49 = vadd.f32 %v2333_v45, %v2332_v26 }
 0x18a   : > { %v2305_v50 = vadd.f32 %v2304_v48, %v2303_v43  ;;  %v2335_v27 = vrot.slane %v2334_v49, 4 }
 0x18c   : > { %v2306_v52 = vrot.slane %v2305_v50, 2  ;;  %v2336_v47 = vadd.f32 %v2335_v27, %v2334_v49 }
 0x18e   : > { %v2307_v53 = vadd.f32 %v2306_v52, %v2305_v50  ;;  %v2337_v54 = vrot.slane %v2336_v47, 2 }
 0x190   : > { %v2308_v56 = vrot.slane %v2307_v53, 1  ;;  %v2338_v58 = vadd.f32 %v2337_v54, %v2336_v47 }
 0x192   : > { %v2309_v59 = vadd.f32 %v2308_v56, %v2307_v53  ;;  %v2339_v60 = vrot.slane %v2338_v58, 1 }
 0x194   : > { %2311 = vst.msk [vmem:[%s226_s10] sm:$0x1] %vm2310_vm14, %v2309_v59  ;;  %v2340_v37 = vadd.f32 %v2339_v60, %v2338_v58 }
 0x196   : > { %2341 = vst.msk [vmem:[%s226_s10 + $0x1] sm:$0x1] %vm2310_vm14, %v2340_v37 }
 0x197 PF: > { %s14_s14 = sadd.s32 1, %s3022_s14   ;;  %s3654_s12 = smov %s3018_s13 }
 0x198   : > { %p11_p5 = scmp.ge.s32.totalorder %s14_s14, 4   ;;  %s3655_s13 = smov %s3657_s15 }
 0x19a   :  { %13 = sbr.rel (!%p11_p5) target bundleno = 2 (0x2), region = 79 }

// kernel: down_forward.4
= control target key start
LH: loop header
LB: loop body
LE: loop exit
PB: predicated region body
PF: predicated region fallthrough
CT: control target
= control target key end

     0   :  { %s3216_s18 = smov 0   ;;  %s3218_s19 = smov 0   ;;  %s3807_s0 = inlined_call_operand.vmem [shape: bf16[2,64,32], index: 0, kind: input, shape index: {}]   ;;  %s3808_s1 = inlined_call_operand.vmem [shape: f32[1,32], index: 1, kind: input, shape index: {}]   ;;  %s3809_s2 = inlined_call_operand.vmem [shape: f32[1,32], index: 2, kind: input, shape index: {}]   ;;  %s3810_s3 = inlined_call_operand.vmem [shape: bf16[1152,32], index: 3, kind: input, shape index: {}]   ;;  %s3811_s4 = inlined_call_operand.vmem [shape: bf16[2,64,32], index: 4, kind: output, shape index: {0}]   ;;  %s3812_s5 = inlined_call_operand.vmem [shape: f32[2,2,32], index: 5, kind: output, shape index: {1}]  }
   0x1   :  { %s3220_s20 = smov 0  }
   0x2 LB: > { %s28_s21 = sadd.s32 1, %s3179_s19  ;;  %p2605_p0 = scmp.ge.s32.totalorder %s3183_s20, 1  ;;  %s3183_s20 = sphi %s3220_s20, %s16_s20   ;;  %s3179_s19 = sphi %s3218_s19, %s3836_s19   ;;  %s3175_s18 = sphi %s3216_s18, %s3835_s18  }
   0x3   : > { %p30_p1 = scmp.ge.s32.totalorder %s28_s21, 2  ;;  %p215_p2 = scmp.lt.s32.totalorder %s3183_s20, 3 }
   0x5   : > { %s3838_s21 = smov (%p30_p1, %s28_s21), 0  ;;  %p216_p3 = pnand %p2605_p0, %p215_p2 }
   0x7   : > { %219 = sbr.rel (%p216_p3) target bundleno = 415 (0x19f), region = 36 }
   0xc   : > { %v3037_v0 = vld [vmem:[%s3810_s3 + $0xf8] sm:$0xff]   ;;  %v3039_v2 = vld [vmem:[%s3810_s3 + $0xf0] sm:$0xff]   ;;  %v3185_v3 = vmov 0   ;;  %v3043_v7 = vld [vmem:[%s3810_s3 + $0xe8] sm:$0xff]   ;;  %p257_p4 = scmp.lt.s32.totalorder %s3175_s18, 1  ;;  %vm714_vm0 = vcmask 1042432  }
   0xd   : > { %v3038_v1 = vld [vmem:[%s3810_s3 + $0xb8] sm:$0xff]   ;;  %2840 = vmatprep.subr.bf16.mxu1 %v3037_v0  ;;  %364 = vst [vmem:[#allocation2] sm:$0xf] %v3185_v3  ;;  %365 = vst [vmem:[#allocation2 + $0x4] sm:$0x1] %v3185_v3  ;;  %v3041_v5 = vld [vmem:[%s3810_s3 + $0xb0] sm:$0xff]  }
   0xe   : > { %366 = vst [vmem:[#allocation2 + $0x8] sm:$0xf] %v3185_v3  ;;  %367 = vst [vmem:[#allocation2 + $0xc] sm:$0x1] %v3185_v3  ;;  %2841 = vmatpush3.bf16.msra.mxu1 %v3038_v1  ;;  %v3040_v4 = vld [vmem:[%s3810_s3 + $0x78] sm:$0xff]   ;;  %v3044_v8 = vld [vmem:[%s3810_s3 + $0x70] sm:$0xff]  }
   0xf   : > { %368 = vst [vmem:[#allocation2 + $0x10] sm:$0xf] %v3185_v3  ;;  %369 = vst [vmem:[#allocation2 + $0x14] sm:$0x1] %v3185_v3  ;;  %2842 = vmatprep.subr.bf16.mxu1 %v3039_v2  ;;  %2800 = vmatprep.subr.bf16.mxu0 %v3040_v4  ;;  %v3042_v6 = vld [vmem:[%s3810_s3 + $0x38] sm:$0xff]   ;;  %v3045_v9 = vld [vmem:[%s3810_s3 + $0xa8] sm:$0xff]  }
  0x10   : > { %370 = vst [vmem:[#allocation2 + $0x18] sm:$0xf] %v3185_v3  ;;  %371 = vst [vmem:[#allocation2 + $0x1c] sm:$0x1] %v3185_v3  ;;  %2801 = vmatpush3.bf16.msra.mxu0 %v3042_v6  ;;  %v3046_v10 = vld [vmem:[%s3810_s3 + $0x30] sm:$0xff]   ;;  %v3047_v11 = vld [vmem:[%s3810_s3 + $0xe0] sm:$0xff]  }
  0x11   : > { %372 = vst [vmem:[#allocation2 + $0x20] sm:$0xf] %v3185_v3  ;;  %373 = vst [vmem:[#allocation2 + $0x24] sm:$0x1] %v3185_v3  ;;  %2802 = vmatprep.subr.bf16.mxu0 %v3044_v8  ;;  %v3048_v12 = vld [vmem:[%s3810_s3 + $0x68] sm:$0xff]   ;;  %v3049_v13 = vld [vmem:[%s3810_s3 + $0xa0] sm:$0xff]  }
  0x12   : > { %374 = vst [vmem:[#allocation2 + $0x28] sm:$0xf] %v3185_v3  ;;  %375 = vst [vmem:[#allocation2 + $0x2c] sm:$0x1] %v3185_v3  ;;  %2843 = vmatpush3.bf16.msra.mxu1 %v3041_v5  ;;  %v3050_v14 = vld [vmem:[%s3810_s3 + $0x28] sm:$0xff]   ;;  %v3051_v15 = vld [vmem:[%s3810_s3 + $0xd8] sm:$0xff]  }
  0x13   : > { %376 = vst [vmem:[#allocation2 + $0x30] sm:$0xf] %v3185_v3  ;;  %377 = vst [vmem:[#allocation2 + $0x34] sm:$0x1] %v3185_v3  ;;  %2844 = vmatprep.subr.bf16.mxu1 %v3043_v7  ;;  %v3052_v16 = vld [vmem:[%s3810_s3 + $0x60] sm:$0xff]   ;;  %v3053_v17 = vld [vmem:[%s3810_s3 + $0x98] sm:$0xff]  }
  0x14   : > { %378 = vst [vmem:[#allocation2 + $0x38] sm:$0xf] %v3185_v3  ;;  %379 = vst [vmem:[#allocation2 + $0x3c] sm:$0x1] %v3185_v3  ;;  %2803 = vmatpush3.bf16.msra.mxu0 %v3046_v10  ;;  %v3054_v18 = vld [vmem:[%s3810_s3 + $0x20] sm:$0xff]   ;;  %v3055_v19 = vld [vmem:[%s3810_s3 + $0xd0] sm:$0xff]  }
  0x15   : > { %380 = vst [vmem:[#allocation2 + $0x40] sm:$0xf] %v3185_v3  ;;  %381 = vst [vmem:[#allocation2 + $0x44] sm:$0x1] %v3185_v3  ;;  %2804 = vmatprep.subr.bf16.mxu0 %v3048_v12  ;;  %v3056_v20 = vld [vmem:[%s3810_s3 + $0x58] sm:$0xff]   ;;  %v3057_v21 = vld [vmem:[%s3810_s3 + $0x90] sm:$0xff]  }
  0x16   : > { %382 = vst [vmem:[#allocation2 + $0x48] sm:$0xf] %v3185_v3  ;;  %383 = vst [vmem:[#allocation2 + $0x4c] sm:$0x1] %v3185_v3  ;;  %2845 = vmatpush3.bf16.msra.mxu1 %v3045_v9  ;;  %s3840_s18 = smov (!%p257_p4, %s3175_s18), 1  ;;  %v3058_v22 = vld [vmem:[%s3810_s3 + $0x18] sm:$0xff]  }
  0x17   : > { %2846 = vmatprep.subr.bf16.mxu1 %v3047_v11  ;;  %v3059_v23 = vld [vmem:[%s3810_s3 + $0xc8] sm:$0xff]   ;;  %v3060_v24 = vld [vmem:[%s3810_s3 + $0x50] sm:$0xff]   ;;  %s2763_s30 = sshll.u32 %s3840_s18, 5  ;;  %v3063_v27 = vld [vmem:[%s3810_s3 + $0xc0] sm:$0xff]   ;;  %vm715_vm1 = vcmask 1046532   ;;  %vm465_vm6 = vcmask 257024  }
  0x18   : > { %2805 = vmatpush3.bf16.msra.mxu0 %v3050_v14  ;;  %v3061_v25 = vld [vmem:[%s3810_s3 + $0x88] sm:$0xff]   ;;  %v3062_v26 = vld [vmem:[%s3810_s3 + $0x10] sm:$0xff]   ;;  %s3330_s14 = scalar_lea.vmem %s3807_s0, %s2763_s30  ;;  %v3065_v29 = vld [vmem:[%s3810_s3 + $0x80] sm:$0xff]   ;;  %vm466_vm2 = vsmask.f32 7938  ;;  %vm471_vm7 = vcmask 253952  }
  0x19   : > { %2806 = vmatprep.subr.bf16.mxu0 %v3052_v16  ;;  %v3064_v28 = vld [vmem:[%s3810_s3 + $0x48] sm:$0xff]   ;;  %v2782_v31 = vld [vmem:[%s3330_s14] sm:$0xff]   ;;  %vm472_vm3 = vsmask.f32 256  ;;  %vm3351_vm4 = vmor %vm714_vm0, %vm715_vm1  ;;  %vm551_vm5 = vsmask.f32 3328 }
  0x1a   : > { %2847 = vmatpush3.bf16.msra.mxu1 %v3049_v13  ;;  %v3066_v30 = vld [vmem:[%s3810_s3 + $0x8] sm:$0xff]   ;;  %v3342_v32 = vld [vmem:[%s3808_s1] ss:$0 sm:$0xff]  ;;  %v2783_v33 = vunpack.c.l.bf16 %v2782_v31  ;;  %v2784_v34 = vunpack.c.h.bf16 %v2782_v31  ;;  %v682_v38 = vld [vmem:[#allocation2] sm:$0xe]  ;;  %vm2412_vm12 = vcmask 261120  }
  0x1b   : > { %2848 = vmatprep.subr.bf16.mxu1 %v3051_v15  ;;  %v3347_v35 = vld [vmem:[%s3809_s2] ss:$0 sm:$0xff]  ;;  %v683_v39 = vld [vmem:[#allocation2 + $0x4] sm:$0x1]  ;;  %v2621_v41 = vrot.slane %v682_v38, 9  ;;  %v3070_v45 = vld [vmem:[%s3810_s3 + $0x1f8] sm:$0xff]  }
  0x1c   : > { %2807 = vmatpush3.bf16.msra.mxu0 %v3054_v18  ;;  %v309_v36 = vmul.f32 %v2783_v33, %v3342_v32  ;;  %v310_v37 = vmul.f32 %v2784_v34, %v3342_v32  ;;  %v719_v42 = vrot.slane %v683_v39, 5  ;;  %v3071_v47 = vld [vmem:[%s3810_s3 + $0x40] sm:$0xff]   ;;  %vm552_vm8 = vsmask.f32 7440  ;;  %vm3370_vm9 = vmand %vm465_vm6, %vm466_vm2  ;;  %v468_v63 = vld [vmem:[#allocation2 + $0x8] sm:$0xf] }
  0x1d   : > { %2808 = vmatprep.subr.bf16.mxu0 %v3056_v20  ;;  %v3073_v50 = vld [vmem:[%s3810_s3] sm:$0xff]   ;;  %v474_v0 = vld [vmem:[#allocation2 + $0xc] sm:$0x1]  ;;  %v3078_v4 = vld [vmem:[%s3810_s3 + $0x178] sm:$0xff]  }
  0x1e   : > { %2849 = vmatpush3.bf16.msra.mxu1 %v3053_v17  ;;  %v324_v43 = vadd.f32 %v3347_v35, %v309_v36  ;;  %v325_v44 = vadd.f32 %v3347_v35, %v310_v37  ;;  %v720_v46 = vsel %vm3351_vm4, %v2621_v41, %v719_v42  ;;  %v519_v53 = vld [vmem:[#allocation2] sm:$0xf]  ;;  %v536_v55 = vld [vmem:[#allocation2 + $0x4] sm:$0x1]  ;;  %vm3379_vm10 = vmand %vm471_vm7, %vm472_vm3 }
  0x1f   : > { %2850 = vmatprep.subr.bf16.mxu1 %v3055_v19  ;;  %757 = vst [vmem:[#allocation3 + $0x8] sm:$0xf] %v720_v46  ;;  %v535_v54 = vld [vmem:[#allocation2] sm:$0xf]  ;;  %527 = vst [vmem:[#allocation3] sm:$0xf] %v519_v53 }
  0x20   : > { %2809 = vmatpush3.bf16.msra.mxu0 %v3058_v22  ;;  %v332_v48 = vmax.f32 %v324_v43, 0.0  ;;  %v333_v49 = vmax.f32 %v325_v44, 0.0  ;;  %v555_v56 = vshrl.u32 %v535_v54, 16  ;;  %v558_v57 = vshll.u32 %v535_v54, 16  ;;  %v477_v8 = vld [vmem:[#allocation2 + $0x10] sm:$0xf]  ;;  %vm3386_vm11 = vmor %vm551_vm5, %vm552_vm8 }
  0x21   : > { %2810 = vmatprep.subr.bf16.mxu0 %v3060_v24  ;;  %v564_v3 = vshll.u32 %v536_v55, 16  ;;  %v2797_v11 = vld [vmem:[%s3330_s14 + $0x8] sm:$0xff]   ;;  %v480_v17 = vld [vmem:[#allocation2 + $0x14] sm:$0x1] }
  0x22   : > { %2851 = vmatpush3.bf16.msra.mxu1 %v3057_v21  ;;  %v2765_v51 = vpack.c.bf16 %v332_v48, %v332_v48  ;;  %v2766_v52 = vpack.c.bf16 %v333_v49, %v333_v49  ;;  %v557_v1 = vrot.slane %v555_v56, 4  ;;  %v560_v2 = vrot.slane %v558_v57, 5  ;;  %v2798_v34 = vld [vmem:[%s3330_s14 + $0x10] sm:$0xff]   ;;  %v483_v56 = vld [vmem:[#allocation2 + $0x18] sm:$0xf] }
  0x23   : > { %2852 = vmatprep.subr.bf16.mxu1 %v3059_v23  ;;  %v566_v10 = vrot.slane %v564_v3, 5  ;;  %v2787_v19 = vunpack.c.l.bf16 %v2797_v11  ;;  %v2788_v20 = vunpack.c.h.bf16 %v2797_v11  ;;  %v2791_v41 = vunpack.c.l.bf16 %v2798_v34  ;;  %v486_v57 = vld [vmem:[#allocation2 + $0x1c] sm:$0x1] }
  0x24   : > { %2811 = vmatpush3.bf16.msra.mxu0 %v3062_v26  ;;  %v385_v58 = vshrl.u32 %v2765_v51, 16  ;;  %v388_v59 = vshll.u32 %v2765_v51, 16  ;;  %v393_v60 = vshrl.u32 %v2766_v52, 16  ;;  %v396_v61 = vshll.u32 %v2766_v52, 16 }
  0x25   : > { %2812 = vmatprep.subr.bf16.mxu0 %v3064_v28  ;;  %v561_v9 = vor.u32 %v560_v2, %v557_v1  ;;  %v311_v26 = vmul.f32 %v2787_v19, %v3342_v32  ;;  %v2792_v42 = vunpack.c.h.bf16 %v2798_v34 }
  0x26   : > { %2853 = vmatpush3.bf16.msra.mxu1 %v3061_v25  ;;  %v387_v5 = vrot.slane %v385_v58, 7  ;;  %v395_v6 = vrot.slane %v393_v60, 7 }
  0x27   : > { %2854 = vmatprep.subr.bf16.mxu1 %v3063_v27  ;;  %v562_v18 = vrot.slane %v561_v9, 4  ;;  %v312_v27 = vmul.f32 %v2788_v20, %v3342_v32  ;;  %v326_v28 = vadd.f32 %v3347_v35, %v311_v26  ;;  %v314_v51 = vmul.f32 %v2792_v42, %v3342_v32 }
  0x28   : > { %2813 = vmatpush3.bf16.msra.mxu0 %v3066_v30  ;;  %v390_v12 = vor.u32 %v388_v59, %v387_v5  ;;  %v391_v13 = vrot.slane %v387_v5, 4  ;;  %v398_v14 = vor.u32 %v396_v61, %v395_v6  ;;  %v399_v15 = vrot.slane %v395_v6, 4 }
  0x29   : > { %2814 = vmatprep.subr.bf16.mxu0 %v3071_v47  ;;  %v567_v25 = vsel %vm3386_vm11, %v562_v18, %v566_v10  ;;  %v334_v30 = vmax.f32 %v326_v28, 0.0 }
  0x2a   : > { %2855 = vmatpush3.bf16.msra.mxu1 %v3065_v29  ;;  %v469_v21 = vsel %vm3370_vm9, %v390_v12, %v468_v63  ;;  %v475_v22 = vsel %vm3379_vm10, %v391_v13, %v474_v0  ;;  %v478_v23 = vsel %vm3370_vm9, %v398_v14, %v477_v8  ;;  %v481_v24 = vsel %vm3379_vm10, %v399_v15, %v480_v17  ;;  %v489_v13 = vld [vmem:[#allocation2 + $0x20] sm:$0xf] }
  0x2b   : > { %2920 = vmatprep.subr.bf16.mxu1 %v3070_v45  ;;  %470 = vst [vmem:[#allocation2 + $0x8] sm:$0xf] %v469_v21  ;;  %476 = vst [vmem:[#allocation2 + $0xc] sm:$0x1] %v475_v22  ;;  %v327_v29 = vadd.f32 %v3347_v35, %v312_v27  ;;  %v2767_v33 = vpack.c.bf16 %v334_v30, %v334_v30 }
  0x2c   : > { %2815 = vmatpush3.bf16.msra.mxu0 %v3073_v50  ;;  %479 = vst [vmem:[#allocation2 + $0x10] sm:$0xf] %v478_v23  ;;  %482 = vst [vmem:[#allocation2 + $0x14] sm:$0x1] %v481_v24  ;;  %v313_v50 = vmul.f32 %v2791_v41, %v3342_v32  ;;  %v492_v23 = vld [vmem:[#allocation2 + $0x24] sm:$0x1] }
  0x2d   : > { %2880 = vmatprep.subr.bf16.mxu0 %v3078_v4  ;;  %674 = vst [vmem:[#allocation3 + $0x4] sm:$0xf] %v567_v25  ;;  %v335_v31 = vmax.f32 %v327_v29, 0.0  ;;  %v401_v49 = vshrl.u32 %v2767_v33, 16  ;;  %v404_v60 = vshll.u32 %v2767_v33, 16  ;;  %v3072_v24 = vld [vmem:[%s3810_s3 + $0x1b8] sm:$0xff]   ;;  %v329_v33 = vadd.f32 %v3347_v35, %v314_v51 }
  0x2e   : > { %v328_v18 = vadd.f32 %v3347_v35, %v313_v50  ;;  %v3074_v29 = vld [vmem:[%s3810_s3 + $0x1f0] sm:$0xff]  }
  0x2f   : > { %v2768_v39 = vpack.c.bf16 %v335_v31, %v335_v31  ;;  %v403_v59 = vrot.slane %v401_v49, 7 }
  0x30   : > { %v336_v34 = vmax.f32 %v328_v18, 0.0 }
  0x31   : > { %v409_v61 = vshrl.u32 %v2768_v39, 16  ;;  %v412_v63 = vshll.u32 %v2768_v39, 16  ;;  %v406_v6 = vor.u32 %v404_v60, %v403_v59  ;;  %v407_v8 = vrot.slane %v403_v59, 4 }
  0x32   : > { %v684_v36 = vld [vmem:[#allocation2 + $0x8] sm:$0xe]  ;;  %v685_v37 = vld [vmem:[#allocation2 + $0xc] sm:$0x1] }
  0x33   : > { %v765_v38 = vld [vmem:[#allocation2 + $0x8] sm:$0xf]  ;;  %v2622_v43 = vrot.slane %v684_v36, 9  ;;  %v723_v44 = vrot.slane %v685_v37, 5  ;;  %v766_v45 = vld [vmem:[#allocation2 + $0x10] sm:$0xf]  ;;  %v484_v21 = vsel %vm3370_vm9, %v406_v6, %v483_v56  ;;  %v487_v22 = vsel %vm3379_vm10, %v407_v8, %v486_v57 }
  0x34   : > { %773 = vst [vmem:[#allocation3 + $0xc] sm:$0xf] %v765_v38  ;;  %v520_v46 = vld [vmem:[#allocation2 + $0x8] sm:$0xf]  ;;  %774 = vst [vmem:[#allocation3 + $0x30] sm:$0xf] %v766_v45 }
  0x35   : > { %528 = vst [vmem:[#allocation3 + $0x24] sm:$0xf] %v520_v46  ;;  %v537_v47 = vld [vmem:[#allocation2 + $0x8] sm:$0xf]  ;;  %v538_v48 = vld [vmem:[#allocation2 + $0xc] sm:$0x1]  ;;  %v724_v52 = vsel %vm3351_vm4, %v2622_v43, %v723_v44  ;;  %v2769_v44 = vpack.c.bf16 %v336_v34, %v336_v34 }
  0x36   : > { %v569_v53 = vshrl.u32 %v537_v47, 16  ;;  %v572_v54 = vshll.u32 %v537_v47, 16  ;;  %v578_v55 = vshll.u32 %v538_v48, 16  ;;  %v686_v58 = vld [vmem:[#allocation2 + $0x10] sm:$0xe]  ;;  %v411_v9 = vrot.slane %v409_v61, 7 }
  0x37   : > { %758 = vst [vmem:[#allocation3 + $0x2c] sm:$0xf] %v724_v52  ;;  %v687_v0 = vld [vmem:[#allocation2 + $0x14] sm:$0x1]  ;;  %v2623_v4 = vrot.slane %v686_v58, 9  ;;  %v337_v43 = vmax.f32 %v329_v33, 0.0 }
  0x38   : > { %v571_v1 = vrot.slane %v569_v53, 4  ;;  %v574_v2 = vrot.slane %v572_v54, 5  ;;  %v580_v3 = vrot.slane %v578_v55, 5  ;;  %v521_v5 = vld [vmem:[#allocation2 + $0x10] sm:$0xf]  ;;  %v727_v10 = vrot.slane %v687_v0, 5 }
  0x39   : > { %529 = vst [vmem:[#allocation3 + $0x48] sm:$0xf] %v521_v5  ;;  %v539_v11 = vld [vmem:[#allocation2 + $0x10] sm:$0xf]  ;;  %v540_v14 = vld [vmem:[#allocation2 + $0x14] sm:$0x1]  ;;  %v414_v19 = vor.u32 %v412_v63, %v411_v9  ;;  %v2770_v54 = vpack.c.bf16 %v337_v43, %v337_v43 }
  0x3a   : > { %v575_v12 = vor.u32 %v574_v2, %v571_v1  ;;  %v583_v15 = vshrl.u32 %v539_v11, 16  ;;  %v586_v17 = vshll.u32 %v539_v11, 16  ;;  %v415_v20 = vrot.slane %v411_v9, 4  ;;  %485 = vst [vmem:[#allocation2 + $0x18] sm:$0xf] %v484_v21  ;;  %v3079_v45 = vld [vmem:[%s3810_s3 + $0x1b0] sm:$0xff]  }
  0x3b   : > { %488 = vst [vmem:[#allocation2 + $0x1c] sm:$0x1] %v487_v22  ;;  %v728_v26 = vsel %vm3351_vm4, %v2623_v4, %v727_v10  ;;  %v490_v30 = vsel %vm3370_vm9, %v414_v19, %v489_v13  ;;  %v592_v31 = vshll.u32 %v540_v14, 16  ;;  %v3069_v37 = vld [vmem:[#allocation3 + $0xc] ss:$36 sps:$4 sm:$0xff]   ;;  %v3084_v47 = vld [vmem:[%s3810_s3 + $0x1e8] sm:$0xff]  }
  0x3c   : > { %v576_v25 = vrot.slane %v575_v12, 4  ;;  %v585_v27 = vrot.slane %v583_v15, 4  ;;  %v588_v28 = vrot.slane %v586_v17, 5  ;;  %759 = vst [vmem:[#allocation3 + $0x50] sm:$0xf] %v728_v26  ;;  %v493_v41 = vsel %vm3379_vm10, %v415_v20, %v492_v23  ;;  %2143 = vmatprep.mubr.bf16.mxu1 %v3069_v37  ;;  %v3080_v55 = vld [vmem:[%s3810_s3 + $0x138] sm:$0xff]  }
  0x3d   : > { %491 = vst [vmem:[#allocation2 + $0x20] sm:$0xf] %v490_v30  ;;  %v594_v42 = vrot.slane %v592_v31, 5  ;;  %494 = vst [vmem:[#allocation2 + $0x24] sm:$0x1] %v493_v41  ;;  %v417_v49 = vshrl.u32 %v2769_v44, 16 }
  0x3e   : > { %v3067_v36 = vld [vmem:[#allocation3 + $0x8] ss:$36 sps:$4 sm:$0xff]   ;;  %v581_v38 = vsel %vm3386_vm11, %v576_v25, %v580_v3  ;;  %v589_v39 = vor.u32 %v588_v28, %v585_v27  ;;  %v420_v50 = vshll.u32 %v2769_v44, 16  ;;  %v3086_v58 = vld [vmem:[%s3810_s3 + $0x1a8] sm:$0xff]   ;;  %v3085_v63 = vld [vmem:[%s3810_s3 + $0x170] sm:$0xff]   ;;  %v425_v13 = vshrl.u32 %v2770_v54, 16 }
  0x3f   : > { %675 = vst [vmem:[#allocation3 + $0x28] sm:$0xf] %v581_v38  ;;  %2144 = vmatmul.mubr.bf16.vlgmr.msra.gmra.mxu1 %v3067_v36  ;;  %v3088_v0 = vld [vmem:[%s3810_s3 + $0x1e0] sm:$0xff]   ;;  %v3075_v4 = vld [vmem:[#allocation3] ss:$36 sps:$4 sm:$0xff]   ;;  %v419_v12 = vrot.slane %v417_v49, 7 }
  0x40   : > { %v590_v46 = vrot.slane %v589_v39, 4  ;;  %2921 = vmatpush3.bf16.msra.mxu1 %v3072_v24  ;;  %v495_v9 = vld [vmem:[#allocation2 + $0x28] sm:$0xf]  ;;  %v498_v14 = vld [vmem:[#allocation2 + $0x2c] sm:$0x1]  ;;  %v3087_v17 = vld [vmem:[%s3810_s3 + $0x130] sm:$0xff]  }
  0x41   : > { %2922 = vmatprep.subr.bf16.mxu1 %v3074_v29  ;;  %v688_v51 = vld [vmem:[#allocation2 + $0x18] sm:$0xe]  ;;  %v3092_v19 = vld [vmem:[%s3810_s3 + $0x1a0] sm:$0xff]   ;;  %v428_v20 = vshll.u32 %v2770_v54, 16  ;;  %v501_v21 = vld [vmem:[#allocation2 + $0x30] sm:$0xf]  ;;  %v422_v26 = vor.u32 %v420_v50, %v419_v12 }
  0x42   : > { %v595_v48 = vsel %vm3386_vm11, %v590_v46, %v594_v42  ;;  %v689_v52 = vld [vmem:[#allocation2 + $0x1c] sm:$0x1]  ;;  %v767_v53 = vld [vmem:[#allocation2 + $0x18] sm:$0xf]  ;;  %v2624_v56 = vrot.slane %v688_v51, 9  ;;  %v3091_v25 = vld [vmem:[%s3810_s3 + $0x168] sm:$0xff]  }
  0x43   : > { %676 = vst [vmem:[#allocation3 + $0x4c] sm:$0xf] %v595_v48  ;;  %v731_v57 = vrot.slane %v689_v52, 5  ;;  %775 = vst [vmem:[#allocation3 + $0x54] sm:$0xf] %v767_v53  ;;  %v423_v27 = vrot.slane %v419_v12, 4  ;;  %v496_v41 = vsel %vm3370_vm9, %v422_v26, %v495_v9 }
  0x44   : > { %v522_v59 = vld [vmem:[#allocation2 + $0x18] sm:$0xf]  ;;  %v768_v61 = vld [vmem:[#allocation2 + $0x20] sm:$0xf]  ;;  %v542_v1 = vld [vmem:[#allocation2 + $0x1c] sm:$0x1]  ;;  %2923 = vmatpush3.bf16.msra.mxu1 %v3079_v45 }
  0x45   : > { %v541_v60 = vld [vmem:[#allocation2 + $0x18] sm:$0xf]  ;;  %530 = vst [vmem:[#allocation3 + $0x6c] sm:$0xf] %v522_v59  ;;  %v732_v6 = vsel %vm3351_vm4, %v2624_v56, %v731_v57  ;;  %776 = vst [vmem:[#allocation3 + $0x78] sm:$0xf] %v768_v61  ;;  %2924 = vmatprep.subr.bf16.mxu1 %v3084_v47  ;;  %v499_v44 = vsel %vm3379_vm10, %v423_v27, %v498_v14 }
  0x46   : > { %v597_v2 = vshrl.u32 %v541_v60, 16  ;;  %v600_v3 = vshll.u32 %v541_v60, 16  ;;  %v3077_v5 = vld [vmem:[#allocation3 + $0x4] ss:$36 sps:$4 sm:$0xff]   ;;  %v606_v8 = vshll.u32 %v542_v1, 16  ;;  %v427_v28 = vrot.slane %v425_v13, 7 }
  0x47   : > { %760 = vst [vmem:[#allocation3 + $0x74] sm:$0xf] %v732_v6  ;;  %v690_v15 = vld [vmem:[#allocation2 + $0x20] sm:$0xe]  ;;  %2078 = vmatprep.mubr.bf16.mxu0 %v3077_v5  ;;  %v691_v22 = vld [vmem:[#allocation2 + $0x24] sm:$0x1] }
  0x48   : > { %v599_v10 = vrot.slane %v597_v2, 4  ;;  %v602_v11 = vrot.slane %v600_v3, 5  ;;  %v608_v18 = vrot.slane %v606_v8, 5  ;;  %v2625_v23 = vrot.slane %v690_v15, 9  ;;  %2079 = vmatmul.mubr.bf16.vlgmr.msra.gmra.mxu0 %v3075_v4  ;;  %v523_v29 = vld [vmem:[#allocation2 + $0x20] sm:$0xf]  ;;  %2925 = vmatpush3.bf16.msra.mxu1 %v3086_v58 }
  0x49   : > { %v543_v30 = vld [vmem:[#allocation2 + $0x20] sm:$0xf]  ;;  %2881 = vmatpush3.bf16.msra.mxu0 %v3080_v55  ;;  %v735_v31 = vrot.slane %v691_v22, 5  ;;  %531 = vst [vmem:[#allocation3 + $0x90] sm:$0xf] %v523_v29  ;;  %2926 = vmatprep.subr.bf16.mxu1 %v3088_v0  ;;  %v430_v38 = vor.u32 %v428_v20, %v427_v28  ;;  %v431_v39 = vrot.slane %v427_v28, 4 }
  0x4a   : > { %v603_v24 = vor.u32 %v602_v11, %v599_v10  ;;  %v544_v33 = vld [vmem:[#allocation2 + $0x24] sm:$0x1]  ;;  %v611_v34 = vshrl.u32 %v543_v30, 16  ;;  %v614_v36 = vshll.u32 %v543_v30, 16  ;;  %2882 = vmatprep.subr.bf16.mxu0 %v3085_v63  ;;  %v3098_v42 = vld [vmem:[%s3810_s3 + $0x1d8] sm:$0xff]   ;;  %v3094_v43 = vld [vmem:[%s3810_s3 + $0x128] sm:$0xff]  }
  0x4b   : > { %497 = vst [vmem:[#allocation2 + $0x28] sm:$0xf] %v496_v41  ;;  %v736_v45 = vsel %vm3351_vm4, %v2625_v23, %v735_v31  ;;  %v3100_v46 = vld [vmem:[%s3810_s3 + $0x198] sm:$0xff]   ;;  %500 = vst [vmem:[#allocation2 + $0x2c] sm:$0x1] %v499_v44  ;;  %v502_v50 = vsel %vm3370_vm9, %v430_v38, %v501_v21  ;;  %v3099_v51 = vld [vmem:[%s3810_s3 + $0x160] sm:$0xff]  }
  0x4c   : > { %v604_v37 = vrot.slane %v603_v24, 4  ;;  %v613_v47 = vrot.slane %v611_v34, 4  ;;  %v616_v48 = vrot.slane %v614_v36, 5  ;;  %761 = vst [vmem:[#allocation3 + $0x98] sm:$0xf] %v736_v45  ;;  %v3102_v52 = vld [vmem:[%s3810_s3 + $0x1d0] sm:$0xff]   ;;  %2927 = vmatpush3.bf16.msra.mxu1 %v3092_v19 }
  0x4d   : > { %v620_v53 = vshll.u32 %v544_v33, 16  ;;  %v3081_v54 = vld [vmem:[#allocation3 + $0x54] ss:$36 sps:$4 sm:$0xff]   ;;  %2883 = vmatpush3.bf16.msra.mxu0 %v3087_v17  ;;  %503 = vst [vmem:[#allocation2 + $0x30] sm:$0xf] %v502_v50  ;;  %2928 = vmatprep.subr.bf16.mxu1 %v3098_v42  ;;  %v2799_v58 = vld [vmem:[%s3330_s14 + $0x18] sm:$0xff]   ;;  %s3749_s14 = scalar_lea.vmem %s3811_s4, %s2763_s30 }
  0x4e   : > { %v609_v49 = vsel %vm3386_vm11, %v604_v37, %v608_v18  ;;  %v3083_v55 = vld [vmem:[#allocation3 + $0x50] ss:$36 sps:$4 sm:$0xff]   ;;  %v617_v56 = vor.u32 %v616_v48, %v613_v47  ;;  %2884 = vmatprep.subr.bf16.mxu0 %v3091_v25  ;;  %v504_v59 = vld [vmem:[#allocation2 + $0x34] sm:$0x1]  ;;  %2151 = vmatprep.mubr.bf16.mxu1 %v3081_v54  ;;  %v2795_v63 = vunpack.c.l.bf16 %v2799_v58  ;;  %v2796_v0 = vunpack.c.h.bf16 %v2799_v58  ;;  %v3105_v2 = vld [vmem:[%s3810_s3 + $0x158] sm:$0xff]   ;;  %s2610_s30 = sshll.u32 %s3840_s18, 1 }
  0x4f   : > { %677 = vst [vmem:[#allocation3 + $0x70] sm:$0xf] %v609_v49  ;;  %v622_v57 = vrot.slane %v620_v53, 5  ;;  %v3101_v60 = vld [vmem:[%s3810_s3 + $0x120] sm:$0xff]   ;;  %v505_v1 = vsel %vm3379_vm10, %v431_v39, %v504_v59  ;;  %2152 = vmatmul.mubr.bf16.gmra.mxu1 %v3083_v55  ;;  %v3106_v3 = vld [vmem:[%s3810_s3 + $0x190] sm:$0xff]   ;;  %v3112_v8 = vld [vmem:[%s3810_s3 + $0x1c8] sm:$0xff]   ;;  %s280_s13 = scalar_lea.vmem %s3812_s5, %s2610_s30 }
  0x50   : > { %v618_v61 = vrot.slane %v617_v56, 4  ;;  %506 = vst [vmem:[#allocation2 + $0x34] sm:$0x1] %v505_v1  ;;  %2929 = vmatpush3.bf16.msra.mxu1 %v3100_v46  ;;  %v315_v5 = vmul.f32 %v2795_v63, %v3342_v32  ;;  %v316_v6 = vmul.f32 %v2796_v0, %v3342_v32  ;;  %v3108_v15 = vld [vmem:[%s3810_s3 + $0x118] sm:$0xff]   ;;  %v3114_v18 = vld [vmem:[%s3810_s3 + $0x188] sm:$0xff]   ;;  %v3113_v30 = vld [vmem:[%s3810_s3 + $0x150] sm:$0xff]  }
  0x51   : > { %2885 = vmatpush3.bf16.msra.mxu0 %v3094_v43  ;;  %2930 = vmatprep.subr.bf16.mxu1 %v3102_v52  ;;  %v3093_v20 = vld [vmem:[#allocation3 + $0x48] ss:$36 sps:$4 sm:$0xff]   ;;  %v3116_v37 = vld [vmem:[%s3810_s3 + $0x1c0] sm:$0xff]   ;;  %v3115_v42 = vld [vmem:[%s3810_s3 + $0x110] sm:$0xff]  }
  0x52   : > { %v623_v4 = vsel %vm3386_vm11, %v618_v61, %v622_v57  ;;  %v692_v9 = vld [vmem:[#allocation2 + $0x28] sm:$0xe]  ;;  %2886 = vmatprep.subr.bf16.mxu0 %v3099_v51  ;;  %v693_v12 = vld [vmem:[#allocation2 + $0x2c] sm:$0x1]  ;;  %v330_v32 = vadd.f32 %v3347_v35, %v315_v5  ;;  %v331_v17 = vadd.f32 %v3347_v35, %v316_v6  ;;  %v507_v51 = vld [vmem:[#allocation2 + $0x38] sm:$0xf] }
  0x53   : > { %v769_v10 = vld [vmem:[#allocation2 + $0x28] sm:$0xf]  ;;  %678 = vst [vmem:[#allocation3 + $0x94] sm:$0xf] %v623_v4  ;;  %v2626_v13 = vrot.slane %v692_v9, 9  ;;  %v739_v21 = vrot.slane %v693_v12, 5 }
  0x54   : > { %v524_v11 = vld [vmem:[#allocation2 + $0x28] sm:$0xf]  ;;  %777 = vst [vmem:[#allocation3 + $0x9c] sm:$0xf] %v769_v10  ;;  %v770_v22 = vld [vmem:[#allocation2 + $0x30] sm:$0xf]  ;;  %2931 = vmatpush3.bf16.msra.mxu1 %v3106_v3 }
  0x55   : > { %532 = vst [vmem:[#allocation3 + $0xb4] sm:$0xf] %v524_v11  ;;  %v545_v14 = vld [vmem:[#allocation2 + $0x28] sm:$0xf]  ;;  %2887 = vmatpush3.bf16.msra.mxu0 %v3101_v60  ;;  %v546_v23 = vld [vmem:[#allocation2 + $0x2c] sm:$0x1]  ;;  %v740_v26 = vsel %vm3351_vm4, %v2626_v13, %v739_v21  ;;  %2932 = vmatprep.subr.bf16.mxu1 %v3112_v8 }
  0x56   : > { %v3089_v19 = vld [vmem:[#allocation3 + $0x4c] ss:$36 sps:$4 sm:$0xff]   ;;  %v625_v24 = vshrl.u32 %v545_v14, 16  ;;  %v628_v25 = vshll.u32 %v545_v14, 16  ;;  %778 = vst [vmem:[#allocation3 + $0xc0] sm:$0xf] %v770_v22  ;;  %2888 = vmatprep.subr.bf16.mxu0 %v3105_v2 }
  0x57   : > { %2086 = vmatprep.mubr.bf16.mxu0 %v3089_v19  ;;  %v634_v27 = vshll.u32 %v546_v23, 16  ;;  %v338_v35 = vmax.f32 %v330_v32, 0.0  ;;  %v339_v28 = vmax.f32 %v331_v17, 0.0  ;;  %v694_v29 = vld [vmem:[#allocation2 + $0x30] sm:$0xe]  ;;  %v3119_v49 = vld [vmem:[%s3810_s3 + $0x148] sm:$0xff]  }
  0x58   : > { %2087 = vmatmul.mubr.bf16.gmra.mxu0 %v3093_v20  ;;  %762 = vst [vmem:[#allocation3 + $0xbc] sm:$0xf] %v740_v26  ;;  %v627_v31 = vrot.slane %v625_v24, 4  ;;  %v630_v33 = vrot.slane %v628_v25, 5  ;;  %v695_v34 = vld [vmem:[#allocation2 + $0x34] sm:$0x1]  ;;  %2933 = vmatpush3.bf16.msra.mxu1 %v3114_v18 }
  0x59   : > { %v2627_v36 = vrot.slane %v694_v29, 9  ;;  %v2771_v38 = vpack.c.bf16 %v338_v35, %v338_v35  ;;  %v2772_v39 = vpack.c.bf16 %v339_v28, %v339_v28  ;;  %v743_v41 = vrot.slane %v695_v34, 5  ;;  %2889 = vmatpush3.bf16.msra.mxu0 %v3108_v15  ;;  %2934 = vmatprep.subr.bf16.mxu1 %v3116_v37  ;;  %v510_v52 = vld [vmem:[#allocation2 + $0x3c] sm:$0x1]  ;;  %v513_v53 = vld [vmem:[#allocation2 + $0x40] sm:$0xf] }
  0x5a   : > { %v631_v43 = vor.u32 %v630_v33, %v627_v31  ;;  %v636_v44 = vrot.slane %v634_v27, 5  ;;  %2890 = vmatprep.subr.bf16.mxu0 %v3113_v30  ;;  %v3120_v55 = vld [vmem:[%s3810_s3 + $0x180] sm:$0xff]   ;;  %v525_v58 = vld [vmem:[#allocation2 + $0x30] sm:$0xf]  ;;  %v548_v61 = vld [vmem:[#allocation2 + $0x34] sm:$0x1] }
  0x5b   : > { %v433_v45 = vshrl.u32 %v2771_v38, 16  ;;  %v436_v46 = vshll.u32 %v2771_v38, 16  ;;  %v441_v47 = vshrl.u32 %v2772_v39, 16  ;;  %v444_v48 = vshll.u32 %v2772_v39, 16  ;;  %v547_v59 = vld [vmem:[#allocation2 + $0x30] sm:$0xf] }
  0x5c   : > { %v632_v50 = vrot.slane %v631_v43, 4  ;;  %v744_v54 = vsel %vm3351_vm4, %v2627_v36, %v743_v41  ;;  %533 = vst [vmem:[#allocation3 + $0xd8] sm:$0xf] %v525_v58  ;;  %v639_v63 = vshrl.u32 %v547_v59, 16  ;;  %v642_v0 = vshll.u32 %v547_v59, 16  ;;  %2935 = vmatpush3.bf16.msra.mxu1 %v3120_v55  ;;  %v3122_v15 = vld [vmem:[%s3810_s3 + $0x108] sm:$0xff]  }
  0x5d   : > { %v435_v56 = vrot.slane %v433_v45, 7  ;;  %v3531_v57 = vrot.slane %v441_v47, 7  ;;  %763 = vst [vmem:[#allocation3 + $0xe0] sm:$0xf] %v744_v54  ;;  %2891 = vmatpush3.bf16.msra.mxu0 %v3115_v42  ;;  %v3095_v1 = vld [vmem:[#allocation3 + $0x9c] ss:$36 sps:$4 sm:$0xff]  }
  0x5e   : > { %v637_v60 = vsel %vm3386_vm11, %v632_v50, %v636_v44  ;;  %2892 = vmatprep.subr.bf16.mxu0 %v3119_v49  ;;  %v641_v6 = vrot.slane %v639_v63, 4  ;;  %v644_v8 = vrot.slane %v642_v0, 5  ;;  %v648_v9 = vshll.u32 %v548_v61, 16  ;;  %2159 = vmatprep.mubr.bf16.mxu1 %v3095_v1  ;;  %v1006_v32 = vld [vmem:[#allocation2 + $0x10] sm:$0xf]  ;;  %v3550_v37 = vld [vmem:[%s3810_s3 + $0x238] sm:$0xff]  }
  0x5f   : > { %v3097_v2 = vld [vmem:[#allocation3 + $0x98] ss:$36 sps:$4 sm:$0xff]   ;;  %679 = vst [vmem:[#allocation3 + $0xb8] sm:$0xf] %v637_v60  ;;  %v438_v3 = vor.u32 %v436_v46, %v435_v56  ;;  %v439_v4 = vrot.slane %v435_v56, 4  ;;  %v446_v5 = vor.u32 %v444_v48, %v3531_v57  ;;  %2996 = vmatprep.subr.bf16.mxu1 %v3550_v37  ;;  %v3127_v56 = vld [vmem:[%s3810_s3 + $0x140] sm:$0xff]  }
  0x60   : > { %2160 = vmatmul.mubr.bf16.gmra.mxu1 %v3097_v2  ;;  %v645_v13 = vor.u32 %v644_v8, %v641_v6  ;;  %v650_v14 = vrot.slane %v648_v9, 5  ;;  %v1007_v17 = vld [vmem:[#allocation2 + $0x18] sm:$0xf]  ;;  %1014 = vst [vmem:[#allocation3 + $0x18] sm:$0xf] %v1006_v32  ;;  %v3128_v60 = vld [vmem:[%s3810_s3 + $0x100] sm:$0xff]  }
  0x61   : > { %v508_v10 = vsel %vm3370_vm9, %v438_v3, %v507_v51  ;;  %v511_v11 = vsel %vm3379_vm10, %v439_v4, %v510_v52  ;;  %v514_v12 = vsel %vm3370_vm9, %v446_v5, %v513_v53  ;;  %v1022_v18 = vld [vmem:[#allocation2 + $0x10] sm:$0xf]  ;;  %v1023_v19 = vld [vmem:[#allocation2 + $0x14] sm:$0x1]  ;;  %2893 = vmatpush3.bf16.msra.mxu0 %v3122_v15  ;;  %1015 = vst [vmem:[#allocation3 + $0x3c] sm:$0xf] %v1007_v17 }
  0x62   : > { %509 = vst [vmem:[#allocation2 + $0x38] sm:$0xf] %v508_v10  ;;  %512 = vst [vmem:[#allocation2 + $0x3c] sm:$0x1] %v511_v11  ;;  %v646_v20 = vrot.slane %v645_v13, 4  ;;  %v1039_v22 = vshrl.u32 %v1022_v18, 16  ;;  %2894 = vmatprep.subr.bf16.mxu0 %v3127_v56 }
  0x63   : > { %515 = vst [vmem:[#allocation2 + $0x40] sm:$0xf] %v514_v12  ;;  %v1024_v62 = vld [vmem:[#allocation2 + $0x18] sm:$0xf]  ;;  %v1025_v21 = vld [vmem:[#allocation2 + $0x1c] sm:$0x1] }
  0x64   : > { %v1042_v23 = vshll.u32 %v1022_v18, 16  ;;  %v1048_v24 = vshll.u32 %v1023_v19, 16  ;;  %v1053_v25 = vshrl.u32 %v1024_v62, 16  ;;  %v1056_v26 = vshll.u32 %v1024_v62, 16  ;;  %v3107_v35 = vld [vmem:[#allocation3 + $0x90] ss:$36 sps:$4 sm:$0xff]  }
  0x65   : > { %v651_v28 = vsel %vm3386_vm11, %v646_v20, %v650_v14  ;;  %v1041_v29 = vrot.slane %v1039_v22, 4  ;;  %v1062_v36 = vshll.u32 %v1025_v21, 16  ;;  %2895 = vmatpush3.bf16.msra.mxu0 %v3128_v60  ;;  %v781_v2 = vld [vmem:[#allocation2 + $0x8] sm:$0xf]  ;;  %v782_v3 = vld [vmem:[#allocation2 + $0xc] sm:$0x1] }
  0x66   : > { %v3103_v27 = vld [vmem:[#allocation3 + $0x94] ss:$36 sps:$4 sm:$0xff]   ;;  %680 = vst [vmem:[#allocation3 + $0xdc] sm:$0xf] %v651_v28  ;;  %v1044_v30 = vrot.slane %v1042_v23, 5  ;;  %v1050_v31 = vrot.slane %v1048_v24, 5  ;;  %2972 = vmatprep.subr.bf16.mxu0 %v3550_v37 }
  0x67   : > { %v1055_v33 = vrot.slane %v1053_v25, 4  ;;  %v1058_v34 = vrot.slane %v1056_v26, 5  ;;  %2094 = vmatprep.mubr.bf16.mxu0 %v3103_v27  ;;  %v1064_v59 = vrot.slane %v1062_v36, 5  ;;  %v783_v5 = vld [vmem:[#allocation2 + $0x10] sm:$0xf]  ;;  %v798_v8 = vshrl.u32 %v781_v2, 16 }
  0x68   : > { %2095 = vmatmul.mubr.bf16.gmra.mxu0 %v3107_v35  ;;  %v1045_v42 = vor.u32 %v1044_v30, %v1041_v29  ;;  %v784_v6 = vld [vmem:[#allocation2 + $0x14] sm:$0x1]  ;;  %v801_v9 = vshll.u32 %v781_v2, 16  ;;  %v807_v10 = vshll.u32 %v782_v3, 16  ;;  %v812_v11 = vshrl.u32 %v783_v5, 16 }
  0x69   : > { %v696_v38 = vld [vmem:[#allocation2 + $0x38] sm:$0xe]  ;;  %v697_v39 = vld [vmem:[#allocation2 + $0x3c] sm:$0x1]  ;;  %v1059_v43 = vor.u32 %v1058_v34, %v1055_v33  ;;  %v815_v12 = vshll.u32 %v783_v5, 16  ;;  %v821_v13 = vshll.u32 %v784_v6, 16 }
  0x6a   : > { %v771_v41 = vld [vmem:[#allocation2 + $0x38] sm:$0xf]  ;;  %v2628_v44 = vrot.slane %v696_v38, 9  ;;  %v747_v45 = vrot.slane %v697_v39, 5  ;;  %v772_v46 = vld [vmem:[#allocation2 + $0x40] sm:$0xf] }
  0x6b   : > { %779 = vst [vmem:[#allocation3 + $0xe4] sm:$0xf] %v771_v41  ;;  %v526_v47 = vld [vmem:[#allocation2 + $0x38] sm:$0xf]  ;;  %780 = vst [vmem:[#allocation3 + $0x108] sm:$0xf] %v772_v46 }
  0x6c   : > { %534 = vst [vmem:[#allocation3 + $0xfc] sm:$0xf] %v526_v47  ;;  %v549_v48 = vld [vmem:[#allocation2 + $0x38] sm:$0xf]  ;;  %v550_v49 = vld [vmem:[#allocation2 + $0x3c] sm:$0x1]  ;;  %v748_v52 = vsel %vm3351_vm4, %v2628_v44, %v747_v45 }
  0x6d   : > { %v1046_v50 = vrot.slane %v1045_v42, 4  ;;  %v1060_v51 = vrot.slane %v1059_v43, 4  ;;  %v653_v53 = vshrl.u32 %v549_v48, 16  ;;  %v656_v54 = vshll.u32 %v549_v48, 16  ;;  %764 = vst [vmem:[#allocation3 + $0x104] sm:$0xf] %v748_v52 }
  0x6e   : > { %v662_v55 = vshll.u32 %v550_v49, 16  ;;  %v800_v15 = vrot.slane %v798_v8, 4  ;;  %v803_v32 = vrot.slane %v801_v9, 5  ;;  %v925_v17 = vld [vmem:[#allocation2 + $0x8] sm:$0xe]  ;;  %v809_v18 = vrot.slane %v807_v10, 5 }
  0x6f   : > { %v1051_v58 = vsel %vm3386_vm11, %v1046_v50, %v1050_v31  ;;  %v655_v61 = vrot.slane %v653_v53, 4  ;;  %v658_v63 = vrot.slane %v656_v54, 5  ;;  %v1065_v1 = vsel %vm3386_vm11, %v1060_v51, %v1064_v59  ;;  %v926_v21 = vld [vmem:[#allocation2 + $0xc] sm:$0x1]  ;;  %v927_v35 = vld [vmem:[#allocation2 + $0x10] sm:$0xe] }
  0x70   : > { %1158 = vst [vmem:[#allocation3 + $0x1c] sm:$0xf] %v1051_v58  ;;  %v664_v0 = vrot.slane %v662_v55, 5  ;;  %1159 = vst [vmem:[#allocation3 + $0x40] sm:$0xf] %v1065_v1  ;;  %v814_v19 = vrot.slane %v812_v11, 4  ;;  %v804_v25 = vor.u32 %v803_v32, %v800_v15 }
  0x71   : > { %v659_v4 = vor.u32 %v658_v63, %v655_v61  ;;  %v817_v20 = vrot.slane %v815_v12, 5  ;;  %v823_v62 = vrot.slane %v821_v13, 5  ;;  %v2629_v26 = vrot.slane %v925_v17, 9  ;;  %v928_v28 = vld [vmem:[#allocation2 + $0x14] sm:$0x1]  ;;  %v3585_v13 = vld [vmem:[%s3810_s3 + $0x228] sm:$0xff]  }
  0x72   : > { %v3109_v22 = vld [vmem:[#allocation3 + $0xe4] ss:$36 sps:$4 sm:$0xff]   ;;  %v959_v29 = vrot.slane %v926_v21, 5  ;;  %v805_v30 = vrot.slane %v804_v25, 4  ;;  %v2630_v31 = vrot.slane %v927_v35, 9  ;;  %v963_v33 = vrot.slane %v928_v28, 5 }
  0x73   : > { %v660_v14 = vrot.slane %v659_v4, 4  ;;  %v818_v27 = vor.u32 %v817_v20, %v814_v19  ;;  %2167 = vmatprep.mubr.bf16.mxu1 %v3109_v22  ;;  %v1008_v34 = vld [vmem:[#allocation2 + $0x20] sm:$0xf]  ;;  %v1009_v43 = vld [vmem:[#allocation2 + $0x28] sm:$0xf]  ;;  %v3579_v63 = vld [vmem:[%s3810_s3 + $0x230] sm:$0xff]  }
  0x74   : > { %v3111_v23 = vld [vmem:[#allocation3 + $0xe0] ss:$36 sps:$4 sm:$0xff]   ;;  %v960_v39 = vsel %vm3351_vm4, %v2629_v26, %v959_v29  ;;  %1016 = vst [vmem:[#allocation3 + $0x60] sm:$0xf] %v1008_v34  ;;  %v810_v41 = vsel %vm3386_vm11, %v805_v30, %v809_v18  ;;  %v964_v42 = vsel %vm3351_vm4, %v2630_v31, %v963_v33  ;;  %v1026_v44 = vld [vmem:[#allocation2 + $0x20] sm:$0xf] }
  0x75   : > { %v665_v24 = vsel %vm3386_vm11, %v660_v14, %v664_v0  ;;  %2168 = vmatmul.mubr.bf16.gmra.mxu1 %v3111_v23  ;;  %v819_v38 = vrot.slane %v818_v27, 4  ;;  %997 = vst [vmem:[#allocation3 + $0x14] sm:$0xf] %v960_v39  ;;  %v1027_v45 = vld [vmem:[#allocation2 + $0x24] sm:$0x1]  ;;  %v1067_v50 = vshrl.u32 %v1026_v44, 16 }
  0x76   : > { %681 = vst [vmem:[#allocation3 + $0x100] sm:$0xf] %v665_v24  ;;  %v3123_v46 = vld [vmem:[#allocation3 + $0x18] ss:$36 sps:$4 sm:$0xff]   ;;  %917 = vst [vmem:[#allocation3 + $0x10] sm:$0xf] %v810_v41 }
  0x77   : > { %v3125_v36 = vld [vmem:[#allocation3 + $0x1c] ss:$36 sps:$4 sm:$0xff]   ;;  %v824_v47 = vsel %vm3386_vm11, %v819_v38, %v823_v62  ;;  %998 = vst [vmem:[#allocation3 + $0x38] sm:$0xf] %v964_v42  ;;  %1017 = vst [vmem:[#allocation3 + $0x84] sm:$0xf] %v1009_v43 }
  0x78   : > { %2273 = vmatprep.mubr.bf16.mxu1 %v3125_v36  ;;  %v1028_v48 = vld [vmem:[#allocation2 + $0x28] sm:$0xf]  ;;  %v1029_v49 = vld [vmem:[#allocation2 + $0x2c] sm:$0x1]  ;;  %v1070_v51 = vshll.u32 %v1026_v44, 16  ;;  %v1076_v52 = vshll.u32 %v1027_v45, 16 }
  0x79   : > { %918 = vst [vmem:[#allocation3 + $0x34] sm:$0xf] %v824_v47  ;;  %v1081_v53 = vshrl.u32 %v1028_v48, 16  ;;  %v1084_v54 = vshll.u32 %v1028_v48, 16  ;;  %v1090_v55 = vshll.u32 %v1029_v49, 16  ;;  %v1069_v56 = vrot.slane %v1067_v50, 4 }
  0x7a   : > { %v1072_v58 = vrot.slane %v1070_v51, 5  ;;  %v3121_v60 = vld [vmem:[#allocation3 + $0xd8] ss:$36 sps:$4 sm:$0xff]   ;;  %v1078_v61 = vrot.slane %v1076_v52, 5  ;;  %v785_v4 = vld [vmem:[#allocation2 + $0x18] sm:$0xf] }
  0x7b   : > { %v1083_v1 = vrot.slane %v1081_v53, 4  ;;  %v1086_v2 = vrot.slane %v1084_v54, 5  ;;  %v1092_v3 = vrot.slane %v1090_v55, 5  ;;  %v786_v5 = vld [vmem:[#allocation2 + $0x1c] sm:$0x1]  ;;  %v826_v11 = vshrl.u32 %v785_v4, 16 }
  0x7c   : > { %v1073_v0 = vor.u32 %v1072_v58, %v1069_v56  ;;  %v787_v6 = vld [vmem:[#allocation2 + $0x20] sm:$0xf]  ;;  %v788_v10 = vld [vmem:[#allocation2 + $0x24] sm:$0x1]  ;;  %v829_v12 = vshll.u32 %v785_v4, 16  ;;  %v835_v14 = vshll.u32 %v786_v5, 16 }
  0x7d   : > { %v3117_v59 = vld [vmem:[#allocation3 + $0xdc] ss:$36 sps:$4 sm:$0xff]   ;;  %2274 = vmatmul.mubr.bf16.vlgmr.msra.gmra.mxu1 %v3123_v46  ;;  %v1087_v9 = vor.u32 %v1086_v2, %v1083_v1  ;;  %v840_v15 = vshrl.u32 %v787_v6, 16  ;;  %v843_v32 = vshll.u32 %v787_v6, 16  ;;  %v849_v17 = vshll.u32 %v788_v10, 16  ;;  %v3596_v29 = vld [vmem:[%s3810_s3 + $0x220] sm:$0xff]  }
  0x7e   : > { %2102 = vmatprep.mubr.bf16.mxu0 %v3117_v59  ;;  %v1074_v8 = vrot.slane %v1073_v0, 4  ;;  %3004 = vmatpush3.bf16.msra.mxu1 %v3550_v37  ;;  %v3132_v19 = vld [vmem:[#allocation3 + $0x14] ss:$36 sps:$4 sm:$0xff]   ;;  %v828_v21 = vrot.slane %v826_v11, 4  ;;  %v831_v22 = vrot.slane %v829_v12, 5  ;;  %v837_v26 = vrot.slane %v835_v14, 5 }
  0x7f   : > { %2103 = vmatmul.mubr.bf16.gmra.mxu0 %v3121_v60  ;;  %2997 = vmatprep.subr.bf16.mxu1 %v3579_v63  ;;  %v1088_v62 = vrot.slane %v1087_v9, 4  ;;  %v842_v23 = vrot.slane %v840_v15, 4  ;;  %v929_v24 = vld [vmem:[#allocation2 + $0x18] sm:$0xe]  ;;  %v845_v27 = vrot.slane %v843_v32, 5  ;;  %v851_v39 = vrot.slane %v849_v17, 5 }
  0x80   : > { %v3130_v18 = vld [vmem:[#allocation3 + $0x10] ss:$36 sps:$4 sm:$0xff]   ;;  %v1079_v20 = vsel %vm3386_vm11, %v1074_v8, %v1078_v61  ;;  %2208 = vmatprep.mubr.bf16.mxu0 %v3132_v19  ;;  %v930_v35 = vld [vmem:[#allocation2 + $0x1c] sm:$0x1]  ;;  %v832_v30 = vor.u32 %v831_v22, %v828_v21  ;;  %v2631_v33 = vrot.slane %v929_v24, 9  ;;  %v447_v61 = vrot.slane %v3531_v57, 4 }
  0x81   : > { %1160 = vst [vmem:[#allocation3 + $0x64] sm:$0xf] %v1079_v20  ;;  %v1093_v25 = vsel %vm3386_vm11, %v1088_v62, %v1092_v3  ;;  %v931_v28 = vld [vmem:[#allocation2 + $0x20] sm:$0xe]  ;;  %v932_v31 = vld [vmem:[#allocation2 + $0x24] sm:$0x1]  ;;  %v846_v38 = vor.u32 %v845_v27, %v842_v23 }
  0x82   : > { %3005 = vmatpush3.bf16.msra.mxu1 %v3579_v63  ;;  %1161 = vst [vmem:[#allocation3 + $0x88] sm:$0xf] %v1093_v25  ;;  %v967_v34 = vrot.slane %v930_v35, 5  ;;  %v2632_v36 = vrot.slane %v931_v28, 9  ;;  %v971_v41 = vrot.slane %v932_v31, 5  ;;  %v833_v44 = vrot.slane %v832_v30, 4 }
  0x83   : > { %2998 = vmatprep.subr.bf16.mxu1 %v3585_v13  ;;  %v1010_v42 = vld [vmem:[#allocation2 + $0x30] sm:$0xf]  ;;  %v1011_v43 = vld [vmem:[#allocation2 + $0x38] sm:$0xf]  ;;  %v1031_v47 = vld [vmem:[#allocation2 + $0x34] sm:$0x1] }
  0x84   : > { %v968_v45 = vsel %vm3351_vm4, %v2631_v33, %v967_v34  ;;  %1018 = vst [vmem:[#allocation3 + $0xa8] sm:$0xf] %v1010_v42  ;;  %1019 = vst [vmem:[#allocation3 + $0xcc] sm:$0xf] %v1011_v43  ;;  %v1030_v46 = vld [vmem:[#allocation2 + $0x30] sm:$0xf]  ;;  %v972_v49 = vsel %vm3351_vm4, %v2632_v36, %v971_v41  ;;  %v838_v53 = vsel %vm3386_vm11, %v833_v44, %v837_v26 }
  0x85   : > { %v847_v48 = vrot.slane %v846_v38, 4  ;;  %999 = vst [vmem:[#allocation3 + $0x5c] sm:$0xf] %v968_v45  ;;  %v1032_v50 = vld [vmem:[#allocation2 + $0x38] sm:$0xf]  ;;  %v1095_v52 = vshrl.u32 %v1030_v46, 16 }
  0x86   : > { %v1033_v51 = vld [vmem:[#allocation2 + $0x3c] sm:$0x1]  ;;  %3006 = vmatpush3.bf16.msra.mxu1 %v3585_v13  ;;  %1000 = vst [vmem:[#allocation3 + $0x80] sm:$0xf] %v972_v49  ;;  %v1098_v54 = vshll.u32 %v1030_v46, 16  ;;  %v1104_v55 = vshll.u32 %v1031_v47, 16 }
  0x87   : > { %2209 = vmatmul.mubr.bf16.vlgmr.msra.gmra.mxu0 %v3130_v18  ;;  %v1109_v56 = vshrl.u32 %v1032_v50, 16  ;;  %2999 = vmatprep.subr.bf16.mxu1 %v3596_v29  ;;  %v852_v58 = vsel %vm3386_vm11, %v847_v48, %v851_v39  ;;  %919 = vst [vmem:[#allocation3 + $0x58] sm:$0xf] %v838_v53  ;;  %v1097_v59 = vrot.slane %v1095_v52, 4  ;;  %v1112_v60 = vshll.u32 %v1032_v50, 16  ;;  %v3615_v2 = vld [vmem:[%s3810_s3 + $0x218] sm:$0xff]  }
  0x88   : > { %2973 = vmatpush3.bf16.msra.mxu0 %v3550_v37  ;;  %v1118_v37 = vshll.u32 %v1033_v51, 16  ;;  %920 = vst [vmem:[#allocation3 + $0x7c] sm:$0xf] %v852_v58  ;;  %v1100_v0 = vrot.slane %v1098_v54, 5  ;;  %v3135_v4 = vld [vmem:[#allocation3 + $0x60] ss:$36 sps:$4 sm:$0xff]  }
  0x89   : > { %2974 = vmatprep.subr.bf16.mxu0 %v3579_v63  ;;  %v1111_v1 = vrot.slane %v1109_v56, 4  ;;  %v3133_v3 = vld [vmem:[#allocation3 + $0x64] ss:$36 sps:$4 sm:$0xff]   ;;  %v1114_v5 = vrot.slane %v1112_v60, 5  ;;  %v1106_v9 = vrot.slane %v1104_v55, 5  ;;  %v3629_v24 = vld [vmem:[%s3810_s3 + $0x208] sm:$0xff]  }
  0x8a   : > { %v3620_v6 = vld [vmem:[%s3810_s3 + $0x210] sm:$0xff]   ;;  %3007 = vmatpush3.bf16.msra.mxu1 %v3596_v29  ;;  %v1101_v8 = vor.u32 %v1100_v0, %v1097_v59  ;;  %v1120_v10 = vrot.slane %v1118_v37, 5  ;;  %v789_v11 = vld [vmem:[#allocation2 + $0x28] sm:$0xf]  ;;  %2281 = vmatprep.mubr.bf16.mxu1 %v3133_v3  ;;  %v790_v14 = vld [vmem:[#allocation2 + $0x2c] sm:$0x1] }
  0x8b   : > { %v1115_v12 = vor.u32 %v1114_v5, %v1111_v1  ;;  %v791_v15 = vld [vmem:[#allocation2 + $0x30] sm:$0xf]  ;;  %v792_v32 = vld [vmem:[#allocation2 + $0x34] sm:$0x1]  ;;  %2282 = vmatmul.mubr.bf16.gmra.mxu1 %v3135_v4  ;;  %3000 = vmatprep.subr.bf16.mxu1 %v3615_v2  ;;  %v854_v18 = vshrl.u32 %v789_v11, 16  ;;  %v857_v19 = vshll.u32 %v789_v11, 16 }
  0x8c   : > { %2975 = vmatpush3.bf16.msra.mxu0 %v3579_v63  ;;  %v1102_v17 = vrot.slane %v1101_v8, 4  ;;  %v863_v63 = vshll.u32 %v790_v14, 16  ;;  %v933_v20 = vld [vmem:[#allocation2 + $0x28] sm:$0xe]  ;;  %v868_v21 = vshrl.u32 %v791_v15, 16  ;;  %v871_v22 = vshll.u32 %v791_v15, 16 }
  0x8d   : > { %2976 = vmatprep.subr.bf16.mxu0 %v3585_v13  ;;  %v1116_v62 = vrot.slane %v1115_v12, 4  ;;  %v934_v23 = vld [vmem:[#allocation2 + $0x2c] sm:$0x1]  ;;  %v856_v26 = vrot.slane %v854_v18, 4  ;;  %v859_v27 = vrot.slane %v857_v19, 5  ;;  %v877_v35 = vshll.u32 %v792_v32, 16 }
  0x8e   : > { %v1107_v25 = vsel %vm3386_vm11, %v1102_v17, %v1106_v9  ;;  %3008 = vmatpush3.bf16.msra.mxu1 %v3615_v2  ;;  %v935_v28 = vld [vmem:[#allocation2 + $0x30] sm:$0xe]  ;;  %v865_v36 = vrot.slane %v863_v63, 5  ;;  %v873_v38 = vrot.slane %v871_v22, 5  ;;  %v936_v39 = vld [vmem:[#allocation2 + $0x34] sm:$0x1] }
  0x8f   : > { %v3138_v30 = vld [vmem:[#allocation3 + $0x5c] ss:$36 sps:$4 sm:$0xff]   ;;  %v1121_v33 = vsel %vm3386_vm11, %v1116_v62, %v1120_v10  ;;  %1162 = vst [vmem:[#allocation3 + $0xac] sm:$0xf] %v1107_v25  ;;  %3001 = vmatprep.subr.bf16.mxu1 %v3620_v6  ;;  %v860_v34 = vor.u32 %v859_v27, %v856_v26  ;;  %v2633_v41 = vrot.slane %v933_v20, 9  ;;  %v975_v42 = vrot.slane %v934_v23, 5 }
  0x90   : > { %2977 = vmatpush3.bf16.msra.mxu0 %v3585_v13  ;;  %v3140_v31 = vld [vmem:[#allocation3 + $0x58] ss:$36 sps:$4 sm:$0xff]   ;;  %v870_v13 = vrot.slane %v868_v21, 4  ;;  %1163 = vst [vmem:[#allocation3 + $0xd0] sm:$0xf] %v1121_v33  ;;  %2216 = vmatprep.mubr.bf16.mxu0 %v3138_v30  ;;  %v2634_v43 = vrot.slane %v935_v28, 9 }
  0x91   : > { %2978 = vmatprep.subr.bf16.mxu0 %v3596_v29  ;;  %v979_v44 = vrot.slane %v936_v39, 5  ;;  %v516_v45 = vld [vmem:[#allocation2 + $0x44] sm:$0x1]  ;;  %2217 = vmatmul.mubr.bf16.gmra.mxu0 %v3140_v31  ;;  %v861_v47 = vrot.slane %v860_v34, 4  ;;  %v879_v49 = vrot.slane %v877_v35, 5  ;;  %v976_v53 = vsel %vm3351_vm4, %v2633_v41, %v975_v42 }
  0x92   : > { %v3642_v46 = vld [vmem:[%s3810_s3 + $0x200] sm:$0xff]   ;;  %v874_v48 = vor.u32 %v873_v38, %v870_v13  ;;  %3009 = vmatpush3.bf16.msra.mxu1 %v3620_v6  ;;  %v517_v50 = vsel %vm3379_vm10, %v447_v61, %v516_v45  ;;  %v1013_v52 = vld [vmem:[#allocation2 + $0x48] sm:$0xf]  ;;  %v1037_v58 = vld [vmem:[#allocation2 + $0x4c] sm:$0x1] }
  0x93   : > { %v1012_v51 = vld [vmem:[#allocation2 + $0x40] sm:$0xf]  ;;  %v980_v54 = vsel %vm3351_vm4, %v2634_v43, %v979_v44  ;;  %518 = vst [vmem:[#allocation2 + $0x44] sm:$0x1] %v517_v50  ;;  %1021 = vst [vmem:[#allocation3 + $0x114] sm:$0xf] %v1013_v52  ;;  %3002 = vmatprep.subr.bf16.mxu1 %v3629_v24  ;;  %v866_v7 = vsel %vm3386_vm11, %v861_v47, %v865_v36 }
  0x94   : > { %2979 = vmatpush3.bf16.msra.mxu0 %v3596_v29  ;;  %1020 = vst [vmem:[#allocation3 + $0xf0] sm:$0xf] %v1012_v51  ;;  %v1034_v55 = vld [vmem:[#allocation2 + $0x40] sm:$0xf]  ;;  %v1036_v56 = vld [vmem:[#allocation2 + $0x48] sm:$0xf] }
  0x95   : > { %v875_v57 = vrot.slane %v874_v48, 4  ;;  %1001 = vst [vmem:[#allocation3 + $0xa4] sm:$0xf] %v976_v53  ;;  %1002 = vst [vmem:[#allocation3 + $0xc8] sm:$0xf] %v980_v54  ;;  %2980 = vmatprep.subr.bf16.mxu0 %v3615_v2  ;;  %v1123_v29 = vshrl.u32 %v1034_v55, 16 }
  0x96   : > { %v1126_v59 = vshll.u32 %v1034_v55, 16  ;;  %921 = vst [vmem:[#allocation3 + $0xa0] sm:$0xf] %v866_v7  ;;  %v1137_v60 = vshrl.u32 %v1036_v56, 16  ;;  %v1140_v37 = vshll.u32 %v1036_v56, 16  ;;  %v1146_v61 = vshll.u32 %v1037_v58, 16  ;;  %3010 = vmatpush3.bf16.msra.mxu1 %v3629_v24 }
  0x97   : > { %v880_v0 = vsel %vm3386_vm11, %v875_v57, %v879_v49  ;;  %v1125_v1 = vrot.slane %v1123_v29, 4  ;;  %v3141_v4 = vld [vmem:[#allocation3 + $0xac] ss:$36 sps:$4 sm:$0xff]   ;;  %3003 = vmatprep.subr.bf16.mxu1 %v3642_v46  ;;  %v793_v12 = vld [vmem:[#allocation2 + $0x38] sm:$0xf] }
  0x98   : > { %v1128_v3 = vrot.slane %v1126_v59, 5  ;;  %v3143_v5 = vld [vmem:[#allocation3 + $0xa8] ss:$36 sps:$4 sm:$0xff]   ;;  %922 = vst [vmem:[#allocation3 + $0xc4] sm:$0xf] %v880_v0  ;;  %2981 = vmatpush3.bf16.msra.mxu0 %v3615_v2  ;;  %v1139_v8 = vrot.slane %v1137_v60, 4  ;;  %2289 = vmatprep.mubr.bf16.mxu1 %v3141_v4 }
  0x99   : > { %v1142_v10 = vrot.slane %v1140_v37, 5  ;;  %v1148_v11 = vrot.slane %v1146_v61, 5  ;;  %2982 = vmatprep.subr.bf16.mxu0 %v3620_v6  ;;  %v794_v14 = vld [vmem:[#allocation2 + $0x3c] sm:$0x1]  ;;  %v795_v15 = vld [vmem:[#allocation2 + $0x40] sm:$0xf]  ;;  %2290 = vmatmul.mubr.bf16.gmra.mxu1 %v3143_v5 }
  0x9a   : > { %v1129_v9 = vor.u32 %v1128_v3, %v1125_v1  ;;  %v882_v32 = vshrl.u32 %v793_v12, 16  ;;  %v885_v17 = vshll.u32 %v793_v12, 16  ;;  %v1035_v18 = vld [vmem:[#allocation2 + $0x44] sm:$0x1]  ;;  %v891_v2 = vshll.u32 %v794_v14, 16  ;;  %3011 = vmatpush3.bf16.msra.mxu1 %v3642_v46 }
  0x9b   : > { %v1143_v63 = vor.u32 %v1142_v10, %v1139_v8  ;;  %v796_v20 = vld [vmem:[#allocation2 + $0x44] sm:$0x1]  ;;  %v1132_v62 = vshll.u32 %v1035_v18, 16  ;;  %v896_v23 = vshrl.u32 %v795_v15, 16  ;;  %v937_v25 = vld [vmem:[#allocation2 + $0x38] sm:$0xe] }
  0x9c   : > { %v1130_v19 = vrot.slane %v1129_v9, 4  ;;  %2983 = vmatpush3.bf16.msra.mxu0 %v3620_v6  ;;  %v884_v21 = vrot.slane %v882_v32, 4  ;;  %v887_v22 = vrot.slane %v885_v17, 5  ;;  %v893_v27 = vrot.slane %v891_v2, 5  ;;  %v938_v13 = vld [vmem:[#allocation2 + $0x3c] sm:$0x1] }
  0x9d   : > { %v1144_v26 = vrot.slane %v1143_v63, 4  ;;  %v899_v35 = vshll.u32 %v795_v15, 16  ;;  %v905_v28 = vshll.u32 %v796_v20, 16  ;;  %2984 = vmatprep.subr.bf16.mxu0 %v3629_v24  ;;  %v1134_v30 = vrot.slane %v1132_v62, 5  ;;  %v939_v34 = vld [vmem:[#allocation2 + $0x40] sm:$0xe] }
  0x9e   : > { %v888_v31 = vor.u32 %v887_v22, %v884_v21  ;;  %v898_v33 = vrot.slane %v896_v23, 4  ;;  %v3146_v36 = vld [vmem:[#allocation3 + $0xa4] ss:$36 sps:$4 sm:$0xff]   ;;  %v940_v44 = vld [vmem:[#allocation2 + $0x44] sm:$0x1]  ;;  %v2635_v45 = vrot.slane %v937_v25, 9 }
  0x9f   : > { %v3148_v38 = vld [vmem:[#allocation3 + $0xa0] ss:$36 sps:$4 sm:$0xff]   ;;  %v1149_v6 = vsel %vm3386_vm11, %v1144_v26, %v1148_v11  ;;  %v901_v39 = vrot.slane %v899_v35, 5  ;;  %v1135_v41 = vsel %vm3386_vm11, %v1130_v19, %v1134_v30  ;;  %v907_v43 = vrot.slane %v905_v28, 5  ;;  %2224 = vmatprep.mubr.bf16.mxu0 %v3146_v36  ;;  %v1176_v54 = vld [vmem:[#allocation2 + $0x38] sm:$0xe] }
  0xa0   : > { %1165 = vst [vmem:[#allocation3 + $0x118] sm:$0xf] %v1149_v6  ;;  %v889_v42 = vrot.slane %v888_v31, 4  ;;  %2985 = vmatpush3.bf16.msra.mxu0 %v3629_v24  ;;  %1164 = vst [vmem:[#allocation3 + $0xf4] sm:$0xf] %v1135_v41  ;;  %v983_v48 = vrot.slane %v938_v13, 5 }
  0xa1   : > { %v902_v47 = vor.u32 %v901_v39, %v898_v33  ;;  %v2636_v49 = vrot.slane %v939_v34, 9  ;;  %v987_v50 = vrot.slane %v940_v44, 5  ;;  %v1174_v51 = vld [vmem:[#allocation2 + $0x30] sm:$0xe]  ;;  %2986 = vmatprep.subr.bf16.mxu0 %v3642_v46  ;;  %2225 = vmatmul.mubr.bf16.gmra.mxu0 %v3148_v38  ;;  %v1175_v53 = vld [vmem:[#allocation2 + $0x34] sm:$0x1] }
  0xa2   : > { %v894_v52 = vsel %vm3386_vm11, %v889_v42, %v893_v27  ;;  %v1177_v55 = vld [vmem:[#allocation2 + $0x3c] sm:$0x1]  ;;  %v984_v24 = vsel %vm3351_vm4, %v2635_v45, %v983_v48  ;;  %v2641_v7 = vrot.slane %v1174_v51, 9  ;;  %v1178_v57 = vld [vmem:[#allocation2 + $0x40] sm:$0xe]  ;;  %v1216_v59 = vrot.slane %v1175_v53, 5 }
  0xa3   : > { %v903_v56 = vrot.slane %v902_v47, 4  ;;  %923 = vst [vmem:[#allocation3 + $0xe8] sm:$0xf] %v894_v52  ;;  %v988_v58 = vsel %vm3351_vm4, %v2636_v49, %v987_v50  ;;  %v1179_v29 = vld [vmem:[#allocation2 + $0x44] sm:$0x1]  ;;  %v2642_v60 = vrot.slane %v1176_v54, 9 }
  0xa4   : > { %1003 = vst [vmem:[#allocation3 + $0xec] sm:$0xf] %v984_v24  ;;  %1004 = vst [vmem:[#allocation3 + $0x110] sm:$0xf] %v988_v58  ;;  %v1220_v37 = vrot.slane %v1177_v55, 5  ;;  %v2643_v0 = vrot.slane %v1178_v57, 9  ;;  %2987 = vmatpush3.bf16.msra.mxu0 %v3642_v46  ;;  %v1217_v9 = vsel %vm3351_vm4, %v2641_v7, %v1216_v59 }
  0xa5   : > { %v1180_v61 = vld [vmem:[#allocation2 + $0x48] sm:$0xe]  ;;  %v908_v1 = vsel %vm3386_vm11, %v903_v56, %v907_v43  ;;  %v1181_v3 = vld [vmem:[#allocation2 + $0x4c] sm:$0x1]  ;;  %v1224_v4 = vrot.slane %v1179_v29, 5 }
  0xa6   : > { %v2644_v5 = vrot.slane %v1180_v61, 9  ;;  %v1166_v8 = vld [vmem:[#allocation2 + $0x10] sm:$0xe]  ;;  %924 = vst [vmem:[#allocation3 + $0x10c] sm:$0xf] %v908_v1  ;;  %v1221_v10 = vsel %vm3351_vm4, %v2642_v60, %v1220_v37  ;;  %v1228_v11 = vrot.slane %v1181_v3, 5 }
  0xa7   : > { %v1167_v12 = vld [vmem:[#allocation2 + $0x14] sm:$0x1]  ;;  %v1168_v14 = vld [vmem:[#allocation2 + $0x18] sm:$0xe]  ;;  %v2637_v15 = vrot.slane %v1166_v8, 9  ;;  %v1225_v16 = vsel %vm3351_vm4, %v2643_v0, %v1224_v4 }
  0xa8   : > { %1242 = vst [vmem:[#allocation3 + $0xb0] sm:$0xf] %v1217_v9  ;;  %1243 = vst [vmem:[#allocation3 + $0xd4] sm:$0xf] %v1221_v10  ;;  %v1169_v46 = vld [vmem:[#allocation2 + $0x1c] sm:$0x1]  ;;  %v1229_v63 = vsel %vm3351_vm4, %v2644_v5, %v1228_v11 }
  0xa9   : > { %v1200_v32 = vrot.slane %v1167_v12, 5  ;;  %v2638_v17 = vrot.slane %v1168_v14, 9  ;;  %v3149_v18 = vld [vmem:[#allocation3 + $0xf4] ss:$36 sps:$4 sm:$0xff]   ;;  %1244 = vst [vmem:[#allocation3 + $0xf8] sm:$0xf] %v1225_v16 }
  0xaa   : > { %v3151_v19 = vld [vmem:[#allocation3 + $0xf0] ss:$36 sps:$4 sm:$0xff]   ;;  %v1204_v20 = vrot.slane %v1169_v46, 5  ;;  %1245 = vst [vmem:[#allocation3 + $0x11c] sm:$0xf] %v1229_v63  ;;  %2297 = vmatprep.mubr.bf16.mxu1 %v3149_v18 }
  0xab   : > { %v1201_v2 = vsel %vm3351_vm4, %v2637_v15, %v1200_v32  ;;  %v1170_v62 = vld [vmem:[#allocation2 + $0x20] sm:$0xe]  ;;  %v1171_v21 = vld [vmem:[#allocation2 + $0x24] sm:$0x1]  ;;  %v1172_v22 = vld [vmem:[#allocation2 + $0x28] sm:$0xe]  ;;  %2298 = vmatmul.mubr.bf16.gmra.mxu1 %v3151_v19 }
  0xac   : > { %v1205_v23 = vsel %vm3351_vm4, %v2638_v17, %v1204_v20  ;;  %1238 = vst [vmem:[#allocation3 + $0x20] sm:$0xf] %v1201_v2  ;;  %v1173_v25 = vld [vmem:[#allocation2 + $0x2c] sm:$0x1]  ;;  %v2639_v26 = vrot.slane %v1170_v62, 9  ;;  %v1208_v27 = vrot.slane %v1171_v21, 5 }
  0xad   : > { %v2640_v35 = vrot.slane %v1172_v22, 9  ;;  %1239 = vst [vmem:[#allocation3 + $0x44] sm:$0xf] %v1205_v23  ;;  %v1212_v28 = vrot.slane %v1173_v25, 5  ;;  %v3154_v31 = vld [vmem:[#allocation3 + $0xec] ss:$36 sps:$4 sm:$0xff]  }
  0xae   : > { %v1209_v30 = vsel %vm3351_vm4, %v2639_v26, %v1208_v27  ;;  %v3156_v33 = vld [vmem:[#allocation3 + $0xe8] ss:$36 sps:$4 sm:$0xff]   ;;  %2232 = vmatprep.mubr.bf16.mxu0 %v3154_v31 }
  0xaf   : > { %v1213_v13 = vsel %vm3351_vm4, %v2640_v35, %v1212_v28  ;;  %1240 = vst [vmem:[#allocation3 + $0x68] sm:$0xf] %v1209_v30  ;;  %v3157_v34 = vld [vmem:[#allocation3 + $0xb0] ss:$36 sps:$4 sm:$0xff]   ;;  %2233 = vmatmul.mubr.bf16.gmra.mxu0 %v3156_v33 }
  0xb0   : > { %1241 = vst [vmem:[#allocation3 + $0x8c] sm:$0xf] %v1213_v13  ;;  %2992 = vmatprep.mubr.bf16.mxu1 %v3157_v34 }
  0xb1   : > { %v3158_v36 = vld [vmem:[#allocation3 + $0xf8] ss:$36 sps:$4 sm:$0xff]  }
  0xb3   : > { %2993 = vmatmul.mubr.bf16.vlgmr.msra.gmra.mxu1 %v3158_v36 }
  0xb4   : > { %v3159_v38 = vld [vmem:[#allocation3 + $0x20] ss:$36 sps:$4 sm:$0xff]  }
  0xb5   : > { %2988 = vmatprep.mubr.bf16.mxu0 %v3159_v38 }
  0xb7   : > { %v3160_v6 = vld [vmem:[#allocation3 + $0x68] ss:$36 sps:$4 sm:$0xff]  }
  0xb8   : > { %2989 = vmatmul.mubr.bf16.vlgmr.msra.gmra.mxu0 %v3160_v6 }
  0xff   : > { %v2856_v39 = vpop.f32.mrf.mxu1 }
 0x101   : > { %v2857_v41 = vpop.f32.mrf.mxu1 }
 0x102   : > { %v3698_v42 = vadd.f32 %v2857_v41, %v2856_v39 }
 0x103   : > { %v3700_v43 = vpop.f32.mrf.mxu1 }
 0x105   : > { %v3702_v44 = vpop.f32.mrf.mxu1 }
 0x108   : > { %v2816_v40 = vpop.f32.mrf.mxu0 }
 0x10a   : > { %v2817_v45 = vpop.f32.mrf.mxu0 }
 0x10b   : > { %v2818_v13 = vadd.f32 %v2817_v45, %v2816_v40 }
 0x10c   : > { %v3704_v48 = vpop.f32.mrf.mxu0 }
 0x10e   : > { %v3706_v50 = vpop.f32.mrf.mxu0 }
 0x10f   : > { %v2862_v47 = vpop.f32.mrf.mxu1 }
 0x111   : > { %v2863_v49 = vpop.f32.mrf.mxu1 }
 0x112   : > { %v2864_v38 = vadd.f32 %v2863_v49, %v2862_v47 }
 0x113   : > { %v3708_v51 = vpop.f32.mrf.mxu1 }
 0x115   : > { %v3710_v53 = vpop.f32.mrf.mxu1 }
 0x116   : > { %v2867_v47 = vadd.f32 %v3710_v53, %v3708_v51 }
 0x118   : > { %v2822_v52 = vpop.f32.mrf.mxu0 }
 0x11a   : > { %v2823_v54 = vpop.f32.mrf.mxu0 }
 0x11b   : > { %v2824_v6 = vadd.f32 %v2823_v54, %v2822_v52 }
 0x11c   : > { %v3712_v56 = vpop.f32.mrf.mxu0 }
 0x11d   : > { %v2154_v49 = vadd.f32 %v2864_v38, %v2824_v6 }
 0x11e   : > { %v2826_v58 = vpop.f32.mrf.mxu0 }
 0x11f   : > { %v2827_v52 = vadd.f32 %v2826_v58, %v3712_v56  ;;  %v2821_v56 = vadd.f32 %v3706_v50, %v3704_v48 }
 0x120   : > { %v2868_v55 = vpop.f32.mrf.mxu1 }
 0x121   : > { %v2157_v58 = vadd.f32 %v2867_v47, %v2827_v52 }
 0x122   : > { %v2869_v24 = vpop.f32.mrf.mxu1 }
 0x123   : > { %v2870_v30 = vadd.f32 %v2869_v24, %v2868_v55  ;;  %v2146_v55 = vadd.f32 %v3698_v42, %v2818_v13 }
 0x124   : > { %v2871_v7 = vpop.f32.mrf.mxu1 }
 0x126   : > { %v2872_v29 = vpop.f32.mrf.mxu1 }
 0x127   : > { %v2873_v39 = vadd.f32 %v2872_v29, %v2871_v7 }
 0x128   : > { %v2828_v57 = vpop.f32.mrf.mxu0 }
 0x12a   : > { %v2829_v59 = vpop.f32.mrf.mxu0 }
 0x12b   : > { %v2830_v31 = vadd.f32 %v2829_v59, %v2828_v57 }
 0x12c   : > { %v2831_v37 = vpop.f32.mrf.mxu0 }
 0x12e   : > { %v2832_v0 = vpop.f32.mrf.mxu0 }
 0x12f   : > { %v2833_v41 = vadd.f32 %v2832_v0, %v2831_v37 }
 0x131   : > { %v2165_v54 = vadd.f32 %v2873_v39, %v2833_v41 }
 0x135   : > { %v2874_v60 = vpop.f32.mrf.mxu1 }
 0x137   : > { %v2875_v61 = vpop.f32.mrf.mxu1 }
 0x139   : > { %v2877_v1 = vpop.f32.mrf.mxu1 }
 0x13b   : > { %v2878_v3 = vpop.f32.mrf.mxu1 }
 0x13c   : > { %v2879_v29 = vadd.f32 %v2878_v3, %v2877_v1 }
 0x13d   : > { %v3714_v5 = vpop.f32.mrf.mxu1 }
 0x13f   : > { %v2834_v4 = vpop.f32.mrf.mxu0  ;;  %v3716_v9 = vpop.f32.mrf.mxu1 }
 0x140   : > { %3821 = vst [vmem:[#allocation4_spill] sm:$0xff] %v3716_v9 }
 0x141   : > { %v2835_v8 = vpop.f32.mrf.mxu0  ;;  %v3718_v12 = vpop.f32.mrf.mxu1 }
 0x142   : > { %3822 = vst [vmem:[#allocation5_spill] sm:$0xff] %v3718_v12  ;;  %v2162_v12 = vadd.f32 %v2870_v30, %v2830_v31 }
 0x143   : > { %v2837_v10 = vpop.f32.mrf.mxu0  ;;  %v3720_v16 = vpop.f32.mrf.mxu1 }
 0x144   : > { %3823 = vst [vmem:[#allocation6_spill] sm:$0xff] %v3720_v16 }
 0x145   : > { %v2838_v11 = vpop.f32.mrf.mxu0 }
 0x147   : > { %v2896_v14 = vpop.f32.mrf.mxu0  ;;  %v3828_v1 = vld [vmem:[#allocation4_spill] sm:$0xff] }
 0x148   : > { %v2938_v3 = vadd.f32 %v3828_v1, %v3714_v5 }
 0x149   : > { %v2897_v15 = vpop.f32.mrf.mxu0 }
 0x14b   : > { %v3722_v46 = vpop.f32.mrf.mxu0  ;;  %v2942_v32 = vpop.f32.mrf.mxu1 }
 0x14c   : > { %3824 = vst [vmem:[#allocation7_spill] sm:$0xff] %v3722_v46 }
 0x14d   : > { %v2943_v17 = vpop.f32.mrf.mxu1  ;;  %v3724_v18 = vpop.f32.mrf.mxu0 }
 0x14e   : > { %3825 = vst [vmem:[#allocation8_spill] sm:$0xff] %v3724_v18  ;;  %v2861_v18 = vadd.f32 %v3702_v44, %v3700_v43  ;;  %v2898_v43 = vadd.f32 %v2897_v15, %v2896_v14  ;;  %v2944_v37 = vadd.f32 %v2943_v17, %v2942_v32 }
 0x14f   : > { %v3726_v19 = vpop.f32.mrf.mxu1 }
 0x150   : > { %3826 = vst [vmem:[#allocation9_spill] sm:$0xff] %v3726_v19  ;;  %v2836_v19 = vadd.f32 %v2835_v8, %v2834_v4  ;;  %v2211_v15 = vadd.f32 %v2898_v43, %v2146_v55 }
 0x151   : > { %v2902_v63 = vpop.f32.mrf.mxu0  ;;  %v3728_v2 = vpop.f32.mrf.mxu1 }
 0x152   : > { %3827 = vst [vmem:[#allocation10_spill] sm:$0xff] %v3728_v2  ;;  %v2876_v2 = vadd.f32 %v2875_v61, %v2874_v60  ;;  %v2839_v60 = vadd.f32 %v2838_v11, %v2837_v10 }
 0x153   : > { %v2903_v20 = vpop.f32.mrf.mxu0 }
 0x154   : > { %v2904_v46 = vadd.f32 %v2903_v20, %v2902_v63  ;;  %v2170_v59 = vadd.f32 %v2876_v2, %v2836_v19  ;;  %v2173_v14 = vadd.f32 %v2879_v29, %v2839_v60 }
 0x155   : > { %v2905_v62 = vpop.f32.mrf.mxu0 }
 0x156   : > { %v2219_v61 = vadd.f32 %v2904_v46, %v2154_v49  ;;  %v3830_v46 = vld [vmem:[#allocation8_spill] sm:$0xff] }
 0x157   : > { %v2906_v22 = vpop.f32.mrf.mxu0 }
 0x158   : > { %v2907_v8 = vadd.f32 %v2906_v22, %v2905_v62  ;;  %v2284_v2 = vadd.f32 %v2944_v37, %v2219_v61  ;;  %v3831_v62 = vld [vmem:[#allocation9_spill] sm:$0xff] }
 0x159   : > { %v2948_v21 = vpop.f32.mrf.mxu1 }
 0x15b   : > { %v2949_v23 = vpop.f32.mrf.mxu1 }
 0x15c   : > { %v2950_v24 = vadd.f32 %v2949_v23, %v2948_v21  ;;  %v3832_v21 = vld [vmem:[#allocation10_spill] sm:$0xff]  ;;  %v2222_v23 = vadd.f32 %v2907_v8, %v2157_v58 }
 0x15d   : > { %v2951_v26 = vpop.f32.mrf.mxu1  ;;  %v2947_v22 = vadd.f32 %v3832_v21, %v3831_v62 }
 0x15f   : > { %v2952_v35 = vpop.f32.mrf.mxu1 }
 0x161   : > { %v2908_v25 = vpop.f32.mrf.mxu0 }
 0x163   : > { %v2909_v27 = vpop.f32.mrf.mxu0 }
 0x164   : > { %v2910_v34 = vadd.f32 %v2909_v27, %v2908_v25  ;;  %v2149_v27 = vadd.f32 %v2861_v18, %v2821_v56 }
 0x165   : > { %v2911_v28 = vpop.f32.mrf.mxu0 }
 0x166   : > { %v2227_v57 = vadd.f32 %v2910_v34, %v2162_v12  ;;  %v2953_v12 = vadd.f32 %v2952_v35, %v2951_v26  ;;  %v3833_v34 = vld [vmem:[#allocation5_spill] sm:$0xff] }
 0x167   : > { %v2912_v36 = vpop.f32.mrf.mxu0 }
 0x168   : > { %v2913_v40 = vadd.f32 %v2912_v36, %v2911_v28  ;;  %v2292_v53 = vadd.f32 %v2950_v24, %v2227_v57  ;;  %v3834_v36 = vld [vmem:[#allocation6_spill] sm:$0xff]  ;;  %v2276_v24 = vadd.f32 %v2938_v3, %v2211_v15  ;;  %v2287_v57 = vadd.f32 %v2947_v22, %v2222_v23 }
 0x169   : > { %v2941_v38 = vadd.f32 %v3834_v36, %v3833_v34 }
 0x16a   : > { %v2230_v63 = vadd.f32 %v2913_v40, %v2165_v54 }
 0x16b   : > { %v2954_v33 = vpop.f32.mrf.mxu1 }
 0x16d   : > { %v2955_v16 = vpop.f32.mrf.mxu1 }
 0x16e   : > { %v2956_v42 = vadd.f32 %v2955_v16, %v2954_v33  ;;  %v3829_v16 = vld [vmem:[#allocation7_spill] sm:$0xff] }
 0x16f   : > { %v2957_v9 = vpop.f32.mrf.mxu1  ;;  %v2914_v45 = vpop.f32.mrf.mxu0  ;;  %v2901_v32 = vadd.f32 %v3830_v46, %v3829_v16 }
 0x171   : > { %v2958_v7 = vpop.f32.mrf.mxu1  ;;  %v2915_v44 = vpop.f32.mrf.mxu0  ;;  %v2214_v6 = vadd.f32 %v2901_v32, %v2149_v27 }
 0x172   : > { %v2916_v0 = vadd.f32 %v2915_v44, %v2914_v45  ;;  %v2959_v20 = vadd.f32 %v2958_v7, %v2957_v9  ;;  %v2295_v9 = vadd.f32 %v2953_v12, %v2230_v63 }
 0x173   : > { %v2994_v4 = vpop.f32.mrf.mxu1  ;;  %v2917_v51 = vpop.f32.mrf.mxu0  ;;  %v2279_v7 = vadd.f32 %v2941_v38, %v2214_v6 }
 0x174   : > { %v2235_v10 = vadd.f32 %v2916_v0, %v2170_v59 }
 0x175   : > { %v2356_v11 = vpop.f32.mrf.mxu1  ;;  %v2918_v19 = vpop.f32.mrf.mxu0 }
 0x176   : > { %v3742_v17 = vadd.f32 %v2356_v11, %v2292_v53  ;;  %v2300_v48 = vadd.f32 %v2956_v42, %v2235_v10  ;;  %v2919_v50 = vadd.f32 %v2918_v19, %v2917_v51 }
 0x177   : > { %v2995_v5 = vpop.f32.mrf.mxu1 }
 0x178   : > { %v2777_v25 = vpack.c.bf16 %v3742_v17, %v3742_v17  ;;  %v2990_v26 = vpop.f32.mrf.mxu0  ;;  %v2365_v35 = vadd.f32 %v2994_v4, %v2300_v48  ;;  %v2238_v28 = vadd.f32 %v2919_v50, %v2173_v14  ;;  %v2440_v58 = vmul.f32 %v3742_v17, %v3742_v17 }
 0x179   : > { %v2349_v30 = vadd.f32 %v2990_v26, %v2284_v2  ;;  %v2359_v31 = vpop.f32.mrf.mxu1  ;;  %v2420_v14 = vsel %vm2412_vm12, %v3742_v17, 0.0 }
 0x17a   : > { %2408 = vst.msk [vmem:[%s3749_s14 + $0x10] sm:$0xf] %vm465_vm6, %v2777_v25  ;;  %v2360_v33 = vadd.f32 %v2359_v31, %v2295_v9  ;;  %v2340_v13 = vpop.f32.mrf.mxu0  ;;  %v2779_v39 = vpack.c.bf16 %v2365_v35, %v2365_v35  ;;  %v2303_v41 = vadd.f32 %v2959_v20, %v2238_v28  ;;  %v2442_v19 = vmul.f32 %v2365_v35, %v2365_v35 }
 0x17b   : > { %v2775_v55 = vpack.c.bf16 %v2349_v30, %v2349_v30  ;;  %v2341_v47 = vadd.f32 %v2340_v13, %v2276_v24  ;;  %v2438_v44 = vmul.f32 %v2349_v30, %v2349_v30  ;;  %v2416_v8 = vsel %vm2412_vm12, %v2349_v30, 0.0 }
 0x17c   : > { %v2778_v18 = vpack.c.bf16 %v2360_v33, %v2360_v33  ;;  %v2991_v40 = vpop.f32.mrf.mxu0  ;;  %2410 = vst.msk [vmem:[%s3749_s14 + $0x18] sm:$0xf] %vm465_vm6, %v2779_v39  ;;  %v2368_v45 = vadd.f32 %v2995_v5, %v2303_v41  ;;  %v2441_v15 = vmul.f32 %v2360_v33, %v2360_v33  ;;  %v2451_v20 = vsel %vm2412_vm12, %v2440_v58, 0.0 }
 0x17d   : > { %2406 = vst.msk [vmem:[%s3749_s14 + $0x8] sm:$0xf] %vm465_vm6, %v2775_v55  ;;  %v2352_v49 = vadd.f32 %v2991_v40, %v2287_v57  ;;  %v2773_v29 = vpack.c.bf16 %v2341_v47, %v2341_v47  ;;  %v2436_v60 = vmul.f32 %v2341_v47, %v2341_v47  ;;  %v2413_v37 = vsel %vm2412_vm12, %v2341_v47, 0.0 }
 0x17e   : > { %2409 = vst.msk [vmem:[%s3749_s14 + $0x14] sm:$0xf] %vm465_vm6, %v2778_v18  ;;  %v2343_v52 = vpop.f32.mrf.mxu0  ;;  %v2780_v54 = vpack.c.bf16 %v2368_v45, %v2368_v45  ;;  %v2447_v1 = vsel %vm2412_vm12, %v2438_v44, 0.0  ;;  %v2422_v48 = vsel %vm2412_vm12, %v2360_v33, 0.0  ;;  %v2424_v2 = vsel %vm2412_vm12, %v2365_v35, 0.0 }
 0x17f   : > { %v2776_v59 = vpack.c.bf16 %v2352_v49, %v2352_v49  ;;  %v2344_v43 = vadd.f32 %v2343_v52, %v2279_v7  ;;  %2404 = vst.msk [vmem:[%s3749_s14] sm:$0xf] %vm465_vm6, %v2773_v29  ;;  %v2444_v12 = vsel %vm2412_vm12, %v2436_v60, 0.0  ;;  %v2439_v63 = vmul.f32 %v2352_v49, %v2352_v49 }
 0x180   : > { %2411 = vst.msk [vmem:[%s3749_s14 + $0x1c] sm:$0xf] %vm465_vm6, %v2780_v54  ;;  %v2418_v3 = vsel %vm2412_vm12, %v2352_v49, 0.0  ;;  %v2443_v62 = vmul.f32 %v2368_v45, %v2368_v45  ;;  %v2453_v21 = vsel %vm2412_vm12, %v2441_v15, 0.0  ;;  %v2455_v23 = vsel %vm2412_vm12, %v2442_v19, 0.0 }
 0x181   : > { %2407 = vst.msk [vmem:[%s3749_s14 + $0xc] sm:$0xf] %vm465_vm6, %v2776_v59  ;;  %v2774_v61 = vpack.c.bf16 %v2344_v43, %v2344_v43  ;;  %v2414_v42 = vsel %vm2412_vm12, %v2344_v43, 0.0  ;;  %v2437_v0 = vmul.f32 %v2344_v43, %v2344_v43  ;;  %v2449_v16 = vsel %vm2412_vm12, %v2439_v63, 0.0 }
 0x182   : > { %v2415_v4 = vadd.f32 %v2414_v42, %v2413_v37  ;;  %v2426_v25 = vsel %vm2412_vm12, %v2368_v45, 0.0  ;;  %v2457_v27 = vsel %vm2412_vm12, %v2443_v62, 0.0 }
 0x183   : > { %2405 = vst.msk [vmem:[%s3749_s14 + $0x4] sm:$0xf] %vm465_vm6, %v2774_v61  ;;  %v2445_v51 = vsel %vm2412_vm12, %v2437_v0, 0.0 }
 0x184   : > { %v2417_v53 = vadd.f32 %v2416_v8, %v2415_v4  ;;  %v2446_v56 = vadd.f32 %v2445_v51, %v2444_v12 }
 0x186   : > { %v2419_v10 = vadd.f32 %v2418_v3, %v2417_v53  ;;  %v2448_v11 = vadd.f32 %v2447_v1, %v2446_v56 }
 0x188   : > { %v2421_v46 = vadd.f32 %v2420_v14, %v2419_v10  ;;  %v2450_v32 = vadd.f32 %v2449_v16, %v2448_v11 }
 0x18a   : > { %v2423_v50 = vadd.f32 %v2422_v48, %v2421_v46  ;;  %v2452_v5 = vadd.f32 %v2451_v20, %v2450_v32 }
 0x18c   : > { %v2425_v22 = vadd.f32 %v2424_v2, %v2423_v50  ;;  %v2454_v17 = vadd.f32 %v2453_v21, %v2452_v5 }
 0x18e   : > { %v2427_v26 = vadd.f32 %v2426_v25, %v2425_v22  ;;  %v2456_v9 = vadd.f32 %v2455_v23, %v2454_v17 }
 0x190   : > { %v2428_v28 = vrot.slane %v2427_v26, 4  ;;  %v2458_v30 = vadd.f32 %v2457_v27, %v2456_v9 }
 0x192   : > { %v2429_v31 = vadd.f32 %v2428_v28, %v2427_v26  ;;  %v2459_v33 = vrot.slane %v2458_v30, 4 }
 0x194   : > { %v2430_v13 = vrot.slane %v2429_v31, 2  ;;  %v2460_v35 = vadd.f32 %v2459_v33, %v2458_v30 }
 0x196   : > { %v2431_v34 = vadd.f32 %v2430_v13, %v2429_v31  ;;  %v2461_v36 = vrot.slane %v2460_v35, 2 }
 0x198   : > { %v2432_v38 = vrot.slane %v2431_v34, 1  ;;  %v2462_v6 = vadd.f32 %v2461_v36, %v2460_v35 }
 0x19a   : > { %v2433_v39 = vadd.f32 %v2432_v38, %v2431_v34  ;;  %v2463_v41 = vrot.slane %v2462_v6, 1 }
 0x19c   : > { %2435 = vst.msk [vmem:[%s280_s13] sm:$0x1] %vm471_vm7, %v2433_v39  ;;  %v2464_v55 = vadd.f32 %v2463_v41, %v2462_v6 }
 0x19e   : > { %2465 = vst.msk [vmem:[%s280_s13 + $0x1] sm:$0x1] %vm471_vm7, %v2464_v55 }
 0x19f PF: > { %s16_s20 = sadd.s32 1, %s3183_s20   ;;  %s3835_s18 = smov %s3179_s19 }
 0x1a0   : > { %p13_p5 = scmp.ge.s32.totalorder %s16_s20, 4   ;;  %s3836_s19 = smov %s3838_s21 }
 0x1a2   :  { %15 = sbr.rel (!%p13_p5) target bundleno = 2 (0x2), region = 87 }

</bundles_post_ra>
